<compile_context>
chip_gen: v7x
topology: tpu7x:2x2x1
jax: 0.10.0
libtpu: 0.0.40
codegen_flags: <defaults>
</compile_context>

<pallas_src>
import functools

import jax
import jax.numpy as jnp
from jax import lax
from jax.experimental import pallas as pl
from jax.experimental.pallas import tpu as pltpu


def _block_kernel(x_ref, w1_ref, b1_ref, w2_ref, b2_ref, out_ref, pad_ref,
                  *, width, pad):
    """One M-tile of: conv1 -> bn1 -> relu -> conv2 -> bn2 -> +x -> relu.

    x_ref   : (TM, L, C) f32      input rows (channels last); also the residual
    w1_ref  : (W*C, C)  bf16      conv1 weights, BN1 scale folded, taps flattened into K
    b1_ref  : (1, 1, C) f32       folded BN1 shift
    w2_ref  : (W*C, C)  bf16      conv2 weights, BN2 scale folded
    b2_ref  : (1, 1, C) f32       folded BN2 shift
    out_ref : (TM, L, C) f32
    pad_ref : (TM, L + 2*pad, C) bf16  shared zero-padded scratch (x, then conv1 act)
    """
    TM, L, C = out_ref.shape

    # Zero only the 2*pad-wide edge strips of the shared padded scratch (the
    # interior is fully overwritten below).  Done every grid step so it stays
    # correct when the grid is sharded across TensorCores.
    if pad > 0:
        zeros_edge = jnp.zeros((TM, pad, C), pad_ref.dtype)
        pad_ref[:, :pad, :] = zeros_edge
        pad_ref[:, pad + L:, :] = zeros_edge

    x = x_ref[...]                                      # (TM, L, C) f32 residual path
    pad_ref[:, pad:pad + L, :] = x.astype(pad_ref.dtype)

    def conv(w_flat):
        # im2col: one (TM, L, W*C) bf16 operand; single matmul with K = W*C so the
        # tap accumulation happens inside the MXU (no per-tap VMEM acc round-trips).
        cols = jnp.concatenate(
            [pad_ref[:, t:t + L, :] for t in range(width)], axis=-1)
        return jnp.einsum("mlk,kd->mld", cols, w_flat,
                          preferred_element_type=jnp.float32)

    # conv1 (BN1 scale folded into w1) -> BN1 shift -> ReLU, epilogue in f32.
    h1 = jnp.maximum(conv(w1_ref[...]) + b1_ref[...], 0.0)
    # Reuse the same padded scratch for the conv2 input.
    pad_ref[:, pad:pad + L, :] = h1.astype(pad_ref.dtype)

    # conv2 (BN2 scale folded into w2) -> BN2 shift -> +identity -> ReLU (f32).
    out = conv(w2_ref[...]) + b2_ref[...] + x
    out_ref[...] = jnp.maximum(out, 0.0).astype(out_ref.dtype)


def _fold_bn(gamma, beta, mean, var, eps=1e-5):
    scale = gamma / jnp.sqrt(var + eps)
    shift = beta - mean * scale
    return scale, shift


def _tile_bytes(rows, lanes, itemsize):
    """VMEM bytes of one (rows, lanes) slab after (8, 128) tiling / padding."""
    return (-(-rows // 8) * 8) * (-(-lanes // 128) * 128) * itemsize


def _pick_tm(M, L, pad, c, width, budget_bytes):
    """Largest M-tile whose per-block VMEM working set fits the budget."""
    lpad = L + 2 * pad
    k = width * c
    per_row = (2 * _tile_bytes(L, c, 4)      # x block, double-buffered, f32
               + 2 * _tile_bytes(L, c, 4)    # out block, double-buffered, f32
               + _tile_bytes(lpad, c, 2)     # shared padded scratch, bf16
               + _tile_bytes(L, k, 2)        # im2col operand, bf16
               + 3 * _tile_bytes(L, c, 4))   # x / h1 / conv-result f32 temporaries
    tm = int(budget_bytes // per_row)
    return max(1, min(tm, M))


def _round_tm(tm, M):
    """Clamp/round the tile: >=2 grid steps (megacore), multiple of 8, divide M."""
    tm = max(1, min(int(tm), M))
    if M > 1:
        tm = min(tm, -(-M // 2))          # at least 2 grid steps (feeds both v7x TCs)
    if tm >= 8:
        tm = (tm // 8) * 8                # sublane alignment
    # Prefer a tile that divides M (no partially-masked last block); don't shrink
    # below tm//2 for it.
    for cand in range(tm, max(tm // 2, 1) - 1, -1):
        if M % cand == 0:
            return cand
    return tm


def _vmem_capacity_bytes():
    try:
        cap = getattr(pltpu.get_tpu_info(), "vmem_capacity_bytes", None)
        if cap:
            return int(cap)
    except Exception:
        pass
    return 64 * 1024 * 1024               # conservative default (v7x per-TC VMEM)


def speech_basic_block(x_nchw, params, width=9, *, tm=None, vmem_limit_bytes=None):
    """SpeechBasicBlock forward (BatchNorm in eval mode).  x_nchw: (N, C, H, L) f32."""
    assert width % 2 == 1, \
        "only odd widths / stride=1 / downsample=None supported (module defaults)"
    pad = (width - 1) // 2
    N, Cin, H, L = x_nchw.shape

    w1 = params["w1"]                     # (Cout, Cin, 1, W)   PyTorch OIHW
    w2 = params["w2"]                     # (Cout, Cout, 1, W)
    Cout = w1.shape[0]
    assert Cout == Cin, "identity residual requires inplanes == planes"

    # Fold BatchNorm (running stats) into per-channel scale/shift; fold the scale
    # into the conv weights so the kernel only applies the shift (in f32).
    s1, b1 = _fold_bn(params["g1"], params["be1"], params["m1"], params["v1"])
    s2, b2 = _fold_bn(params["g2"], params["be2"], params["m2"], params["v2"])
    # (Cout, Cin, 1, W) -> (W, Cin, Cout) -> flatten taps into K = W*Cin (matches
    # the kernel's im2col ordering), cast to bf16 for the MXU fast path.
    w1_flat = (jnp.transpose(w1[:, :, 0, :], (2, 1, 0)) * s1[None, None, :]
               ).reshape(width * Cin, Cout).astype(jnp.bfloat16)
    w2_flat = (jnp.transpose(w2[:, :, 0, :], (2, 1, 0)) * s2[None, None, :]
               ).reshape(width * Cout, Cout).astype(jnp.bfloat16)

    # NCHW -> channels-last rows (M = N*H, L, C).  The conv only mixes along L and
    # across C, so every row is independent and the kernel is gridded over M.
    M = N * H
    x_mlc = jnp.transpose(x_nchw, (0, 2, 3, 1)).reshape(M, L, Cin)

    # Generation-aware VMEM budget: limit = ~60% of physical (v5e/v6e 128 MiB ->
    # ~76 MiB, v7x 64 MiB -> ~38 MiB); tiles sized to ~85% of the limit.
    if vmem_limit_bytes is None:
        vmem_limit_bytes = min(int(_vmem_capacity_bytes() * 0.6), 96 * 1024 * 1024)
    if tm is None:
        fixed = (2 * (w1_flat.size + w2_flat.size) * 2   # double-buffered bf16 weights
                 + 2 * 2 * Cout * 4)                     # double-buffered f32 shifts
        tm = _pick_tm(M, L, pad, Cout, width,
                      max(int(vmem_limit_bytes * 0.85) - fixed, 1 << 20))
    tm = _round_tm(tm, M)
    grid = (pl.cdiv(M, tm),)

    kernel = functools.partial(_block_kernel, width=width, pad=pad)

    flops = 2 * (2 * M * L * width * Cin * Cout)         # two convs, 2 flops / MAC
    bytes_accessed = (4 * (M * L * Cin + M * L * Cout + 2 * Cout)
                      + 2 * (w1_flat.size + w2_flat.size))

    out_mlc = pl.pallas_call(
        kernel,
        out_shape=jax.ShapeDtypeStruct((M, L, Cout), jnp.float32),
        grid_spec=pltpu.PrefetchScalarGridSpec(
            num_scalar_prefetch=0,
            grid=grid,
            in_specs=[
                pl.BlockSpec((tm, L, Cin), lambda i: (i, 0, 0)),          # x rows
                pl.BlockSpec((width * Cin, Cout), lambda i: (0, 0)),      # conv1 w (flat K)
                pl.BlockSpec((1, 1, Cout), lambda i: (0, 0, 0)),          # bn1 shift
                pl.BlockSpec((width * Cout, Cout), lambda i: (0, 0)),     # conv2 w (flat K)
                pl.BlockSpec((1, 1, Cout), lambda i: (0, 0, 0)),          # bn2 shift
            ],
            out_specs=pl.BlockSpec((tm, L, Cout), lambda i: (i, 0, 0)),
            scratch_shapes=[
                pltpu.VMEM((tm, L + 2 * pad, Cin), jnp.bfloat16),  # shared padded scratch
            ],
        ),
        compiler_params=pltpu.CompilerParams(
            dimension_semantics=("parallel",),   # 2 TCs on v7x; harmless on v5e/v6e
            vmem_limit_bytes=int(vmem_limit_bytes),
        ),
        cost_estimate=pl.CostEstimate(
            flops=flops, transcendentals=0, bytes_accessed=bytes_accessed),
    )(x_mlc, w1_flat, b1.reshape(1, 1, Cout), w2_flat, b2.reshape(1, 1, Cout))

    # (M, L, C) -> NCHW
    return jnp.transpose(out_mlc.reshape(N, H, L, Cout), (0, 3, 1, 2))


def _reference(x_nchw, params, width=9):
    """Pure-JAX reference matching the PyTorch module (BN in eval mode, f32)."""
    pad = (width - 1) // 2
    dn = ("NCHW", "OIHW", "NCHW")

    def conv(x, w):
        return lax.conv_general_dilated(
            x, w, window_strides=(1, 1), padding=((0, 0), (pad, pad)),
            dimension_numbers=dn)

    def bn(x, g, b, m, v, eps=1e-5):
        g, b, m, v = (a.reshape(1, -1, 1, 1) for a in (g, b, m, v))
        return (x - m) / jnp.sqrt(v + eps) * g + b

    out = conv(x_nchw, params["w1"])
    out = jnp.maximum(bn(out, params["g1"], params["be1"], params["m1"], params["v1"]), 0.0)
    out = conv(out, params["w2"])
    out = bn(out, params["g2"], params["be2"], params["m2"], params["v2"])
    return jnp.maximum(out + x_nchw, 0.0)


if __name__ == "__main__":
    # SpeechBasicBlock(inplanes=4, planes=4, width=9, stride=1, downsample=None)
    N, C, H, L, WIDTH = 2, 4, 16, 16, 9

    key = jax.random.PRNGKey(0)
    keys = jax.random.split(key, 9)

    x = jax.random.normal(keys[0], (N, C, H, L), dtype=jnp.float32)

    params = {
        # conv weights (PyTorch OIHW: out, in, 1, width), bias=False
        "w1": 0.1 * jax.random.normal(keys[1], (C, C, 1, WIDTH), dtype=jnp.float32),
        "w2": 0.1 * jax.random.normal(keys[2], (C, C, 1, WIDTH), dtype=jnp.float32),
        # BatchNorm2d params (inference-mode running stats)
        "g1": 1.0 + 0.1 * jax.random.normal(keys[3], (C,), dtype=jnp.float32),
        "be1": 0.1 * jax.random.normal(keys[4], (C,), dtype=jnp.float32),
        "m1": 0.05 * jax.random.normal(keys[5], (C,), dtype=jnp.float32),
        "v1": 1.0 + 0.1 * jnp.abs(jax.random.normal(keys[6], (C,), dtype=jnp.float32)),
        "g2": 1.0 + 0.1 * jax.random.normal(keys[7], (C,), dtype=jnp.float32),
        "be2": 0.1 * jax.random.normal(keys[8], (C,), dtype=jnp.float32),
        "m2": jnp.zeros((C,), jnp.float32),
        "v2": jnp.ones((C,), jnp.float32),
    }

    ref = jax.block_until_ready(_reference(x, params, width=WIDTH))

    # Tolerance loosened for bf16 matmul operands (accumulation / epilogue are f32).
    TOL = dict(atol=5e-2, rtol=5e-2)

    # Auto tile size: picker + megacore clamp -> tm=16, grid=(2,).
    out = jax.block_until_ready(speech_basic_block(x, params, width=WIDTH))
    assert out.shape == (N, C, H, L)
    assert jnp.allclose(out, ref, **TOL), \
        f"max abs err {jnp.max(jnp.abs(out - ref))}"

    # Forced small tile to exercise the multi-step pipelined path (grid=(4,)).
    out_tiled = jax.block_until_ready(speech_basic_block(x, params, width=WIDTH, tm=8))
    assert jnp.allclose(out_tiled, ref, **TOL), \
        f"max abs err {jnp.max(jnp.abs(out_tiled - ref))}"

    print("KERNEL_OK")
</pallas_src>

<mosaic_0001>
module attributes {stable_mosaic.version = 11 : i64} {
  func.func @_block_kernel(%arg0: i32, %arg1: memref<16x16x4xf32, #tpu.memory_space<vmem>>, %arg2: memref<36x4xbf16, #tpu.memory_space<vmem>>, %arg3: memref<1x1x4xf32, #tpu.memory_space<vmem>>, %arg4: memref<36x4xbf16, #tpu.memory_space<vmem>>, %arg5: memref<1x1x4xf32, #tpu.memory_space<vmem>>, %arg6: memref<16x16x4xf32, #tpu.memory_space<vmem>>, %arg7: memref<16x24x4xbf16, #tpu.memory_space<vmem>>) attributes {dimension_semantics = [#tpu.dimension_semantics<parallel>], iteration_bounds = array<i64: 2>, scalar_prefetch = 0 : i64, scratch_operands = 1 : i64, tpu.core_type = #tpu.core_type<tc>, window_params = [{transform_indices = @transform_0, window_bounds = array<i64: 16, 16, 4>}, {pipeline_mode = #tpu.pipeline_mode<synchronous>, transform_indices = @transform_1, window_bounds = array<i64: 36, 4>}, {pipeline_mode = #tpu.pipeline_mode<synchronous>, transform_indices = @transform_2, window_bounds = array<i64: 1, 1, 4>}, {pipeline_mode = #tpu.pipeline_mode<synchronous>, transform_indices = @transform_3, window_bounds = array<i64: 36, 4>}, {pipeline_mode = #tpu.pipeline_mode<synchronous>, transform_indices = @transform_4, window_bounds = array<i64: 1, 1, 4>}, {transform_indices = @transform_5, window_bounds = array<i64: 16, 16, 4>}]} {
    %cst = arith.constant 0.000000e+00 : bf16
    %0 = vector.broadcast %cst : bf16 to vector<16x4x4xbf16>
    %c0 = arith.constant 0 : index
    %c0_0 = arith.constant 0 : index
    %c0_1 = arith.constant 0 : index
    %1 = vector.load %arg7[%c0, %c0_0, %c0_1] : memref<16x24x4xbf16, #tpu.memory_space<vmem>>, vector<16x4x4xbf16>
    tpu.vector_store %arg7[%c0, %c0_0, %c0_1], %0 {strides = array<i32>} : memref<16x24x4xbf16, #tpu.memory_space<vmem>>, vector<16x4x4xbf16>,
    %c0_2 = arith.constant 0 : index
    %c20 = arith.constant 20 : index
    %c0_3 = arith.constant 0 : index
    %2 = vector.load %arg7[%c0_2, %c20, %c0_3] : memref<16x24x4xbf16, #tpu.memory_space<vmem>>, vector<16x4x4xbf16>
    tpu.vector_store %arg7[%c0_2, %c20, %c0_3], %0 {strides = array<i32>} : memref<16x24x4xbf16, #tpu.memory_space<vmem>>, vector<16x4x4xbf16>,
    %c0_4 = arith.constant 0 : index
    %c0_5 = arith.constant 0 : index
    %c0_6 = arith.constant 0 : index
    %3 = vector.load %arg1[%c0_4, %c0_5, %c0_6] : memref<16x16x4xf32, #tpu.memory_space<vmem>>, vector<16x16x4xf32>
    %4 = arith.truncf %3 : vector<16x16x4xf32> to vector<16x16x4xbf16>
    %c0_7 = arith.constant 0 : index
    %c4 = arith.constant 4 : index
    %c0_8 = arith.constant 0 : index
    %5 = vector.load %arg7[%c0_7, %c4, %c0_8] : memref<16x24x4xbf16, #tpu.memory_space<vmem>>, vector<16x16x4xbf16>
    tpu.vector_store %arg7[%c0_7, %c4, %c0_8], %4 {strides = array<i32>} : memref<16x24x4xbf16, #tpu.memory_space<vmem>>, vector<16x16x4xbf16>,
    %c0_9 = arith.constant 0 : index
    %c0_10 = arith.constant 0 : index
    %6 = vector.load %arg2[%c0_9, %c0_10] : memref<36x4xbf16, #tpu.memory_space<vmem>>, vector<36x4xbf16>
    %c0_11 = arith.constant 0 : index
    %c0_12 = arith.constant 0 : index
    %c0_13 = arith.constant 0 : index
    %7 = vector.load %arg7[%c0_11, %c0_12, %c0_13] : memref<16x24x4xbf16, #tpu.memory_space<vmem>>, vector<16x16x4xbf16>
    %c0_14 = arith.constant 0 : index
    %c1 = arith.constant 1 : index
    %c0_15 = arith.constant 0 : index
    %8 = vector.load %arg7[%c0_14, %c1, %c0_15] : memref<16x24x4xbf16, #tpu.memory_space<vmem>>, vector<16x16x4xbf16>
    %c0_16 = arith.constant 0 : index
    %c2 = arith.constant 2 : index
    %c0_17 = arith.constant 0 : index
    %9 = vector.load %arg7[%c0_16, %c2, %c0_17] : memref<16x24x4xbf16, #tpu.memory_space<vmem>>, vector<16x16x4xbf16>
    %c0_18 = arith.constant 0 : index
    %c3 = arith.constant 3 : index
    %c0_19 = arith.constant 0 : index
    %10 = vector.load %arg7[%c0_18, %c3, %c0_19] : memref<16x24x4xbf16, #tpu.memory_space<vmem>>, vector<16x16x4xbf16>
    %c0_20 = arith.constant 0 : index
    %c4_21 = arith.constant 4 : index
    %c0_22 = arith.constant 0 : index
    %11 = vector.load %arg7[%c0_20, %c4_21, %c0_22] : memref<16x24x4xbf16, #tpu.memory_space<vmem>>, vector<16x16x4xbf16>
    %c0_23 = arith.constant 0 : index
    %c5 = arith.constant 5 : index
    %c0_24 = arith.constant 0 : index
    %12 = vector.load %arg7[%c0_23, %c5, %c0_24] : memref<16x24x4xbf16, #tpu.memory_space<vmem>>, vector<16x16x4xbf16>
    %c0_25 = arith.constant 0 : index
    %c6 = arith.constant 6 : index
    %c0_26 = arith.constant 0 : index
    %13 = vector.load %arg7[%c0_25, %c6, %c0_26] : memref<16x24x4xbf16, #tpu.memory_space<vmem>>, vector<16x16x4xbf16>
    %c0_27 = arith.constant 0 : index
    %c7 = arith.constant 7 : index
    %c0_28 = arith.constant 0 : index
    %14 = vector.load %arg7[%c0_27, %c7, %c0_28] : memref<16x24x4xbf16, #tpu.memory_space<vmem>>, vector<16x16x4xbf16>
    %c0_29 = arith.constant 0 : index
    %c8 = arith.constant 8 : index
    %c0_30 = arith.constant 0 : index
    %15 = vector.load %arg7[%c0_29, %c8, %c0_30] : memref<16x24x4xbf16, #tpu.memory_space<vmem>>, vector<16x16x4xbf16>
    %16 = tpu.concatenate %7, %8, %9, %10, %11, %12, %13, %14, %15 in 2 : vector<16x16x4xbf16>, vector<16x16x4xbf16>, vector<16x16x4xbf16>, vector<16x16x4xbf16>, vector<16x16x4xbf16>, vector<16x16x4xbf16>, vector<16x16x4xbf16>, vector<16x16x4xbf16>, vector<16x16x4xbf16> -> vector<16x16x36xbf16>
    "tpu.trace_start"() <{level = 10 : i32, message = "mlk,kd->mld"}> : () -> ()
    %cst_31 = arith.constant dense<0.000000e+00> : vector<16x16x4xf32>
    %17 = tpu.matmul %16, %6, %cst_31 {dimension_numbers = #tpu.dot_dimension_numbers<[2], [0], [0, 1], [1], [0, 0, 0, 1, 1, 1], [], []>} : vector<16x16x36xbf16>, vector<36x4xbf16>, vector<16x16x4xf32> -> vector<16x16x4xf32>
    "tpu.trace_stop"() : () -> ()
    %c0_32 = arith.constant 0 : index
    %c0_33 = arith.constant 0 : index
    %c0_34 = arith.constant 0 : index
    %18 = vector.load %arg3[%c0_32, %c0_33, %c0_34] : memref<1x1x4xf32, #tpu.memory_space<vmem>>, vector<1x1x4xf32>
    %19 = vector.broadcast %18 : vector<1x1x4xf32> to vector<16x16x4xf32>
    %20 = arith.addf %17, %19 : vector<16x16x4xf32>
    %cst_35 = arith.constant 0.000000e+00 : f32
    %21 = vector.broadcast %cst_35 : f32 to vector<16x16x4xf32>
    %22 = arith.maximumf %20, %21 : vector<16x16x4xf32>
    %23 = arith.truncf %22 : vector<16x16x4xf32> to vector<16x16x4xbf16>
    %c0_36 = arith.constant 0 : index
    %c4_37 = arith.constant 4 : index
    %c0_38 = arith.constant 0 : index
    %24 = vector.load %arg7[%c0_36, %c4_37, %c0_38] : memref<16x24x4xbf16, #tpu.memory_space<vmem>>, vector<16x16x4xbf16>
    tpu.vector_store %arg7[%c0_36, %c4_37, %c0_38], %23 {strides = array<i32>} : memref<16x24x4xbf16, #tpu.memory_space<vmem>>, vector<16x16x4xbf16>,
    %c0_39 = arith.constant 0 : index
    %c0_40 = arith.constant 0 : index
    %25 = vector.load %arg4[%c0_39, %c0_40] : memref<36x4xbf16, #tpu.memory_space<vmem>>, vector<36x4xbf16>
    %c0_41 = arith.constant 0 : index
    %c0_42 = arith.constant 0 : index
    %c0_43 = arith.constant 0 : index
    %26 = vector.load %arg7[%c0_41, %c0_42, %c0_43] : memref<16x24x4xbf16, #tpu.memory_space<vmem>>, vector<16x16x4xbf16>
    %c0_44 = arith.constant 0 : index
    %c1_45 = arith.constant 1 : index
    %c0_46 = arith.constant 0 : index
    %27 = vector.load %arg7[%c0_44, %c1_45, %c0_46] : memref<16x24x4xbf16, #tpu.memory_space<vmem>>, vector<16x16x4xbf16>
    %c0_47 = arith.constant 0 : index
    %c2_48 = arith.constant 2 : index
    %c0_49 = arith.constant 0 : index
    %28 = vector.load %arg7[%c0_47, %c2_48, %c0_49] : memref<16x24x4xbf16, #tpu.memory_space<vmem>>, vector<16x16x4xbf16>
    %c0_50 = arith.constant 0 : index
    %c3_51 = arith.constant 3 : index
    %c0_52 = arith.constant 0 : index
    %29 = vector.load %arg7[%c0_50, %c3_51, %c0_52] : memref<16x24x4xbf16, #tpu.memory_space<vmem>>, vector<16x16x4xbf16>
    %c0_53 = arith.constant 0 : index
    %c4_54 = arith.constant 4 : index
    %c0_55 = arith.constant 0 : index
    %30 = vector.load %arg7[%c0_53, %c4_54, %c0_55] : memref<16x24x4xbf16, #tpu.memory_space<vmem>>, vector<16x16x4xbf16>
    %c0_56 = arith.constant 0 : index
    %c5_57 = arith.constant 5 : index
    %c0_58 = arith.constant 0 : index
    %31 = vector.load %arg7[%c0_56, %c5_57, %c0_58] : memref<16x24x4xbf16, #tpu.memory_space<vmem>>, vector<16x16x4xbf16>
    %c0_59 = arith.constant 0 : index
    %c6_60 = arith.constant 6 : index
    %c0_61 = arith.constant 0 : index
    %32 = vector.load %arg7[%c0_59, %c6_60, %c0_61] : memref<16x24x4xbf16, #tpu.memory_space<vmem>>, vector<16x16x4xbf16>
    %c0_62 = arith.constant 0 : index
    %c7_63 = arith.constant 7 : index
    %c0_64 = arith.constant 0 : index
    %33 = vector.load %arg7[%c0_62, %c7_63, %c0_64] : memref<16x24x4xbf16, #tpu.memory_space<vmem>>, vector<16x16x4xbf16>
    %c0_65 = arith.constant 0 : index
    %c8_66 = arith.constant 8 : index
    %c0_67 = arith.constant 0 : index
    %34 = vector.load %arg7[%c0_65, %c8_66, %c0_67] : memref<16x24x4xbf16, #tpu.memory_space<vmem>>, vector<16x16x4xbf16>
    %35 = tpu.concatenate %26, %27, %28, %29, %30, %31, %32, %33, %34 in 2 : vector<16x16x4xbf16>, vector<16x16x4xbf16>, vector<16x16x4xbf16>, vector<16x16x4xbf16>, vector<16x16x4xbf16>, vector<16x16x4xbf16>, vector<16x16x4xbf16>, vector<16x16x4xbf16>, vector<16x16x4xbf16> -> vector<16x16x36xbf16>
    "tpu.trace_start"() <{level = 10 : i32, message = "mlk,kd->mld"}> : () -> ()
    %cst_68 = arith.constant dense<0.000000e+00> : vector<16x16x4xf32>
    %36 = tpu.matmul %35, %25, %cst_68 {dimension_numbers = #tpu.dot_dimension_numbers<[2], [0], [0, 1], [1], [0, 0, 0, 1, 1, 1], [], []>} : vector<16x16x36xbf16>, vector<36x4xbf16>, vector<16x16x4xf32> -> vector<16x16x4xf32>
    "tpu.trace_stop"() : () -> ()
    %c0_69 = arith.constant 0 : index
    %c0_70 = arith.constant 0 : index
    %c0_71 = arith.constant 0 : index
    %37 = vector.load %arg5[%c0_69, %c0_70, %c0_71] : memref<1x1x4xf32, #tpu.memory_space<vmem>>, vector<1x1x4xf32>
    %38 = vector.broadcast %37 : vector<1x1x4xf32> to vector<16x16x4xf32>
    %39 = arith.addf %36, %38 : vector<16x16x4xf32>
    %40 = arith.addf %39, %3 : vector<16x16x4xf32>
    %cst_72 = arith.constant 0.000000e+00 : f32
    %41 = vector.broadcast %cst_72 : f32 to vector<16x16x4xf32>
    %42 = arith.maximumf %40, %41 : vector<16x16x4xf32>
    %c0_73 = arith.constant 0 : index
    %c0_74 = arith.constant 0 : index
    %c0_75 = arith.constant 0 : index
    %43 = vector.load %arg6[%c0_73, %c0_74, %c0_75] : memref<16x16x4xf32, #tpu.memory_space<vmem>>, vector<16x16x4xf32>
    tpu.vector_store %arg6[%c0_73, %c0_74, %c0_75], %42 {strides = array<i32>} : memref<16x16x4xf32, #tpu.memory_space<vmem>>, vector<16x16x4xf32>,
    return
  }
  func.func @transform_0(%arg0: i32) -> (i32, i32, i32) {
    %c0_i32 = arith.constant 0 : i32
    %c0_i32_0 = arith.constant 0 : i32
    %c0_i32_1 = arith.constant 0 : i32
    return %arg0, %c0_i32, %c0_i32_0 : i32, i32, i32
  }
  func.func @transform_1(%arg0: i32) -> (i32, i32) {
    %c0_i32 = arith.constant 0 : i32
    %c0_i32_0 = arith.constant 0 : i32
    %c0_i32_1 = arith.constant 0 : i32
    return %c0_i32, %c0_i32_0 : i32, i32
  }
  func.func @transform_2(%arg0: i32) -> (i32, i32, i32) {
    %c0_i32 = arith.constant 0 : i32
    %c0_i32_0 = arith.constant 0 : i32
    %c0_i32_1 = arith.constant 0 : i32
    %c0_i32_2 = arith.constant 0 : i32
    return %c0_i32, %c0_i32_0, %c0_i32_1 : i32, i32, i32
  }
  func.func @transform_3(%arg0: i32) -> (i32, i32) {
    %c0_i32 = arith.constant 0 : i32
    %c0_i32_0 = arith.constant 0 : i32
    %c0_i32_1 = arith.constant 0 : i32
    return %c0_i32, %c0_i32_0 : i32, i32
  }
  func.func @transform_4(%arg0: i32) -> (i32, i32, i32) {
    %c0_i32 = arith.constant 0 : i32
    %c0_i32_0 = arith.constant 0 : i32
    %c0_i32_1 = arith.constant 0 : i32
    %c0_i32_2 = arith.constant 0 : i32
    return %c0_i32, %c0_i32_0, %c0_i32_1 : i32, i32, i32
  }
  func.func @transform_5(%arg0: i32) -> (i32, i32, i32) {
    %c0_i32 = arith.constant 0 : i32
    %c0_i32_0 = arith.constant 0 : i32
    %c0_i32_1 = arith.constant 0 : i32
    return %arg0, %c0_i32, %c0_i32_0 : i32, i32, i32
  }
}

</mosaic_0001>

<bundles_post_ra>
// kernel: tpu_custom_call.1
= control target key start
LH: loop header
LB: loop body
LE: loop exit
PB: predicated region body
PF: predicated region fallthrough
CT: control target
= control target key end

     0   :  { %s6871_s18 = smov 0   ;;  %s9516_s0 = inlined_call_operand.vmem [shape: f32[32,16,4], index: 0, kind: input, shape index: {}]   ;;  %s9517_s1 = inlined_call_operand.vmem [shape: bf16[36,4], index: 1, kind: input, shape index: {}]   ;;  %s9518_s2 = inlined_call_operand.vmem [shape: f32[1,1,4], index: 2, kind: input, shape index: {}]   ;;  %s9519_s3 = inlined_call_operand.vmem [shape: bf16[36,4], index: 3, kind: input, shape index: {}]   ;;  %s9520_s4 = inlined_call_operand.vmem [shape: f32[1,1,4], index: 4, kind: input, shape index: {}]   ;;  %s9521_s5 = inlined_call_operand.vmem [shape: f32[32,16,4], index: 5, kind: output, shape index: {}]  }
   0x1 LB: > { %s5977_s19 = sadd.s32 4294967295, %s6830_s18   ;;  %p5981_p0 = scmp.ge.s32.totalorder %s6830_s18, 1  ;;  %s6830_s18 = sphi %s6871_s18, %s15_s18  }
   0x2   : > { %p189_p1 = scmp.lt.s32.totalorder %s6830_s18, 3 }
   0x4   : > { %p190_p2 = pnand %p5981_p0, %p189_p1 }
   0x5   : > { %s6879_s20 = sshll.u32 (!%p190_p2), %s5977_s19, 4  ;;  %vm9524_vm0 = vcmask (!%p190_p2), 25600   ;;  %vm9523_vm1 = vcmask (!%p190_p2), 27650   ;;  %v6832_v0 = vmov (!%p190_p2), 0   ;;  %vm9522_vm2 = vcmask (!%p190_p2), 1041408   ;;  %s6833_s25 = smov (!%p190_p2), 32  }
   0x6   : > { %193 = sbr.rel (%p190_p2) target bundleno = 1061 (0x425), region = 40  ;;  %p220_p3 = scmp.lt.s32.totalorder (!%p190_p2), %s6879_s20, 31  ;;  %252 = vst.msk [vmem:[#allocation2 + $0x8] sm:$0xc] (!%p190_p2), %vm9523_vm1, %v6832_v0  ;;  %253 = vst.msk [vmem:[#allocation2 + $0x14] sm:$0xc] (!%p190_p2), %vm9523_vm1, %v6832_v0 }
   0x7   : > { %235 = vst.msk [vmem:[#allocation2] sm:$0x3] (!%p190_p2), %vm9524_vm0, %v6832_v0  ;;  %236 = vst.msk [vmem:[#allocation2 + $0xc] sm:$0x3] (!%p190_p2), %vm9524_vm0, %v6832_v0  ;;  %vm397_vm3 = vcmask (!%p190_p2), 1045508   ;;  %vm9530_vm4 = vcmask (!%p190_p2), 27648  }
   0x8   : > { %237 = vst.msk [vmem:[#allocation2 + $0x18] sm:$0x3] (!%p190_p2), %vm9524_vm0, %v6832_v0  ;;  %238 = vst.msk [vmem:[#allocation2 + $0x24] sm:$0x3] (!%p190_p2), %vm9524_vm0, %v6832_v0  ;;  %vm9526_vm6 = vcmask (!%p190_p2), 1046528   ;;  %vm1608_vm7 = vcmask (!%p190_p2), 1045504  }
   0x9   : > { %239 = vst.msk [vmem:[#allocation2 + $0x30] sm:$0x3] (!%p190_p2), %vm9524_vm0, %v6832_v0  ;;  %240 = vst.msk [vmem:[#allocation2 + $0x3c] sm:$0x3] (!%p190_p2), %vm9524_vm0, %v6832_v0  ;;  %vm9527_vm8 = vcmask (!%p190_p2), 1044480   ;;  %s6834_s26 = smov (!%p190_p2), 8  }
   0xa   : > { %241 = vst.msk [vmem:[#allocation2 + $0x48] sm:$0x3] (!%p190_p2), %vm9524_vm0, %v6832_v0  ;;  %242 = vst.msk [vmem:[#allocation2 + $0x54] sm:$0x3] (!%p190_p2), %vm9524_vm0, %v6832_v0  ;;  %vm1255_vm9 = vsmask.f32 (!%p190_p2), 6400 }
   0xb   : > { %243 = vst.msk [vmem:[#allocation2 + $0x60] sm:$0x3] (!%p190_p2), %vm9524_vm0, %v6832_v0  ;;  %244 = vst.msk [vmem:[#allocation2 + $0x6c] sm:$0x3] (!%p190_p2), %vm9524_vm0, %v6832_v0  ;;  %vm9525_vm10 = vsmask.f32 (!%p190_p2), 7424 }
   0xc   : > { %245 = vst.msk [vmem:[#allocation2 + $0x78] sm:$0x3] (!%p190_p2), %vm9524_vm0, %v6832_v0  ;;  %246 = vst.msk [vmem:[#allocation2 + $0x84] sm:$0x3] (!%p190_p2), %vm9524_vm0, %v6832_v0  ;;  %s6835_s27 = smov (!%p190_p2), 16   ;;  %s6836_s28 = smov (!%p190_p2), 24  }
   0xd   : > { %247 = vst.msk [vmem:[#allocation2 + $0x90] sm:$0x3] %vm9524_vm0, %v6832_v0  ;;  %248 = vst.msk [vmem:[#allocation2 + $0x9c] sm:$0x3] %vm9524_vm0, %v6832_v0  ;;  %s9758_s20 = smov (!%p220_p3, %s6879_s20), 31  ;;  %s6837_s6 = smov 4  }
   0xe   : > { %249 = vst.msk [vmem:[#allocation2 + $0xa8] sm:$0x3] %vm9524_vm0, %v6832_v0  ;;  %250 = vst.msk [vmem:[#allocation2 + $0xb4] sm:$0x3] %vm9524_vm0, %v6832_v0  ;;  %s6382_s21 = sshll.u32 %s9758_s20, 4  ;;  %s6838_s7 = smov 12  }
   0xf   : > { %254 = vst.msk [vmem:[#allocation2 + $0x20] sm:$0xc] %vm9523_vm1, %v6832_v0  ;;  %255 = vst.msk [vmem:[#allocation2 + $0x2c] sm:$0xc] %vm9523_vm1, %v6832_v0  ;;  %s6925_s24 = scalar_lea.vmem %s9516_s0, %s6382_s21  ;;  %vm9528_vm11 = vsmask.f32 5376 }
  0x10   : > { %256 = vst.msk [vmem:[#allocation2 + $0x38] sm:$0xc] %vm9523_vm1, %v6832_v0  ;;  %257 = vst.msk [vmem:[#allocation2 + $0x44] sm:$0xc] %vm9523_vm1, %v6832_v0  ;;  %v268_v1 = vld [vmem:[%s6925_s24] sm:$0xff]  ;;  %v269_v2 = vld [vmem:[%s6925_s24 + $0x8] sm:$0xff] }
  0x11   : > { %258 = vst.msk [vmem:[#allocation2 + $0x50] sm:$0xc] %vm9523_vm1, %v6832_v0  ;;  %259 = vst.msk [vmem:[#allocation2 + $0x5c] sm:$0xc] %vm9523_vm1, %v6832_v0  ;;  %v270_v3 = vld [vmem:[%s6925_s24 + $0x10] sm:$0xff]  ;;  %v6384_v4 = vpack.c.bf16 %v268_v1, %v268_v1  ;;  %v6385_v5 = vpack.c.bf16 %v269_v2, %v269_v2  ;;  %v271_v6 = vld [vmem:[%s6925_s24 + $0x18] sm:$0xff] }
  0x12   : > { %260 = vst.msk [vmem:[#allocation2 + $0x68] sm:$0xc] %vm9523_vm1, %v6832_v0  ;;  %261 = vst.msk [vmem:[#allocation2 + $0x74] sm:$0xc] %vm9523_vm1, %v6832_v0  ;;  %v6386_v7 = vpack.c.bf16 %v270_v3, %v270_v3  ;;  %v272_v8 = vld [vmem:[%s6925_s24 + $0x20] sm:$0xff]  ;;  %v273_v9 = vld [vmem:[%s6925_s24 + $0x28] sm:$0xff]  ;;  %v6387_v10 = vpack.c.bf16 %v271_v6, %v271_v6 }
  0x13   : > { %262 = vst.msk [vmem:[#allocation2 + $0x80] sm:$0xc] %vm9523_vm1, %v6832_v0  ;;  %263 = vst.msk [vmem:[#allocation2 + $0x8c] sm:$0xc] %vm9523_vm1, %v6832_v0  ;;  %v6388_v11 = vpack.c.bf16 %v272_v8, %v272_v8  ;;  %v6389_v12 = vpack.c.bf16 %v273_v9, %v273_v9  ;;  %v274_v13 = vld [vmem:[%s6925_s24 + $0x30] sm:$0xff]  ;;  %v275_v14 = vld [vmem:[%s6925_s24 + $0x38] sm:$0xff] }
  0x14   : > { %264 = vst.msk [vmem:[#allocation2 + $0x98] sm:$0xc] %vm9523_vm1, %v6832_v0  ;;  %265 = vst.msk [vmem:[#allocation2 + $0xa4] sm:$0xc] %vm9523_vm1, %v6832_v0  ;;  %v399_v15 = vrot.slane %v6384_v4, 6  ;;  %v401_v16 = vrot.slane %v6385_v5, 6  ;;  %v6390_v18 = vpack.c.bf16 %v274_v13, %v274_v13  ;;  %v6391_v23 = vpack.c.bf16 %v275_v14, %v275_v14 }
  0x15   : > { %266 = vst.msk [vmem:[#allocation2 + $0xb0] sm:$0xc] %vm9523_vm1, %v6832_v0  ;;  %267 = vst.msk [vmem:[#allocation2 + $0xbc] sm:$0xc] %vm9523_vm1, %v6832_v0  ;;  %v404_v17 = vrot.slane %v6386_v7, 6  ;;  %v406_v20 = vrot.slane %v6387_v10, 6 }
  0x16   : > { %vm6937_vm5 = vmor %vm9522_vm2, %vm397_vm3  ;;  %v409_v21 = vrot.slane %v6388_v11, 6  ;;  %v411_v22 = vrot.slane %v6389_v12, 6  ;;  %v276_v24 = vld [vmem:[%s6925_s24 + $0x40] sm:$0xff]  ;;  %v400_v25 = vrot.slane %v399_v15, 4  ;;  %v403_v26 = vrot.slane %v401_v16, 4  ;;  %v277_v29 = vld [vmem:[%s6925_s24 + $0x48] sm:$0xff] }
  0x17   : > { %527 = vst.msk [vmem:[#allocation2] sm:$0xc] %vm9523_vm1, %v399_v15  ;;  %v405_v27 = vrot.slane %v404_v17, 4  ;;  %531 = vst.msk [vmem:[#allocation2 + $0xc] sm:$0xc] %vm9523_vm1, %v404_v17  ;;  %v414_v28 = vrot.slane %v6390_v18, 6  ;;  %v6392_v39 = vpack.c.bf16 %v276_v24, %v276_v24  ;;  %v6393_v42 = vpack.c.bf16 %v277_v29, %v277_v29 }
  0x18   : > { %v278_v30 = vld [vmem:[%s6925_s24 + $0x50] sm:$0xff]  ;;  %v408_v31 = vrot.slane %v406_v20, 4  ;;  %v410_v32 = vrot.slane %v409_v21, 4  ;;  %v413_v33 = vrot.slane %v411_v22, 4  ;;  %534 = vst.msk [vmem:[#allocation2 + $0x18] sm:$0xc] %vm9523_vm1, %v409_v21  ;;  %v402_v36 = vsel %vm6937_vm5, %v400_v25, %v401_v16 }
  0x19   : > { %v416_v34 = vrot.slane %v6391_v23, 6  ;;  %v280_v35 = vld [vmem:[%s6925_s24 + $0x60] sm:$0xff]  ;;  %530 = vst.msk [vmem:[#allocation2 + $0x8] sm:$0x3] %vm9524_vm0, %v403_v26  ;;  %v407_v37 = vsel %vm6937_vm5, %v405_v27, %v406_v20  ;;  %v415_v38 = vrot.slane %v414_v28, 4  ;;  %v6394_v43 = vpack.c.bf16 %v278_v30, %v278_v30  ;;  %s6839_s10 = smov 20  }
  0x1a   : > { %537 = vst.msk [vmem:[#allocation2 + $0x24] sm:$0xc] %vm9523_vm1, %v414_v28  ;;  %v412_v40 = vsel %vm6937_vm5, %v410_v32, %v411_v22  ;;  %v419_v45 = vrot.slane %v6392_v39, 6  ;;  %v6396_v46 = vpack.c.bf16 %v280_v35, %v280_v35  ;;  %v421_v47 = vrot.slane %v6393_v42, 6  ;;  %s6840_s11 = smov 28  }
  0x1b   : > { %529 = vst.msk [vmem:[#allocation2 + $0x4] sm:$0xf] %vm9530_vm4, %v402_v36  ;;  %532 = vst.msk [vmem:[#allocation2 + $0x10] sm:$0xf] %vm9530_vm4, %v407_v37  ;;  %v418_v41 = vrot.slane %v416_v34, 4  ;;  %v417_v44 = vsel %vm6937_vm5, %v415_v38, %v416_v34  ;;  %v6965_v48 = vrot.slane %v6394_v43, 6 }
  0x1c   : > { %533 = vst.msk [vmem:[#allocation2 + $0x14] sm:$0x3] %vm9524_vm0, %v408_v31  ;;  %536 = vst.msk [vmem:[#allocation2 + $0x20] sm:$0x3] %vm9524_vm0, %v413_v33  ;;  %v420_v49 = vrot.slane %v419_v45, 4  ;;  %v6968_v50 = vrot.slane %v6396_v46, 6 }
  0x1d   : > { %535 = vst.msk [vmem:[#allocation2 + $0x1c] sm:$0xf] %vm9530_vm4, %v412_v40  ;;  %538 = vst.msk [vmem:[#allocation2 + $0x28] sm:$0xf] %vm9530_vm4, %v417_v44  ;;  %v423_v62 = vrot.slane %v421_v47, 4  ;;  %vm9529_vm13 = vcmask 31744  }
  0x1e   : > { %539 = vst.msk [vmem:[#allocation2 + $0x2c] sm:$0x3] %vm9524_vm0, %v418_v41  ;;  %v629_v51 = vld [vmem:[#allocation2] sm:$0xe]  ;;  %v630_v52 = vld [vmem:[#allocation2 + $0xc] sm:$0xe]  ;;  %v422_v55 = vsel %vm6937_vm5, %v420_v49, %v421_v47 }
  0x1f   : > { %540 = vst.msk [vmem:[#allocation2 + $0x30] sm:$0xc] %vm9523_vm1, %v419_v45  ;;  %543 = vst.msk [vmem:[#allocation2 + $0x3c] sm:$0xc] %vm9523_vm1, %v6965_v48  ;;  %v661_v53 = vld [vmem:[#allocation2] sm:$0xc] }
  0x20   : > { %v693_v54 = vld [vmem:[#allocation2] sm:$0x8]  ;;  %546 = vst.msk [vmem:[#allocation2 + $0x48] sm:$0xc] %vm9523_vm1, %v6968_v50  ;;  %v709_v56 = vld [vmem:[#allocation2 + $0x8] sm:$0xf] }
  0x21   : > { %v662_v57 = vld [vmem:[#allocation2 + $0xc] sm:$0xc]  ;;  %541 = vst.msk [vmem:[#allocation2 + $0x34] sm:$0xf] %vm9530_vm4, %v422_v55  ;;  %v6977_v60 = vcombine.low %v709_v56, %v709_v56  ;;  %v581_v34 = vld [vmem:[#allocation2] sm:$0xf] }
  0x22   : > { %v694_v58 = vld [vmem:[#allocation2 + $0xc] sm:$0x8]  ;;  %v582_v59 = vld [vmem:[#allocation2 + $0x4] sm:$0xf]  ;;  %v584_v1 = vld [vmem:[#allocation2 + $0x10] sm:$0xf] }
  0x23   : > { %v6583_v61 = vld [vmem:[#allocation2 + $0x8] ss:$0 sps:$4 sm:$0x11]   ;;  %v6148_v63 = vcombine.low %v582_v59, %v709_v56  ;;  %v6979_v0 = vcombine.low %v629_v51, %v582_v59  ;;  %v710_v2 = vld [vmem:[#allocation2 + $0x14] sm:$0xf]  ;;  %v6981_v3 = vcombine.low %v661_v53, %v582_v59  ;;  %v6983_v4 = vcombine.low %v693_v54, %v582_v59 }
  0x24   : > { %v2229_v5 = vshrl.u32 %v6977_v60, 16  ;;  %v2232_v6 = vshll.u32 %v6977_v60, 16  ;;  %v1128_v7 = vrot.slane %v6583_v61, 1  ;;  %v6987_v8 = vld [vmem:[#allocation2 + $0x14] ss:$0 sps:$4 sm:$0x11]   ;;  %v6149_v10 = vcombine.low %v584_v1, %v710_v2 }
  0x25   : > { %542 = vst.msk [vmem:[#allocation2 + $0x38] sm:$0x3] %vm9524_vm0, %v423_v62  ;;  %2540 = vrot.lane.b32.xlu0 %v6148_v63, %s6833_s25  ;;  %v1127_v9 = vrot.slane %v6979_v0, 1  ;;  %v6053_v11 = vcombine.low %v630_v52, %v584_v1  ;;  %v6992_v12 = vld [vmem:[#allocation2 + $0x8] ss:$0 sps:$4 sm:$0x33]   ;;  %v6085_v16 = vcombine.low %v662_v57, %v584_v1  ;;  %v6996_v17 = vcombine.low %v694_v58, %v584_v1 }
  0x26   : > { %v1609_v13 = vrot.slane %v6981_v3, 2  ;;  %v1131_v14 = vrot.slane %v6987_v8, 1  ;;  %v6588_v15 = vld [vmem:[#allocation2 + $0x14] ss:$0 sps:$4 sm:$0x33]   ;;  %v1610_v21 = vrot.slane %v6992_v12, 2  ;;  %v7005_v27 = vcombine.low %v710_v2, %v710_v2 }
  0x27   : > { %v1129_v18 = vsel %vm9526_vm6, %v1127_v9, %v1128_v7  ;;  %v1130_v20 = vrot.slane %v6053_v11, 1  ;;  %v2091_v22 = vrot.slane %v6983_v4, 3  ;;  %v1612_v23 = vrot.slane %v6085_v16, 2  ;;  %v7002_v25 = vld [vmem:[#allocation2 + $0x8] ss:$0 sps:$4 sm:$0x77]  }
  0x28   : > { %1175 = vrot.lane.b32.xlu1 %v1129_v18, %s6834_s26  ;;  %v1613_v24 = vrot.slane %v6588_v15, 2  ;;  %v2094_v26 = vrot.slane %v6996_v17, 3  ;;  %v1611_v29 = vsel %vm1608_vm7, %v1609_v13, %v1610_v21  ;;  %v6590_v30 = vld [vmem:[#allocation2 + $0x14] ss:$0 sps:$4 sm:$0x77]   ;;  %v862_v31 = vshll.u32 %v6583_v61, 16 }
  0x29   : > { %2542 = vrot.lane.b32.xlu0 %v6149_v10, %s6833_s25  ;;  %v1132_v28 = vsel %vm9526_vm6, %v1130_v20, %v1131_v14  ;;  %v2092_v33 = vrot.slane %v7002_v25, 3  ;;  %v1274_v35 = vshrl.u32 %v6053_v11, 16  ;;  %v1277_v36 = vshll.u32 %v6053_v11, 16  ;;  %v583_v41 = vld [vmem:[#allocation2 + $0xc] sm:$0xf] }
  0x2a   : > { %v1614_v32 = vsel %vm1608_vm7, %v1612_v23, %v1613_v24  ;;  %v2095_v37 = vrot.slane %v6590_v30, 3  ;;  %v7012_v38 = vcombine.low %v581_v34, %v582_v59  ;;  %v864_v39 = vrot.slane %v862_v31, 1 }
  0x2b   : > { %v1282_v40 = vshrl.u32 %v6588_v15, 16  ;;  %v2093_v42 = vsel %vm9527_vm8, %v2091_v22, %v2092_v33  ;;  %v1276_v43 = vrot.slane %v1274_v35, 1  ;;  %v1279_v44 = vrot.slane %v1277_v36, 2  ;;  %v7042_v35 = vld [vmem:[#allocation2 + $0x1c] sm:$0xf] }
  0x2c   : > { %1177 = vrot.lane.b32.xlu1 %v1132_v28, %s6834_s26  ;;  %v1285_v45 = vshll.u32 %v6588_v15, 16  ;;  %v2096_v46 = vsel %vm9527_vm8, %v2094_v26, %v2095_v37  ;;  %v855_v47 = vshrl.u32 %v7012_v38, 16  ;;  %v857_v49 = vshll.u32 %v7012_v38, 16  ;;  %v6636_v26 = vld [vmem:[%s9517_s1] sm:$0xff]  }
  0x2d   : > { %1657 = vrot.lane.b32.xlu0 %v1611_v29, %s6835_s27  ;;  %v1284_v51 = vrot.slane %v1282_v40, 1  ;;  %v1280_v52 = vor.u32 %v1279_v44, %v1276_v43  ;;  %v7020_v54 = vcombine.low %v583_v41, %v584_v1  ;;  %v874_v55 = vshll.u32 %v6987_v8, 16  ;;  %6486 = vmatprep.subr.bf16.mxu0 %v6636_v26  ;;  %v7045_v41 = vld [vmem:[#allocation2 + $0x20] ss:$0 sps:$4 sm:$0x11]  }
  0x2e   : > { %v1287_v53 = vrot.slane %v1285_v45, 2  ;;  %v859_v56 = vrot.slane %v857_v49, 1  ;;  %v1756_v57 = vshrl.u32 %v6085_v16, 16  ;;  %v1759_v58 = vshll.u32 %v6085_v16, 16  ;;  %6487 = vmatpush3.bf16.msra.mxu0 %v6636_v26  ;;  %v6638_v49 = vld [vmem:[%s9517_s1 + $0x8] sm:$0xff]  }
  0x2f   : > { %v1764_v59 = vshrl.u32 %v6590_v30, 16  ;;  %v867_v62 = vshrl.u32 %v7020_v54, 16  ;;  %v869_v63 = vshll.u32 %v7020_v54, 16  ;;  %v876_v2 = vrot.slane %v874_v55, 1  ;;  %6488 = vmatprep.subr.bf16.mxu0 %v6638_v49 }
  0x30   : > { %1659 = vrot.lane.b32.xlu1 %v1614_v32, %s6835_s27  ;;  %v1288_v61 = vor.u32 %v1287_v53, %v1284_v51  ;;  %v860_v7 = vor.u32 %v859_v56, %v855_v47  ;;  %v1758_v1 = vrot.slane %v1756_v57, 2  ;;  %v1761_v9 = vrot.slane %v1759_v58, 3  ;;  %v587_v56 = vld [vmem:[#allocation2 + $0x24] sm:$0xf] }
  0x31   : > { %2139 = vrot.lane.b32.xlu0 %v2093_v42, %s6836_s28  ;;  %v1766_v10 = vrot.slane %v1764_v59, 2  ;;  %v871_v11 = vrot.slane %v869_v63, 1  ;;  %v1767_v13 = vshll.u32 %v6590_v30, 16  ;;  %v1257_v14 = vshrl.u32 %v6979_v0, 16 }
  0x32   : > { %v1289_v8 = vsel %vm1255_vm9, %v1280_v52, %v1288_v61  ;;  %vm9531_vm12 = vsmask.f32 4352  ;;  %v865_v15 = vsel %vm9525_vm10, %v860_v7, %v864_v39  ;;  %v1762_v16 = vor.u32 %v1761_v9, %v1758_v1  ;;  %v7061_v57 = vld [vmem:[#allocation2 + $0x2c] ss:$0 sps:$4 sm:$0x11]   ;;  %6489 = vmatpush3.bf16.msra.mxu0 %v6638_v49 }
  0x33   : > { %v1260_v18 = vshll.u32 %v6979_v0, 16  ;;  %v1265_v20 = vshrl.u32 %v6992_v12, 16  ;;  %v872_v21 = vor.u32 %v871_v11, %v867_v62  ;;  %v1769_v22 = vrot.slane %v1767_v13, 3  ;;  %v7068_v7 = vld [vmem:[#allocation2 + $0x28] sm:$0xf] }
  0x34   : > { %2141 = vrot.lane.b32.xlu1 %v2096_v46, %s6836_s28  ;;  %v1259_v23 = vrot.slane %v1257_v14, 1  ;;  %v1268_v24 = vshll.u32 %v6992_v12, 16  ;;  %v2238_v0 = vshrl.u32 %v6996_v17, 16  ;;  %v2241_v30 = vshll.u32 %v6996_v17, 16  ;;  %v585_v12 = vld [vmem:[#allocation2 + $0x18] sm:$0xf] }
  0x35   : > { %1046 = vrot.lane.b32.xlu0 %v865_v15, %s6837_s6  ;;  %v1262_v28 = vrot.slane %v1260_v18, 2  ;;  %v1267_v29 = vrot.slane %v1265_v20, 1  ;;  %v877_v31 = vsel %vm9525_vm10, %v872_v21, %v876_v2  ;;  %v1770_v32 = vor.u32 %v1769_v22, %v1766_v10  ;;  %v631_v11 = vld [vmem:[#allocation2 + $0x18] sm:$0xe] }
  0x36   : > { %v1270_v33 = vrot.slane %v1268_v24, 2  ;;  %v2246_v34 = vshrl.u32 %v7005_v27, 16  ;;  %v2240_v37 = vrot.slane %v2238_v0, 3  ;;  %v2243_v39 = vrot.slane %v2241_v30, 4 }
  0x37   : > { %v1263_v36 = vor.u32 %v1262_v28, %v1259_v23  ;;  %v2249_v40 = vshll.u32 %v7005_v27, 16  ;;  %v1771_v17 = vsel %vm9528_vm11, %v1762_v16, %v1770_v32  ;;  %v1739_v44 = vshrl.u32 %v6981_v3, 16  ;;  %v632_v23 = vld [vmem:[#allocation2 + $0x24] sm:$0xe] }
  0x38   : > { %1530 = vrot.lane.b32.xlu1 %v1289_v8, %s6838_s7  ;;  %v1271_v42 = vor.u32 %v1270_v33, %v1267_v29  ;;  %v2248_v43 = vrot.slane %v2246_v34, 3  ;;  %v2244_v45 = vor.u32 %v2243_v39, %v2240_v37  ;;  %v1742_v47 = vshll.u32 %v6981_v3, 16  ;;  %v7085_v28 = vld [vmem:[#allocation2 + $0x20] ss:$0 sps:$4 sm:$0x33]  }
  0x39   : > { %1048 = vrot.lane.b32.xlu0 %v877_v31, %s6837_s6  ;;  %v2251_v46 = vrot.slane %v2249_v40, 4  ;;  %v1747_v27 = vshrl.u32 %v7002_v25, 16  ;;  %v1741_v52 = vrot.slane %v1739_v44, 2  ;;  %v1750_v53 = vshll.u32 %v7002_v25, 16 }
  0x3a   : > { %v1272_v51 = vsel %vm1255_vm9, %v1263_v36, %v1271_v42  ;;  %v7059_v55 = vcombine.low %v585_v12, %v7042_v35  ;;  %v1744_v59 = vrot.slane %v1742_v47, 3  ;;  %v886_v61 = vshll.u32 %v7045_v41, 16  ;;  %v7094_v39 = vld [vmem:[#allocation2 + $0x2c] ss:$0 sps:$4 sm:$0x33]  }
  0x3b   : > { %v2252_v58 = vor.u32 %v2251_v46, %v2248_v43  ;;  %v1749_v3 = vrot.slane %v1747_v27, 2  ;;  %v1752_v62 = vrot.slane %v1750_v53, 3  ;;  %v2221_v2 = vshrl.u32 %v6983_v4, 16  ;;  %v663_v43 = vld [vmem:[#allocation2 + $0x18] sm:$0xc] }
  0x3c   : > { %2012 = vrot.lane.b32.xlu1 %v1771_v17, %s6839_s10  ;;  %v879_v63 = vshrl.u32 %v7059_v55, 16  ;;  %v881_v25 = vshll.u32 %v7059_v55, 16  ;;  %v1745_v9 = vor.u32 %v1744_v59, %v1741_v52  ;;  %v888_v10 = vrot.slane %v886_v61, 1  ;;  %v664_v27 = vld [vmem:[#allocation2 + $0x24] sm:$0xc] }
  0x3d   : > { %1528 = vrot.lane.b32.xlu0 %v1272_v51, %s6838_s7  ;;  %v2253_v1 = vsel %vm9531_vm12, %v2244_v45, %v2252_v58  ;;  %v2224_v8 = vshll.u32 %v6983_v4, 16  ;;  %v1753_v13 = vor.u32 %v1752_v62, %v1749_v3  ;;  %v2223_v15 = vrot.slane %v2221_v2, 3  ;;  %v7105_v3 = vld [vmem:[%s6925_s24 + $0x58] sm:$0xff]  ;;  %v7110_v2 = vld [vmem:[#allocation2 + $0x20] ss:$0 sps:$4 sm:$0x77]  }
  0x3e   : > { %v883_v14 = vrot.slane %v881_v25, 1  ;;  %v2231_v16 = vrot.slane %v2229_v5, 3  ;;  %v2234_v20 = vrot.slane %v2232_v6, 4  ;;  %v7078_v21 = vcombine.low %v587_v56, %v7068_v7 }
  0x3f   : > { %v2226_v18 = vrot.slane %v2224_v8, 4  ;;  %v898_v22 = vshll.u32 %v7061_v57, 16  ;;  %v1754_v4 = vsel %vm9528_vm11, %v1745_v9, %v1753_v13  ;;  %v6054_v26 = vcombine.low %v631_v11, %v7042_v35 }
  0x40   : > { %2494 = vrot.lane.b32.xlu1 %v2253_v1, %s6840_s11  ;;  %v884_v24 = vor.u32 %v883_v14, %v879_v63  ;;  %v1134_v5 = vrot.slane %v7045_v41, 1  ;;  %v2235_v6 = vor.u32 %v2234_v20, %v2231_v16  ;;  %v891_v29 = vshrl.u32 %v7078_v21, 16 }
  0x41   : > { %2010 = vrot.lane.b32.xlu0 %v1754_v4, %s6839_s10  ;;  %v2227_v60 = vor.u32 %v2226_v18, %v2223_v15  ;;  %v893_v0 = vshll.u32 %v7078_v21, 16  ;;  %v900_v31 = vrot.slane %v898_v22, 1  ;;  %v1133_v32 = vrot.slane %v6054_v26, 1 }
  0x42   : > { %v889_v30 = vsel %vm9525_vm10, %v884_v24, %v888_v10  ;;  %v6055_v33 = vcombine.low %v632_v23, %v7068_v7  ;;  %v1137_v36 = vrot.slane %v7061_v57, 1  ;;  %v1291_v37 = vshrl.u32 %v6054_v26, 16  ;;  %v7119_v23 = vld [vmem:[#allocation2 + $0x2c] ss:$0 sps:$4 sm:$0x77]  }
  0x43   : > { %v2236_v34 = vsel %vm9531_vm12, %v2227_v60, %v2235_v6  ;;  %v895_v12 = vrot.slane %v893_v0, 1  ;;  %v1135_v40 = vsel %vm9526_vm6, %v1133_v32, %v1134_v5  ;;  %v1294_v17 = vshll.u32 %v6054_v26, 16  ;;  %v695_v0 = vld [vmem:[#allocation2 + $0x18] sm:$0x8] }
  0x44   : > { %1050 = vrot.lane.b32.xlu1 %v889_v30, %s6837_s6  ;;  %v1136_v41 = vrot.slane %v6055_v33, 1  ;;  %v1299_v42 = vshrl.u32 %v7085_v28, 16  ;;  %v1293_v45 = vrot.slane %v1291_v37, 1  ;;  %v1302_v46 = vshll.u32 %v7085_v28, 16 }
  0x45   : > { %2492 = vrot.lane.b32.xlu0 %v2236_v34, %s6840_s11  ;;  %v896_v44 = vor.u32 %v895_v12, %v891_v29  ;;  %v1308_v47 = vshrl.u32 %v6055_v33, 16  ;;  %v1296_v51 = vrot.slane %v1294_v17, 2  ;;  %v1311_v53 = vshll.u32 %v6055_v33, 16  ;;  %v696_v34 = vld [vmem:[#allocation2 + $0x24] sm:$0x8] }
  0x46   : > { %v1138_v49 = vsel %vm9526_vm6, %v1136_v41, %v1137_v36  ;;  %v1301_v52 = vrot.slane %v1299_v42, 1  ;;  %v1304_v57 = vrot.slane %v1302_v46, 2  ;;  %v1316_v59 = vshrl.u32 %v7094_v39, 16 }
  0x47   : > { %v901_v56 = vsel %vm9525_vm10, %v896_v44, %v900_v31  ;;  %v1310_v58 = vrot.slane %v1308_v47, 1  ;;  %v1297_v61 = vor.u32 %v1296_v51, %v1293_v45  ;;  %v1313_v62 = vrot.slane %v1311_v53, 2  ;;  %v7137_v44 = vld [vmem:[%s9517_s1 + $0x10] ss:$0 sps:$4 sm:$0x33]  }
  0x48   : > { %1052 = vrot.lane.b32.xlu1 %v901_v56, %s6837_s6  ;;  %v1319_v63 = vshll.u32 %v7094_v39, 16  ;;  %v6086_v25 = vcombine.low %v663_v43, %v7042_v35  ;;  %v1305_v1 = vor.u32 %v1304_v57, %v1301_v52  ;;  %v1318_v9 = vrot.slane %v1316_v59, 1  ;;  %6562 = vmatprep.subr.msk.bf16.mxu0 %vm9522_vm2, %v7137_v44 }
  0x49   : > { %1179 = vrot.lane.b32.xlu0 %v1135_v40, %s6834_s26  ;;  %v1616_v10 = vrot.slane %v7085_v28, 2  ;;  %v6087_v8 = vcombine.low %v664_v27, %v7068_v7  ;;  %v1314_v11 = vor.u32 %v1313_v62, %v1310_v58  ;;  %v6395_v15 = vpack.c.bf16 %v7105_v3, %v7105_v3  ;;  %v7129_v40 = vld [vmem:[#allocation2 + $0x20] sm:$0xf]  ;;  %v589_v62 = vld [vmem:[#allocation2 + $0x30] sm:$0xf] }
  0x4a   : > { %v1321_v13 = vrot.slane %v1319_v63, 2  ;;  %v1615_v14 = vrot.slane %v6086_v25, 2  ;;  %v1306_v16 = vsel %vm1255_vm9, %v1297_v61, %v1305_v1  ;;  %v1619_v18 = vrot.slane %v7094_v39, 2 }
  0x4b   : > { %v1773_v20 = vshrl.u32 %v6086_v25, 16  ;;  %v1776_v22 = vshll.u32 %v6086_v25, 16  ;;  %v1618_v24 = vrot.slane %v6087_v8, 2  ;;  %v1781_v26 = vshrl.u32 %v7110_v2, 16 }
  0x4c   : > { %1181 = vrot.lane.b32.xlu1 %v1138_v49, %s6834_s26  ;;  %v1322_v4 = vor.u32 %v1321_v13, %v1318_v9  ;;  %v1784_v5 = vshll.u32 %v7110_v2, 16  ;;  %v1617_v28 = vsel %vm1608_vm7, %v1615_v14, %v1616_v10  ;;  %v1790_v29 = vshrl.u32 %v6087_v8, 16  ;;  %v7142_v49 = vld [vmem:[#allocation2 + $0x2c] sm:$0xf]  ;;  %v7153_v9 = vld [vmem:[#allocation2 + $0x34] sm:$0xf] }
  0x4d   : > { %1532 = vrot.lane.b32.xlu0 %v1306_v16, %s6838_s7  ;;  %v1775_v60 = vrot.slane %v1773_v20, 2  ;;  %v1778_v6 = vrot.slane %v1776_v22, 3  ;;  %v1783_v31 = vrot.slane %v1781_v26, 2  ;;  %v1793_v33 = vshll.u32 %v6087_v8, 16 }
  0x4e   : > { %v1323_v30 = vsel %vm1255_vm9, %v1314_v11, %v1322_v4  ;;  %v1786_v32 = vrot.slane %v1784_v5, 3  ;;  %v1792_v36 = vrot.slane %v1790_v29, 2  ;;  %v1798_v37 = vshrl.u32 %v7119_v23, 16  ;;  %v7158_v14 = vld [vmem:[#allocation2 + $0x38] ss:$0 sps:$4 sm:$0x11]  }
  0x4f   : > { %v1779_v12 = vor.u32 %v1778_v6, %v1775_v60  ;;  %v1801_v39 = vshll.u32 %v7119_v23, 16  ;;  %v1620_v41 = vsel %vm1608_vm7, %v1618_v24, %v1619_v18  ;;  %v1795_v42 = vrot.slane %v1793_v33, 3  ;;  %v7167_v29 = vld [vmem:[#allocation2 + $0x38] ss:$0 sps:$4 sm:$0x33]  }
  0x50   : > { %1534 = vrot.lane.b32.xlu1 %v1323_v30, %s6838_s7  ;;  %v1787_v17 = vor.u32 %v1786_v32, %v1783_v31  ;;  %v6118_v43 = vcombine.low %v695_v0, %v7042_v35  ;;  %v1800_v45 = vrot.slane %v1798_v37, 2  ;;  %v2098_v47 = vrot.slane %v7110_v2, 3 }
  0x51   : > { %1661 = vrot.lane.b32.xlu0 %v1617_v28, %s6835_s27  ;;  %v1803_v46 = vrot.slane %v1801_v39, 3  ;;  %v6119_v27 = vcombine.low %v696_v34, %v7068_v7  ;;  %v1796_v52 = vor.u32 %v1795_v42, %v1792_v36  ;;  %v6134_v56 = vcombine.low %v7129_v40, %v7129_v40  ;;  %v665_v36 = vld [vmem:[#allocation2 + $0x30] sm:$0xc]  ;;  %v7179_v42 = vld [vmem:[%s6925_s24 + $0x68] sm:$0xff] }
  0x52   : > { %v1788_v51 = vsel %vm9528_vm11, %v1779_v12, %v1787_v17  ;;  %v2097_v53 = vrot.slane %v6118_v43, 3  ;;  %v2101_v58 = vrot.slane %v7119_v23, 3  ;;  %v2255_v59 = vshrl.u32 %v6118_v43, 16 }
  0x53   : > { %v1804_v57 = vor.u32 %v1803_v46, %v1800_v45  ;;  %v2258_v61 = vshll.u32 %v6118_v43, 16  ;;  %v2100_v63 = vrot.slane %v6119_v27, 3  ;;  %v2263_v25 = vshrl.u32 %v6134_v56, 16 }
  0x54   : > { %1663 = vrot.lane.b32.xlu1 %v1620_v41, %s6835_s27  ;;  %v2266_v2 = vshll.u32 %v6134_v56, 16  ;;  %v6135_v1 = vcombine.low %v7142_v49, %v7142_v49  ;;  %v2099_v8 = vsel %vm9527_vm8, %v2097_v53, %v2098_v47  ;;  %v2257_v11 = vrot.slane %v2255_v59, 3  ;;  %v7201_v59 = vld [vmem:[%s6925_s24 + $0x80] sm:$0xff] }
  0x55   : > { %2014 = vrot.lane.b32.xlu0 %v1788_v51, %s6839_s10  ;;  %v1805_v10 = vsel %vm9528_vm11, %v1796_v52, %v1804_v57  ;;  %v2260_v13 = vrot.slane %v2258_v61, 4  ;;  %v2265_v16 = vrot.slane %v2263_v25, 3  ;;  %v2272_v20 = vshrl.u32 %v6119_v27, 16  ;;  %v7195_v57 = vld [vmem:[%s6925_s24 + $0x70] sm:$0xff] }
  0x56   : > { %v2268_v18 = vrot.slane %v2266_v2, 4  ;;  %v2275_v22 = vshll.u32 %v6119_v27, 16  ;;  %v2280_v4 = vshrl.u32 %v6135_v1, 16  ;;  %v2283_v24 = vshll.u32 %v6135_v1, 16 }
  0x57   : > { %v2261_v23 = vor.u32 %v2260_v13, %v2257_v11  ;;  %v426_v26 = vrot.slane %v6395_v15, 6  ;;  %v2274_v28 = vrot.slane %v2272_v20, 3  ;;  %v7165_v6 = vcombine.low %v589_v62, %v7153_v9  ;;  %v633_v15 = vld [vmem:[#allocation2 + $0x30] sm:$0xe]  ;;  %v7219_v20 = vld [vmem:[%s6925_s24 + $0x98] sm:$0xff] }
  0x58   : > { %2016 = vrot.lane.b32.xlu1 %v1805_v10, %s6839_s10  ;;  %v2269_v5 = vor.u32 %v2268_v18, %v2265_v16  ;;  %v2277_v60 = vrot.slane %v2275_v22, 4  ;;  %v2102_v0 = vsel %vm9527_vm8, %v2100_v63, %v2101_v58  ;;  %v2282_v30 = vrot.slane %v2280_v4, 3  ;;  %v7198_v58 = vld [vmem:[%s6925_s24 + $0x78] sm:$0xff]  ;;  %v7216_v18 = vld [vmem:[%s6925_s24 + $0x90] sm:$0xff] }
  0x59   : > { %2143 = vrot.lane.b32.xlu0 %v2099_v8, %s6836_s28  ;;  %v2285_v31 = vrot.slane %v2283_v24, 4  ;;  %v910_v3 = vshll.u32 %v7158_v14, 16  ;;  %v903_v34 = vshrl.u32 %v7165_v6, 16  ;;  %v905_v12 = vshll.u32 %v7165_v6, 16  ;;  %v591_v22 = vld [vmem:[#allocation2 + $0x3c] sm:$0xf] }
  0x5a   : > { %v2270_v32 = vsel %vm9531_vm12, %v2261_v23, %v2269_v5  ;;  %v2278_v33 = vor.u32 %v2277_v60, %v2274_v28  ;;  %v6150_v39 = vcombine.low %v7042_v35, %v7129_v40  ;;  %v425_v41 = vrot.slane %v6965_v48, 4  ;;  %v7206_v2 = vld [vmem:[#allocation2 + $0x38] ss:$0 sps:$4 sm:$0x77]   ;;  %v634_v23 = vld [vmem:[#allocation2 + $0x3c] sm:$0xe] }
  0x5b   : > { %v2286_v37 = vor.u32 %v2285_v31, %v2282_v30  ;;  %v428_v17 = vrot.slane %v426_v26, 4  ;;  %v907_v43 = vrot.slane %v905_v12, 1  ;;  %v912_v45 = vrot.slane %v910_v3, 1  ;;  %v697_v24 = vld [vmem:[#allocation2 + $0x30] sm:$0x8] }
  0x5c   : > { %2145 = vrot.lane.b32.xlu1 %v2102_v0, %s6836_s28  ;;  %v6056_v46 = vcombine.low %v633_v15, %v7153_v9  ;;  %v1333_v47 = vshrl.u32 %v7167_v29, 16  ;;  %v427_v48 = vsel %vm6937_vm5, %v425_v41, %v426_v26  ;;  %v1336_v40 = vshll.u32 %v7167_v29, 16  ;;  %v7232_v3 = vld [vmem:[#allocation2 + $0x38] sm:$0xf]  ;;  %v7235_v15 = vld [vmem:[%s6925_s24 + $0xa0] sm:$0xff] }
  0x5d   : > { %2496 = vrot.lane.b32.xlu0 %v2270_v32, %s6840_s11  ;;  %v2287_v35 = vsel %vm9531_vm12, %v2278_v33, %v2286_v37  ;;  %545 = vst.msk [vmem:[#allocation2 + $0x44] sm:$0x3] %vm9524_vm0, %v428_v17  ;;  %v6088_v27 = vcombine.low %v665_v36, %v7153_v9  ;;  %v908_v51 = vor.u32 %v907_v43, %v903_v34  ;;  %v1140_v62 = vrot.slane %v7158_v14, 1  ;;  %v7213_v14 = vld [vmem:[%s6925_s24 + $0x88] sm:$0xff] }
  0x5e   : > { %544 = vst.msk [vmem:[#allocation2 + $0x40] sm:$0xf] %vm9530_vm4, %v427_v48  ;;  %v1325_v52 = vshrl.u32 %v6056_v46, 16  ;;  %v1328_v53 = vshll.u32 %v6056_v46, 16  ;;  %v6397_v56 = vpack.c.bf16 %v7179_v42, %v7179_v42  ;;  %v6151_v61 = vcombine.low %v7068_v7, %v7142_v49 }
  0x5f   : > { %v1335_v63 = vrot.slane %v1333_v47, 1  ;;  %v1338_v25 = vrot.slane %v1336_v40, 2  ;;  %v1139_v1 = vrot.slane %v6056_v46, 1  ;;  %v1621_v11 = vrot.slane %v6088_v27, 2 }
  0x60   : > { %2498 = vrot.lane.b32.xlu1 %v2287_v35, %s6840_s11  ;;  %v1327_v10 = vrot.slane %v1325_v52, 1  ;;  %v1330_v8 = vrot.slane %v1328_v53, 2  ;;  %v913_v13 = vsel %vm9525_vm10, %v908_v51, %v912_v45  ;;  %v1622_v7 = vrot.slane %v7167_v29, 2  ;;  %v666_v29 = vld [vmem:[#allocation2 + $0x3c] sm:$0xc] }
  0x61   : > { %2544 = vrot.lane.b32.xlu0 %v6150_v39, %s6833_s25  ;;  %v1807_v49 = vshrl.u32 %v6088_v27, 16  ;;  %v1810_v16 = vshll.u32 %v6088_v27, 16  ;;  %v1339_v4 = vor.u32 %v1338_v25, %v1335_v63  ;;  %v6398_v26 = vpack.c.bf16 %v7195_v57, %v7195_v57 }
  0x62   : > { %v6399_v5 = vpack.c.bf16 %v7198_v58, %v7198_v58  ;;  %v6400_v28 = vpack.c.bf16 %v7201_v59, %v7201_v59  ;;  %v1331_v60 = vor.u32 %v1330_v8, %v1327_v10  ;;  %v1815_v31 = vshrl.u32 %v7206_v2, 16 }
  0x63   : > { %v7227_v0 = vrot.slane %v1807_v49, 2  ;;  %v7229_v30 = vrot.slane %v1810_v16, 3  ;;  %v1818_v33 = vshll.u32 %v7206_v2, 16  ;;  %v6401_v34 = vpack.c.bf16 %v7213_v14, %v7213_v14 }
  0x64   : > { %1054 = vrot.lane.b32.xlu1 %v913_v13, %s6837_s6  ;;  %v6607_v32 = vld [vmem:[#allocation2 + $0x44] ss:$0 sps:$4 sm:$0x11]   ;;  %v6402_v12 = vpack.c.bf16 %v7216_v18, %v7216_v18  ;;  %v6403_v36 = vpack.c.bf16 %v7219_v20, %v7219_v20  ;;  %v1141_v39 = vsel %vm9526_vm6, %v1139_v1, %v1140_v62  ;;  %v1623_v41 = vsel %vm1608_vm7, %v1621_v11, %v1622_v7  ;;  %v7276_v13 = vld [vmem:[%s6925_s24 + $0xa8] sm:$0xff] }
  0x65   : > { %2546 = vrot.lane.b32.xlu0 %v6151_v61, %s6833_s25  ;;  %v7246_v37 = vld [vmem:[#allocation2 + $0x40] sm:$0xf]  ;;  %v7251_v17 = vcombine.low %v697_v24, %v7153_v9  ;;  %v2104_v43 = vrot.slane %v7206_v2, 3  ;;  %v922_v46 = vshll.u32 %v6607_v32, 16  ;;  %v6136_v48 = vcombine.low %v7232_v3, %v7232_v3 }
  0x66   : > { %v7255_v45 = vcombine.low %v591_v22, %v7246_v37  ;;  %v6057_v47 = vcombine.low %v634_v23, %v7246_v37  ;;  %v7258_v35 = vld [vmem:[#allocation2 + $0x44] ss:$0 sps:$4 sm:$0x33]   ;;  %v1340_v40 = vsel %vm1255_vm9, %v1331_v60, %v1339_v4  ;;  %v1813_v27 = vor.u32 %v7229_v30, %v7227_v0  ;;  %v698_v23 = vld [vmem:[#allocation2 + $0x3c] sm:$0x8] }
  0x67   : > { %v1817_v51 = vrot.slane %v1815_v31, 2  ;;  %v6089_v62 = vcombine.low %v666_v29, %v7246_v37  ;;  %v1820_v63 = vrot.slane %v1818_v33, 3  ;;  %v7270_v25 = vld [vmem:[#allocation2 + $0x44] ss:$0 sps:$4 sm:$0x77]   ;;  %v1350_v8 = vshrl.u32 %v7258_v35, 16 }
  0x68   : > { %v915_v53 = vshrl.u32 %v7255_v45, 16  ;;  %v917_v61 = vshll.u32 %v7255_v45, 16  ;;  %v1342_v1 = vshrl.u32 %v6057_v47, 16  ;;  %v1345_v10 = vshll.u32 %v6057_v47, 16 }
  0x69   : > { %1183 = vrot.lane.b32.xlu0 %v1141_v39, %s6834_s26  ;;  %v1353_v11 = vshll.u32 %v7258_v35, 16  ;;  %v924_v49 = vrot.slane %v922_v46, 1  ;;  %v1142_v16 = vrot.slane %v6057_v47, 1  ;;  %v1143_v22 = vrot.slane %v6607_v32, 1 }
  0x6a   : > { %v919_v7 = vrot.slane %v917_v61, 1  ;;  %v1344_v4 = vrot.slane %v1342_v1, 1  ;;  %v1347_v24 = vrot.slane %v1345_v10, 2  ;;  %v1352_v60 = vrot.slane %v1350_v8, 1  ;;  %v7289_v10 = vld [vmem:[#allocation2 + $0x44] sm:$0xf] }
  0x6b   : > { %v1355_v29 = vrot.slane %v1353_v11, 2  ;;  %v1824_v30 = vshrl.u32 %v6089_v62, 16  ;;  %v2103_v31 = vrot.slane %v7251_v17, 3  ;;  %v6405_v33 = vpack.c.bf16 %v7276_v13, %v7276_v13 }
  0x6c   : > { %v920_v0 = vor.u32 %v919_v7, %v915_v53  ;;  %v1821_v39 = vor.u32 %v1820_v63, %v1817_v51  ;;  %v1827_v52 = vshll.u32 %v6089_v62, 16  ;;  %v1832_v46 = vshrl.u32 %v7270_v25, 16 }
  0x6d   : > { %1536 = vrot.lane.b32.xlu0 %v1340_v40, %s6838_s7  ;;  %v7284_v32 = vcombine.low %v698_v23, %v7246_v37  ;;  %v1144_v61 = vsel %vm9526_vm6, %v1142_v16, %v1143_v22  ;;  %v1624_v53 = vrot.slane %v6089_v62, 2  ;;  %v1835_v1 = vshll.u32 %v7270_v25, 16 }
  0x6e   : > { %v925_v47 = vsel %vm9525_vm10, %v920_v0, %v924_v49  ;;  %v1348_v8 = vor.u32 %v1347_v24, %v1344_v4  ;;  %v1356_v40 = vor.u32 %v1355_v29, %v1352_v60  ;;  %v1625_v51 = vrot.slane %v7258_v35, 2 }
  0x6f   : > { %1056 = vrot.lane.b32.xlu1 %v925_v47, %s6837_s6  ;;  %v1826_v63 = vrot.slane %v1824_v30, 2  ;;  %v1829_v11 = vrot.slane %v1827_v52, 3  ;;  %v2289_v7 = vshrl.u32 %v7251_v17, 16  ;;  %v2292_v23 = vshll.u32 %v7251_v17, 16 }
  0x70   : > { %v2297_v49 = vshrl.u32 %v6136_v48, 16  ;;  %v1834_v62 = vrot.slane %v1832_v46, 2  ;;  %v1837_v16 = vrot.slane %v1835_v1, 3  ;;  %v2300_v22 = vshll.u32 %v6136_v48, 16 }
  0x71   : > { %1665 = vrot.lane.b32.xlu0 %v1623_v41, %s6835_s27  ;;  %v6137_v0 = vcombine.low %v7289_v10, %v7289_v10  ;;  %v1822_v4 = vsel %vm9528_vm11, %v1813_v27, %v1821_v39  ;;  %v2291_v24 = vrot.slane %v2289_v7, 3  ;;  %v2294_v60 = vrot.slane %v2292_v23, 4 }
  0x72   : > { %v2299_v35 = vrot.slane %v2297_v49, 3  ;;  %v2302_v52 = vrot.slane %v2300_v22, 4  ;;  %v2306_v29 = vshrl.u32 %v7284_v32, 16  ;;  %v2309_v17 = vshll.u32 %v7284_v32, 16  ;;  %v7358_v22 = vld [vmem:[%s6925_s24 + $0xb0] sm:$0xff] }
  0x73   : > { %1185 = vrot.lane.b32.xlu1 %v1144_v61, %s6834_s26  ;;  %v2314_v30 = vshrl.u32 %v6137_v0, 16  ;;  %v1357_v41 = vsel %vm1255_vm9, %v1348_v8, %v1356_v40  ;;  %v2105_v48 = vsel %vm9527_vm8, %v2103_v31, %v2104_v43  ;;  %v2317_v46 = vshll.u32 %v6137_v0, 16  ;;  %v7361_v0 = vld [vmem:[%s6925_s24 + $0xb8] sm:$0xff] }
  0x74   : > { %v430_v27 = vrot.slane %v6968_v50, 4  ;;  %v1626_v39 = vsel %vm1608_vm7, %v1624_v53, %v1625_v51  ;;  %v1830_v47 = vor.u32 %v1829_v11, %v1826_v63  ;;  %v1838_v61 = vor.u32 %v1837_v16, %v1834_v62  ;;  %v593_v62 = vld [vmem:[#allocation2 + $0x48] sm:$0xf] }
  0x75   : > { %2018 = vrot.lane.b32.xlu0 %v1822_v4, %s6839_s10  ;;  %v2295_v1 = vor.u32 %v2294_v60, %v2291_v24  ;;  %v2303_v7 = vor.u32 %v2302_v52, %v2299_v35  ;;  %v2308_v23 = vrot.slane %v2306_v29, 3  ;;  %v431_v8 = vrot.slane %v6397_v56, 6  ;;  %v635_v4 = vld [vmem:[#allocation2 + $0x48] sm:$0xe]  ;;  %v7372_v35 = vld [vmem:[%s6925_s24 + $0xc0] sm:$0xff] }
  0x76   : > { %v434_v2 = vrot.slane %v6398_v26, 6  ;;  %v2311_v50 = vrot.slane %v2309_v17, 4  ;;  %v2316_v43 = vrot.slane %v2314_v30, 3  ;;  %v436_v31 = vrot.slane %v6399_v5, 6  ;;  %v667_v24 = vld [vmem:[#allocation2 + $0x48] sm:$0xc] }
  0x77   : > { %1538 = vrot.lane.b32.xlu1 %v1357_v41, %s6838_s7  ;;  %v439_v53 = vrot.slane %v6400_v28, 6  ;;  %v2319_v40 = vrot.slane %v2317_v46, 4  ;;  %v432_v42 = vsel %vm6937_vm5, %v430_v27, %v431_v8  ;;  %v433_v56 = vrot.slane %v431_v8, 4  ;;  %v7382_v29 = vld [vmem:[%s6925_s24 + $0xc8] sm:$0xff]  ;;  %v7385_v17 = vld [vmem:[%s6925_s24 + $0xd0] sm:$0xff] }
  0x78   : > { %v435_v51 = vrot.slane %v434_v2, 4  ;;  %549 = vst.msk [vmem:[#allocation2 + $0x54] sm:$0xc] %vm9523_vm1, %v434_v2  ;;  %v2106_v57 = vrot.slane %v7284_v32, 3  ;;  %v438_v58 = vrot.slane %v436_v31, 4  ;;  %v441_v59 = vrot.slane %v6401_v34, 6 }
  0x79   : > { %2147 = vrot.lane.b32.xlu0 %v2105_v48, %s6836_s28  ;;  %547 = vst.msk [vmem:[#allocation2 + $0x4c] sm:$0xf] %vm9530_vm4, %v432_v42  ;;  %v440_v26 = vrot.slane %v439_v53, 4  ;;  %v2304_v5 = vsel %vm9531_vm12, %v2295_v1, %v2303_v7  ;;  %v444_v32 = vrot.slane %v6402_v12, 6  ;;  %v446_v63 = vrot.slane %v6403_v36, 6 }
  0x7a   : > { %552 = vst.msk [vmem:[#allocation2 + $0x60] sm:$0xc] %vm9523_vm1, %v439_v53  ;;  %v437_v28 = vsel %vm6937_vm5, %v435_v51, %v436_v31  ;;  %v1839_v14 = vsel %vm9528_vm11, %v1830_v47, %v1838_v61  ;;  %v2107_v34 = vrot.slane %v7270_v25, 3  ;;  %v443_v12 = vrot.slane %v441_v59, 4 }
  0x7b   : > { %548 = vst.msk [vmem:[#allocation2 + $0x50] sm:$0x3] %vm9524_vm0, %v433_v56  ;;  %1667 = vrot.lane.b32.xlu1 %v1626_v39, %s6835_s27  ;;  %551 = vst.msk [vmem:[#allocation2 + $0x5c] sm:$0x3] %vm9524_vm0, %v438_v58  ;;  %v442_v18 = vsel %vm6937_vm5, %v440_v26, %v441_v59  ;;  %v2312_v11 = vor.u32 %v2311_v50, %v2308_v23  ;;  %v2320_v49 = vor.u32 %v2319_v40, %v2316_v43  ;;  %vm2605_vm14 = vcmask 64512  }
  0x7c   : > { %550 = vst.msk [vmem:[#allocation2 + $0x58] sm:$0xf] %vm9530_vm4, %v437_v28  ;;  %553 = vst.msk [vmem:[#allocation2 + $0x64] sm:$0xf] %vm9530_vm4, %v442_v18  ;;  %v445_v20 = vrot.slane %v444_v32, 4  ;;  %v448_v36 = vrot.slane %v446_v63, 4  ;;  %v6152_v25 = vcombine.low %v7153_v9, %v7232_v3  ;;  %v9534_v9 = vpack.c.bf16 %v7235_v15, %v7235_v15 }
  0x7d   : > { %555 = vst.msk [vmem:[#allocation2 + $0x6c] sm:$0xc] %vm9523_vm1, %v444_v32  ;;  %2500 = vrot.lane.b32.xlu0 %v2304_v5, %s6840_s11  ;;  %v2893_v16 = vsel %vm9522_vm2, %v7137_v44, 0  ;;  %v699_v44 = vld [vmem:[#allocation2 + $0x48] sm:$0x8]  ;;  %v7379_v52 = vrot.slane %v6405_v33, 6  ;;  %v2108_v15 = vsel %vm9527_vm8, %v2106_v57, %v2107_v34  ;;  %v2321_v30 = vsel %vm9531_vm12, %v2312_v11, %v2320_v49 }
  0x7e   : > { %554 = vst.msk [vmem:[#allocation2 + $0x68] sm:$0x3] %vm9524_vm0, %v443_v12  ;;  %v447_v60 = vsel %vm6937_vm5, %v445_v20, %v446_v63  ;;  %557 = vst.msk [vmem:[#allocation2 + $0x74] sm:$0x3] %vm9524_vm0, %v448_v36  ;;  %6491 = vmatpush3.bf16.msra.mxu0 %v2893_v16  ;;  %v7369_v3 = vrot.slane %v9534_v9, 6  ;;  %v6153_v48 = vcombine.low %v7246_v37, %v7289_v10  ;;  %vm2638_vm15 = vcmask 97280  }
  0x7f   : > { %2020 = vrot.lane.b32.xlu1 %v1839_v14, %s6839_s10  ;;  %556 = vst.msk [vmem:[#allocation2 + $0x70] sm:$0xf] %vm9530_vm4, %v447_v60  ;;  %v595_v46 = vld [vmem:[#allocation2 + $0x54] sm:$0xf]  ;;  %v6406_v13 = vpack.c.bf16 %v7358_v22, %v7358_v22  ;;  %v6407_v61 = vpack.c.bf16 %v7361_v0, %v7361_v0  ;;  %v6408_v37 = vpack.c.bf16 %v7372_v35, %v7372_v35  ;;  %vm2671_vm3 = vcmask 130048  }
  0x80   : > { %v7389_v41 = vld [vmem:[#allocation2 + $0x4c] sm:$0xf]  ;;  %v636_v27 = vld [vmem:[#allocation2 + $0x54] sm:$0xe]  ;;  %558 = vst.msk [vmem:[#allocation2 + $0x78] sm:$0xc] %vm9523_vm1, %v7369_v3  ;;  %v6409_v23 = vpack.c.bf16 %v7382_v29, %v7382_v29  ;;  %v9537_v35 = vpack.c.bf16 %v7385_v17, %v7385_v17 }
  0x81   : > { %2548 = vrot.lane.b32.xlu0 %v6152_v25, %s6833_s25  ;;  %v7399_v33 = vcombine.low %v593_v62, %v7389_v41  ;;  %v6058_v47 = vcombine.low %v635_v4, %v7389_v41  ;;  %v7409_v1 = vcombine.low %v667_v24, %v7389_v41  ;;  %v7412_v7 = vcombine.low %v699_v44, %v7389_v41 }
  0x82   : > { %v6618_v39 = vld [vmem:[#allocation2 + $0x50] ss:$0 sps:$4 sm:$0x11]   ;;  %v6620_v53 = vld [vmem:[#allocation2 + $0x5c] ss:$0 sps:$4 sm:$0x11]  }
  0x83   : > { %v7406_v10 = vld [vmem:[#allocation2 + $0x58] sm:$0xf]  ;;  %2149 = vrot.lane.b32.xlu1 %v2108_v15, %s6836_s28  ;;  %v927_v2 = vshrl.u32 %v7399_v33, 16  ;;  %v929_v50 = vshll.u32 %v7399_v33, 16  ;;  %v934_v43 = vshll.u32 %v6618_v39, 16  ;;  %v1145_v40 = vrot.slane %v6058_v47, 1 }
  0x84   : > { %v7422_v31 = vcombine.low %v595_v46, %v7406_v10  ;;  %v1146_v42 = vrot.slane %v6618_v39, 1  ;;  %v6059_v56 = vcombine.low %v636_v27, %v7406_v10  ;;  %v6622_v51 = vld [vmem:[#allocation2 + $0x50] ss:$0 sps:$4 sm:$0x33]   ;;  %v1359_v57 = vshrl.u32 %v6058_v47, 16 }
  0x85   : > { %v931_v58 = vrot.slane %v929_v50, 1  ;;  %v936_v26 = vrot.slane %v934_v43, 1  ;;  %2550 = vrot.lane.b32.xlu0 %v6153_v48, %s6833_s25  ;;  %v946_v28 = vshll.u32 %v6620_v53, 16  ;;  %v1149_v14 = vrot.slane %v6620_v53, 1  ;;  %v668_v48 = vld [vmem:[#allocation2 + $0x54] sm:$0xc] }
  0x86   : > { %v939_v59 = vshrl.u32 %v7422_v31, 16  ;;  %v941_v5 = vshll.u32 %v7422_v31, 16  ;;  %v1147_v32 = vsel %vm9526_vm6, %v1145_v40, %v1146_v42  ;;  %v1148_v63 = vrot.slane %v6059_v56, 1  ;;  %v7429_v34 = vld [vmem:[#allocation2 + $0x5c] ss:$0 sps:$4 sm:$0x33]  }
  0x87   : > { %2502 = vrot.lane.b32.xlu1 %v2321_v30, %s6840_s11  ;;  %v932_v18 = vor.u32 %v931_v58, %v927_v2  ;;  %v1361_v11 = vrot.slane %v1359_v57, 1  ;;  %v1362_v49 = vshll.u32 %v6058_v47, 16  ;;  %v948_v20 = vrot.slane %v946_v28, 1  ;;  %v6625_v2 = vld [vmem:[#allocation2 + $0x50] ss:$0 sps:$4 sm:$0x77]  }
  0x88   : > { %v943_v12 = vrot.slane %v941_v5, 1  ;;  %v1150_v36 = vsel %vm9526_vm6, %v1148_v63, %v1149_v14  ;;  %v1367_v25 = vshrl.u32 %v6622_v51, 16  ;;  %v1370_v62 = vshll.u32 %v6622_v51, 16  ;;  %v7448_v63 = vld [vmem:[%s6925_s24 + $0xd8] sm:$0xff] }
  0x89   : > { %v937_v16 = vsel %vm9525_vm10, %v932_v18, %v936_v26  ;;  %1187 = vrot.lane.b32.xlu0 %v1147_v32, %s6834_s26  ;;  %v1364_v24 = vrot.slane %v1362_v49, 2  ;;  %v1376_v60 = vshrl.u32 %v6059_v56, 16  ;;  %v1379_v15 = vshll.u32 %v6059_v56, 16  ;;  %v7445_v32 = vld [vmem:[#allocation2 + $0x5c] ss:$0 sps:$4 sm:$0x77]  }
  0x8a   : > { %v944_v4 = vor.u32 %v943_v12, %v939_v59  ;;  %v1369_v9 = vrot.slane %v1367_v25, 1  ;;  %v1372_v44 = vrot.slane %v1370_v62, 2  ;;  %v1384_v30 = vshrl.u32 %v7429_v34, 16 }
  0x8b   : > { %1058 = vrot.lane.b32.xlu1 %v937_v16, %s6837_s6  ;;  %v1365_v27 = vor.u32 %v1364_v24, %v1361_v11  ;;  %v1378_v39 = vrot.slane %v1376_v60, 1  ;;  %v1387_v47 = vshll.u32 %v7429_v34, 16  ;;  %v1381_v43 = vrot.slane %v1379_v15, 2  ;;  %v700_v16 = vld [vmem:[#allocation2 + $0x54] sm:$0x8] }
  0x8c   : > { %v949_v46 = vsel %vm9525_vm10, %v944_v4, %v948_v20  ;;  %v1373_v50 = vor.u32 %v1372_v44, %v1369_v9  ;;  %v1386_v53 = vrot.slane %v1384_v30, 1  ;;  %v1627_v40 = vrot.slane %v7409_v1, 2  ;;  %v7457_v15 = vld [vmem:[#allocation2 + $0x50] sm:$0xf] }
  0x8d   : > { %v1389_v42 = vrot.slane %v1387_v47, 2  ;;  %v1628_v56 = vrot.slane %v6622_v51, 2  ;;  %v6091_v57 = vcombine.low %v668_v48, %v7406_v10  ;;  %v1631_v58 = vrot.slane %v7429_v34, 2 }
  0x8e   : > { %v1374_v26 = vsel %vm1255_vm9, %v1365_v27, %v1373_v50  ;;  %v1382_v59 = vor.u32 %v1381_v43, %v1378_v39  ;;  %v1841_v5 = vshrl.u32 %v7409_v1, 16  ;;  %v1844_v28 = vshll.u32 %v7409_v1, 16  ;;  %v7463_v39 = vld [vmem:[#allocation2 + $0x5c] sm:$0xf] }
  0x8f   : > { %1060 = vrot.lane.b32.xlu1 %v949_v46, %s6837_s6  ;;  %1540 = vrot.lane.b32.xlu0 %v1374_v26, %s6838_s7  ;;  %v1390_v51 = vor.u32 %v1389_v42, %v1386_v53  ;;  %v1629_v14 = vsel %vm1608_vm7, %v1627_v40, %v1628_v56  ;;  %v1630_v18 = vrot.slane %v6091_v57, 2  ;;  %v1849_v34 = vshrl.u32 %v6625_v2, 16 }
  0x90   : > { %v1843_v12 = vrot.slane %v1841_v5, 2  ;;  %v1846_v11 = vrot.slane %v1844_v28, 3  ;;  %v1852_v49 = vshll.u32 %v6625_v2, 16  ;;  %v1858_v20 = vshrl.u32 %v6091_v57, 16  ;;  %v597_v5 = vld [vmem:[#allocation2 + $0x60] sm:$0xf] }
  0x91   : > { %v1391_v25 = vsel %vm1255_vm9, %v1382_v59, %v1390_v51  ;;  %v1851_v1 = vrot.slane %v1849_v34, 2  ;;  %v1861_v62 = vshll.u32 %v6091_v57, 16  ;;  %v1866_v44 = vshrl.u32 %v7445_v32, 16  ;;  %v7471_v57 = vld [vmem:[%s6925_s24 + $0xe0] sm:$0xff] }
  0x92   : > { %v1847_v24 = vor.u32 %v1846_v11, %v1843_v12  ;;  %v1854_v60 = vrot.slane %v1852_v49, 3  ;;  %v1860_v9 = vrot.slane %v1858_v20, 2  ;;  %v1869_v48 = vshll.u32 %v7445_v32, 16  ;;  %v7477_v28 = vld [vmem:[#allocation2 + $0x64] sm:$0xf] }
  0x93   : > { %1189 = vrot.lane.b32.xlu1 %v1150_v36, %s6834_s26  ;;  %1669 = vrot.lane.b32.xlu0 %v1629_v14, %s6835_s27  ;;  %v1863_v30 = vrot.slane %v1861_v62, 3  ;;  %v2109_v46 = vrot.slane %v7412_v7, 3  ;;  %v2110_v27 = vrot.slane %v6625_v2, 3  ;;  %v1632_v47 = vsel %vm1608_vm7, %v1630_v18, %v1631_v58 }
  0x94   : > { %v1855_v50 = vor.u32 %v1854_v60, %v1851_v1  ;;  %v1868_v43 = vrot.slane %v1866_v44, 2  ;;  %v6123_v53 = vcombine.low %v700_v16, %v7406_v10  ;;  %v1871_v42 = vrot.slane %v1869_v48, 3 }
  0x95   : > { %v1864_v40 = vor.u32 %v1863_v30, %v1860_v9  ;;  %v2113_v36 = vrot.slane %v7445_v32, 3  ;;  %v6138_v56 = vcombine.low %v7457_v15, %v7457_v15  ;;  %v2111_v2 = vsel %vm9527_vm8, %v2109_v46, %v2110_v27  ;;  %v7491_v46 = vld [vmem:[#allocation2 + $0x74] ss:$0 sps:$4 sm:$0x11]  }
  0x96   : > { %v1856_v26 = vsel %vm9528_vm11, %v1847_v24, %v1855_v50  ;;  %v2323_v59 = vshrl.u32 %v7412_v7, 16  ;;  %v2326_v58 = vshll.u32 %v7412_v7, 16  ;;  %v2112_v51 = vrot.slane %v6123_v53, 3  ;;  %v7485_v7 = vld [vmem:[#allocation2 + $0x68] ss:$0 sps:$4 sm:$0x11]  }
  0x97   : > { %1542 = vrot.lane.b32.xlu1 %v1391_v25, %s6838_s7  ;;  %2022 = vrot.lane.b32.xlu0 %v1856_v26, %s6839_s10  ;;  %v7481_v32 = vpop.permute.xlu0 %2540  ;;  %v2331_v14 = vshrl.u32 %v6138_v56, 16  ;;  %v2334_v18 = vshll.u32 %v6138_v56, 16  ;;  %v6139_v34 = vcombine.low %v7463_v39, %v7463_v39  ;;  %v1872_v12 = vor.u32 %v1871_v42, %v1868_v43  ;;  %v599_v25 = vld [vmem:[#allocation2 + $0x6c] sm:$0xf]  ;;  %v7501_v56 = vld [vmem:[#allocation2 + $0x70] sm:$0xf] }
  0x98   : > { %v2325_v11 = vrot.slane %v2323_v59, 3  ;;  %v2328_v49 = vrot.slane %v2326_v58, 4  ;;  %v2340_v20 = vshrl.u32 %v6123_v53, 16  ;;  %v2343_v16 = vshll.u32 %v6123_v53, 16  ;;  %v637_v26 = vld [vmem:[#allocation2 + $0x60] sm:$0xe] }
  0x99   : > { %v2333_v1 = vrot.slane %v2331_v14, 3  ;;  %v2336_v62 = vrot.slane %v2334_v18, 4  ;;  %v2348_v30 = vshrl.u32 %v6139_v34, 16  ;;  %v2351_v48 = vshll.u32 %v6139_v34, 16  ;;  %v638_v18 = vld [vmem:[#allocation2 + $0x6c] sm:$0xe] }
  0x9a   : > { %v7489_v60 = vpop.permute.xlu1 %1175  ;;  %v2329_v9 = vor.u32 %v2328_v49, %v2325_v11  ;;  %v2342_v44 = vrot.slane %v2340_v20, 3  ;;  %v2114_v50 = vsel %vm9527_vm8, %v2112_v51, %v2113_v36  ;;  %v2345_v53 = vrot.slane %v2343_v16, 4  ;;  %v7516_v20 = vld [vmem:[#allocation2 + $0x68] ss:$0 sps:$4 sm:$0x33]  }
  0x9b   : > { %1671 = vrot.lane.b32.xlu1 %v1632_v47, %s6835_s27  ;;  %2151 = vrot.lane.b32.xlu0 %v2111_v2, %s6836_s28  ;;  %v7495_v27 = vpop.permute.xlu0 %2542  ;;  %v2337_v43 = vor.u32 %v2336_v62, %v2333_v1  ;;  %v7499_v42 = vcombine.low %v597_v5, %v7477_v28  ;;  %v1873_v59 = vsel %vm9528_vm11, %v1864_v40, %v1872_v12  ;;  %v2350_v58 = vrot.slane %v2348_v30, 3 }
  0x9c   : > { %v2353_v14 = vrot.slane %v2351_v48, 4  ;;  %v958_v47 = vshll.u32 %v7485_v7, 16  ;;  %v2346_v34 = vor.u32 %v2345_v53, %v2342_v44  ;;  %v6154_v49 = vcombine.low %v7389_v41, %v7457_v15 }
  0x9d   : > { %v2338_v2 = vsel %vm9531_vm12, %v2329_v9, %v2337_v43  ;;  %v951_v36 = vshrl.u32 %v7499_v42, 16  ;;  %v953_v51 = vshll.u32 %v7499_v42, 16  ;;  %v7513_v40 = vcombine.low %v599_v25, %v7501_v56 }
  0x9e   : > { %v7508_v5 = vpop.permute.xlu1 %1177  ;;  %v2354_v11 = vor.u32 %v2353_v14, %v2350_v58  ;;  %v970_v12 = vshll.u32 %v7491_v46, 16  ;;  %v960_v16 = vrot.slane %v958_v47, 1  ;;  %v6060_v9 = vcombine.low %v637_v26, %v7477_v28  ;;  %v7530_v58 = vld [vmem:[#allocation2 + $0x74] ss:$0 sps:$4 sm:$0x33]  }
  0x9f   : > { %2024 = vrot.lane.b32.xlu1 %v1873_v59, %s6839_s10  ;;  %2504 = vrot.lane.b32.xlu0 %v2338_v2, %s6840_s11  ;;  %v7520_v1 = vpop.permute.xlu0 %1657  ;;  %v955_v62 = vrot.slane %v953_v51, 1  ;;  %v6061_v41 = vcombine.low %v638_v18, %v7501_v56  ;;  %v6155_v15 = vcombine.low %v7406_v10, %v7463_v39  ;;  %v963_v25 = vshrl.u32 %v7513_v40, 16  ;;  %v669_v51 = vld [vmem:[#allocation2 + $0x60] sm:$0xc] }
  0xa0   : > { %v965_v44 = vshll.u32 %v7513_v40, 16  ;;  %v1152_v30 = vrot.slane %v7485_v7, 1  ;;  %v2355_v48 = vsel %vm9531_vm12, %v2346_v34, %v2354_v11  ;;  %v972_v53 = vrot.slane %v970_v12, 1 }
  0xa1   : > { %v956_v43 = vor.u32 %v955_v62, %v951_v36  ;;  %v1151_v59 = vrot.slane %v6060_v9, 1  ;;  %v1393_v47 = vshrl.u32 %v6060_v9, 16  ;;  %v1396_v18 = vshll.u32 %v6060_v9, 16 }
  0xa2   : > { %v7532_v26 = vpop.permute.xlu1 %1659  ;;  %v967_v14 = vrot.slane %v965_v44, 1  ;;  %v1401_v10 = vshrl.u32 %v7516_v20, 16  ;;  %v1154_v2 = vrot.slane %v6061_v41, 1  ;;  %v1155_v34 = vrot.slane %v7491_v46, 1 }
  0xa3   : > { %2153 = vrot.lane.b32.xlu1 %v2114_v50, %s6836_s28  ;;  %2552 = vrot.lane.b32.xlu0 %v6154_v49, %s6833_s25  ;;  %v7537_v39 = vpop.permute.xlu0 %2139  ;;  %v961_v7 = vsel %vm9525_vm10, %v956_v43, %v960_v16  ;;  %v1404_v36 = vshll.u32 %v7516_v20, 16  ;;  %v1395_v12 = vrot.slane %v1393_v47, 1  ;;  %v1398_v62 = vrot.slane %v1396_v18, 2 }
  0xa4   : > { %v968_v11 = vor.u32 %v967_v14, %v963_v25  ;;  %v1403_v9 = vrot.slane %v1401_v10, 1  ;;  %vm2704_vm2 = vcmask 162816   ;;  %v1410_v50 = vshrl.u32 %v6061_v41, 16  ;;  %v670_v25 = vld [vmem:[#allocation2 + $0x6c] sm:$0xc] }
  0xa5   : > { %v1406_v44 = vrot.slane %v1404_v36, 2  ;;  %v1413_v49 = vshll.u32 %v6061_v41, 16  ;;  %v1418_v24 = vshrl.u32 %v7530_v58, 16  ;;  %v1153_v16 = vsel %vm9526_vm6, %v1151_v59, %v1152_v30  ;;  %v7554_v36 = vld [vmem:[#allocation2 + $0x68] ss:$0 sps:$4 sm:$0x77]  }
  0xa6   : > { %v7543_v4 = vpop.permute.xlu1 %2141  ;;  %v1399_v46 = vor.u32 %v1398_v62, %v1395_v12  ;;  %v1421_v43 = vshll.u32 %v7530_v58, 16  ;;  %v6092_v8 = vcombine.low %v669_v51, %v7477_v28  ;;  %v7550_v18 = vrot.slane %v1410_v50, 1 }
  0xa7   : > { %2506 = vrot.lane.b32.xlu1 %v2355_v48, %s6840_s11  ;;  %2554 = vrot.lane.b32.xlu0 %v6155_v15, %s6833_s25  ;;  %v1047_v14 = vpop.permute.xlu0 %1046  ;;  %v1407_v47 = vor.u32 %v1406_v44, %v1403_v9  ;;  %v7552_v41 = vrot.slane %v1413_v49, 2  ;;  %v1420_v10 = vrot.slane %v1418_v24, 1  ;;  %vm2737_vm1 = vcmask 195584  }
  0xa8   : > { %v2574_v30 = vsel %vm9529_vm13, %v7012_v38, %v1047_v14  ;;  %v1423_v59 = vrot.slane %v1421_v43, 2  ;;  %v1633_v51 = vrot.slane %v6092_v8, 2  ;;  %v1634_v12 = vrot.slane %v7516_v20, 2 }
  0xa9   : > { %v973_v48 = vsel %vm9525_vm10, %v968_v11, %v972_v53  ;;  %v1156_v15 = vsel %vm9526_vm6, %v1154_v2, %v1155_v34  ;;  %v1408_v62 = vsel %vm1255_vm9, %v1399_v46, %v1407_v47  ;;  %v6093_v9 = vcombine.low %v670_v25, %v7501_v56 }
  0xaa   : > { %v1531_v44 = vpop.permute.xlu1 %1530  ;;  %v2607_v24 = vsel %vm2605_vm14, %v2574_v30, %v7489_v60  ;;  %v1416_v50 = vor.u32 %v7552_v41, %v7550_v18  ;;  %v1424_v38 = vor.u32 %v1423_v59, %v1420_v10  ;;  %vm2770_vm0 = vcmask 228352   ;;  %v7572_v60 = vld [vmem:[#allocation2 + $0x74] ss:$0 sps:$4 sm:$0x77]  }
  0xab   : > { %v1875_v49 = vshrl.u32 %v6092_v8, 16  ;;  %1062 = vrot.lane.b32.xlu1 %v961_v7, %s6837_s6  ;;  %1191 = vrot.lane.b32.xlu0 %v1153_v16, %s6834_s26  ;;  %v1049_v20 = vpop.permute.xlu0 %1048  ;;  %v1635_v53 = vsel %vm1608_vm7, %v1633_v51, %v1634_v12  ;;  %v1878_v2 = vshll.u32 %v6092_v8, 16  ;;  %v1883_v34 = vshrl.u32 %v7554_v36, 16  ;;  %v7583_v51 = vld [vmem:[%s6925_s24 + $0xe8] sm:$0xff] }
  0xac   : > { %v1886_v11 = vshll.u32 %v7554_v36, 16  ;;  %v2576_v46 = vsel %vm9529_vm13, %v7020_v54, %v1049_v20  ;;  %v1637_v43 = vrot.slane %v7530_v58, 2  ;;  %v1892_v25 = vshrl.u32 %v6093_v9, 16  ;;  %v7586_v54 = vld [vmem:[%s6925_s24 + $0xf0] sm:$0xff]  ;;  %v701_v20 = vld [vmem:[#allocation2 + $0x60] sm:$0x8] }
  0xad   : > { %v1877_v7 = vrot.slane %v1875_v49, 2  ;;  %v2609_v16 = vsel %vm2605_vm14, %v2576_v46, %v7508_v5  ;;  %v1636_v14 = vrot.slane %v6093_v9, 2  ;;  %v1880_v8 = vrot.slane %v1878_v2, 3 }
  0xae   : > { %v1885_v47 = vrot.slane %v1883_v34, 2  ;;  %v2013_v18 = vpop.permute.xlu1 %2012  ;;  %v2642_v41 = vsel %vm2638_vm15, %v2609_v16, %v1531_v44  ;;  %v1888_v10 = vrot.slane %v1886_v11, 3  ;;  %v7580_v30 = vrot.slane %v1892_v25, 2  ;;  %v7596_v25 = vld [vmem:[#allocation2 + $0x68] sm:$0xf] }
  0xaf   : > { %v1895_v59 = vshll.u32 %v6093_v9, 16  ;;  %1064 = vrot.lane.b32.xlu1 %v973_v48, %s6837_s6  ;;  %1544 = vrot.lane.b32.xlu0 %v1408_v62, %s6838_s7  ;;  %v2675_v5 = vsel %vm2671_vm3, %v2642_v41, %v7532_v26  ;;  %v1529_v58 = vpop.permute.xlu0 %1528  ;;  %v1881_v12 = vor.u32 %v1880_v8, %v1877_v7  ;;  %v1900_v49 = vshrl.u32 %v7572_v60, 16  ;;  %v702_v48 = vld [vmem:[#allocation2 + $0x6c] sm:$0x8] }
  0xb0   : > { %v1903_v44 = vshll.u32 %v7572_v60, 16  ;;  %vm2858_vm10 = vcmask 293888   ;;  %v2708_v9 = vsel %vm2704_vm2, %v2675_v5, %v2013_v18  ;;  %v2640_v2 = vsel %vm2638_vm15, %v2607_v24, %v1529_v58  ;;  %v7618_v5 = vld [vmem:[#allocation2 + $0x74] sm:$0xf] }
  0xb1   : > { %v1889_v34 = vor.u32 %v1888_v10, %v1885_v47  ;;  %v1897_v11 = vrot.slane %v1895_v59, 3  ;;  %vm2803_vm6 = vcmask 261120   ;;  %v1902_v62 = vrot.slane %v1900_v49, 2 }
  0xb2   : > { %v1905_v46 = vrot.slane %v1903_v44, 3  ;;  %v6413_v26 = vpack.c.bf16 %v7583_v51, %v7583_v51  ;;  %v6414_v7 = vpack.c.bf16 %v7586_v54, %v7586_v54  ;;  %v1425_v16 = vsel %vm1255_vm9, %v1416_v50, %v1424_v38  ;;  %v2495_v8 = vpop.permute.xlu1 %2494 }
  0xb3   : > { %v2741_v24 = vsel %vm2737_vm1, %v2708_v9, %v7543_v4  ;;  %v1638_v47 = vsel %vm1608_vm7, %v1636_v14, %v1637_v43  ;;  %v6124_v18 = vcombine.low %v701_v20, %v7477_v28  ;;  %1193 = vrot.lane.b32.xlu1 %v1156_v15, %s6834_s26  ;;  %1673 = vrot.lane.b32.xlu0 %v1635_v53, %s6835_s27  ;;  %v2011_v10 = vpop.permute.xlu0 %2010  ;;  %v2116_v50 = vrot.slane %v7554_v36, 3 }
  0xb4   : > { %v2673_v41 = vsel %vm2671_vm3, %v2640_v2, %v7520_v1  ;;  %v1890_v59 = vsel %vm9528_vm11, %v1881_v12, %v1889_v34  ;;  %v6125_v38 = vcombine.low %v702_v48, %v7501_v56  ;;  %v1898_v43 = vor.u32 %v1897_v11, %v7580_v30  ;;  %v7630_v48 = vld [vmem:[%s6925_s24 + $0xf8] sm:$0xff] }
  0xb5   : > { %v2706_v4 = vsel %vm2704_vm2, %v2673_v41, %v2011_v10  ;;  %v2115_v14 = vrot.slane %v6124_v18, 3  ;;  %v6140_v15 = vcombine.low %v7596_v25, %v7596_v25  ;;  %v2774_v53 = vsel %vm2770_vm0, %v2741_v24, %v2495_v8 }
  0xb6   : > { %v1906_v1 = vor.u32 %v1905_v46, %v1902_v62  ;;  %v2119_v58 = vrot.slane %v7572_v60, 3  ;;  %v2357_v12 = vshrl.u32 %v6124_v18, 16  ;;  %v1051_v36 = vpop.permute.xlu1 %1050  ;;  %v2739_v49 = vsel %vm2737_vm1, %v2706_v4, %v7537_v39 }
  0xb7   : > { %v2360_v44 = vshll.u32 %v6124_v18, 16  ;;  %v2365_v20 = vshrl.u32 %v6140_v15, 16  ;;  %v2368_v30 = vshll.u32 %v6140_v15, 16  ;;  %1546 = vrot.lane.b32.xlu1 %v1425_v16, %s6838_s7  ;;  %2026 = vrot.lane.b32.xlu0 %v1890_v59, %s6839_s10  ;;  %v2493_v9 = vpop.permute.xlu0 %2492  ;;  %v2117_v2 = vsel %vm9527_vm8, %v2115_v14, %v2116_v50 }
  0xb8   : > { %v2118_v34 = vrot.slane %v6125_v38, 3  ;;  %v2359_v11 = vrot.slane %v2357_v12, 3  ;;  %v6141_v60 = vcombine.low %v7618_v5, %v7618_v5  ;;  %v2772_v62 = vsel %vm2770_vm0, %v2739_v49, %v2493_v9 }
  0xb9   : > { %v2362_v39 = vrot.slane %v2360_v44, 4  ;;  %v2367_v46 = vrot.slane %v2365_v20, 3  ;;  %v2370_v8 = vrot.slane %v2368_v30, 4  ;;  %v2805_v16 = vsel %vm2803_vm6, %v2772_v62, %v7481_v32 }
  0xba   : > { %v2374_v24 = vshrl.u32 %v6125_v38, 16  ;;  %v2377_v18 = vshll.u32 %v6125_v38, 16  ;;  %v2382_v41 = vshrl.u32 %v6141_v60, 16  ;;  %v1053_v10 = vpop.permute.xlu1 %1052  ;;  %6492 = vmatprep.mubr.msk.bf16.mxu0 %vm2858_vm10, %v2805_v16  ;;  %v2385_v4 = vshll.u32 %v6141_v60, 16 }
  0xbb   : > { %v2363_v59 = vor.u32 %v2362_v39, %v2359_v11  ;;  %v2371_v50 = vor.u32 %v2370_v8, %v2367_v46  ;;  %v6415_v14 = vpack.c.bf16 %v7630_v48, %v7630_v48  ;;  %1675 = vrot.lane.b32.xlu1 %v1638_v47, %s6835_s27  ;;  %v1907_v15 = vsel %vm9528_vm11, %v1898_v43, %v1906_v1  ;;  %v7643_v38 = vpop.permute.xlu0 %1179  ;;  %v601_v8 = vld [vmem:[#allocation2 + $0x78] sm:$0xf] }
  0xbc   : > { %2155 = vrot.lane.b32.xlu0 %v2117_v2, %s6836_s28  ;;  %v2807_v32 = vsel %vm2803_vm6, %v2774_v53, %v7495_v27  ;;  %v2376_v12 = vrot.slane %v2374_v24, 3  ;;  %v2379_v49 = vrot.slane %v2377_v18, 4  ;;  %v2384_v20 = vrot.slane %v2382_v41, 3 }
  0xbd   : > { %6493 = vmatmul.mubr.msk.bf16.vlgmr.msra.gmra.mrb[0].mxu0 %vm2858_vm10, %v2807_v32  ;;  %v2372_v44 = vsel %vm9531_vm12, %v2363_v59, %v2371_v50  ;;  %v2387_v30 = vrot.slane %v2385_v4, 4  ;;  %v450_v9 = vrot.slane %v7369_v3, 4  ;;  %v2578_v47 = vsel %vm9529_vm13, %v7059_v55, %v1051_v36  ;;  %v703_v59 = vld [vmem:[#allocation2 + $0x78] sm:$0x8] }
  0xbe   : > { %v2120_v43 = vsel %vm9527_vm8, %v2118_v34, %v2119_v58  ;;  %v453_v1 = vrot.slane %v7379_v52, 4  ;;  %v454_v27 = vrot.slane %v6406_v13, 6  ;;  %v1182_v53 = vpop.permute.xlu1 %1181  ;;  %v6156_v2 = vcombine.low %v7477_v28, %v7596_v25 }
  0xbf   : > { %v452_v11 = vsel %vm6937_vm5, %v450_v9, %v7379_v52  ;;  %v456_v55 = vrot.slane %v6407_v61, 6  ;;  %v459_v3 = vrot.slane %v6408_v37, 6  ;;  %2028 = vrot.lane.b32.xlu1 %v1907_v15, %s6839_s10  ;;  %v2580_v22 = vsel %vm9529_vm13, %v7078_v21, %v1053_v10  ;;  %v1533_v13 = vpop.permute.xlu0 %1532  ;;  %v671_v10 = vld [vmem:[#allocation2 + $0x78] sm:$0xc] }
  0xc0   : > { %2508 = vrot.lane.b32.xlu0 %v2372_v44, %s6840_s11  ;;  %559 = vst.msk [vmem:[#allocation2 + $0x7c] sm:$0xf] %vm9530_vm4, %v452_v11  ;;  %vm9535_vm8 = vcmask 25600   ;;  %v455_v52 = vrot.slane %v454_v27, 4  ;;  %vm9536_vm11 = vcmask 27650   ;;  %v461_v0 = vrot.slane %v6409_v23, 6 }
  0xc1   : > { %560 = vst.msk [vmem:[#allocation2 + $0x80] sm:$0x3] %vm9535_vm8, %v453_v1  ;;  %v464_v61 = vrot.slane %v9537_v35, 6  ;;  %v2380_v37 = vor.u32 %v2379_v49, %v2376_v12  ;;  %v2388_v21 = vor.u32 %v2387_v30, %v2384_v20  ;;  %v458_v28 = vrot.slane %v456_v55, 4  ;;  %vm9538_vm13 = vmmov %vm9536_vm11 }
  0xc2   : > { %561 = vst.msk [vmem:[#allocation2 + $0x84] sm:$0xc] %vm9536_vm11, %v454_v27  ;;  %v460_v25 = vrot.slane %v459_v3, 4  ;;  %v457_v58 = vsel %vm6937_vm5, %v455_v52, %v456_v55  ;;  %v463_v36 = vrot.slane %v461_v0, 4  ;;  %v9539_v60 = vpack.c.bf16 %v7448_v63, %v7448_v63  ;;  %vm9540_vm8 = vmmov %vm9536_vm11  ;;  %v1535_v23 = vpop.permute.xlu1 %1534 }
  0xc3   : > { %564 = vst.msk [vmem:[#allocation2 + $0x90] sm:$0xc] %vm9538_vm13, %v459_v3  ;;  %v465_v34 = vrot.slane %v464_v61, 4  ;;  %vm9541_vm11 = vcmask 25600   ;;  %v9542_v48 = vpack.c.bf16 %v7471_v57, %v7471_v57  ;;  %v471_v39 = vrot.slane %v6413_v26, 6  ;;  %2157 = vrot.lane.b32.xlu1 %v2120_v43, %s6836_s28  ;;  %v1662_v46 = vpop.permute.xlu0 %1661 }
  0xc4   : > { %v466_v29 = vrot.slane %v9539_v60, 6  ;;  %567 = vst.msk [vmem:[#allocation2 + $0x9c] sm:$0xc] %vm9540_vm8, %v464_v61  ;;  %v462_v17 = vsel %vm6937_vm5, %v460_v25, %v461_v0  ;;  %v474_v63 = vrot.slane %v6414_v7, 6  ;;  %2556 = vrot.lane.b32.xlu0 %v6156_v2, %s6833_s25  ;;  %v6157_v16 = vcombine.low %v7501_v56, %v7618_v5  ;;  %vm9543_vm13 = vmmov %vm9541_vm11  ;;  %v639_v7 = vld [vmem:[#allocation2 + $0x78] sm:$0xe] }
  0xc5   : > { %562 = vst.msk [vmem:[#allocation2 + $0x88] sm:$0xf] %vm9530_vm4, %v457_v58  ;;  %v469_v62 = vrot.slane %v9542_v48, 6  ;;  %565 = vst.msk [vmem:[#allocation2 + $0x94] sm:$0xf] %vm9530_vm4, %v462_v17  ;;  %v476_v26 = vrot.slane %v6415_v14, 6  ;;  %v2389_v54 = vsel %vm9531_vm12, %v2380_v37, %v2388_v21  ;;  %v2611_v56 = vsel %vm2605_vm14, %v2578_v47, %v7643_v38 }
  0xc6   : > { %563 = vst.msk [vmem:[#allocation2 + $0x8c] sm:$0x3] %vm9541_vm11, %v458_v28  ;;  %v467_v57 = vsel %vm6937_vm5, %v465_v34, %v466_v29  ;;  %v468_v51 = vrot.slane %v466_v29, 4  ;;  %v473_v18 = vrot.slane %v471_v39, 4  ;;  %v475_v41 = vrot.slane %v474_v63, 4  ;;  %vm9544_vm11 = vmmov %vm9540_vm8  ;;  %v1664_v32 = vpop.permute.xlu1 %1663 }
  0xc7   : > { %566 = vst.msk [vmem:[#allocation2 + $0x98] sm:$0x3] %vm9543_vm13, %v463_v36  ;;  %v470_v24 = vrot.slane %v469_v62, 4  ;;  %v2613_v5 = vsel %vm2605_vm14, %v2580_v22, %v1182_v53  ;;  %v478_v50 = vrot.slane %v476_v26, 4  ;;  %v2644_v4 = vsel %vm2638_vm15, %v2611_v56, %v1533_v13  ;;  %v7717_v15 = vld [vmem:[#allocation2 + $0x7c] sm:$0xf]  ;;  %2510 = vrot.lane.b32.xlu1 %v2389_v54, %s6840_s11  ;;  %v2015_v9 = vpop.permute.xlu0 %2014 }
  0xc8   : > { %568 = vst.msk [vmem:[#allocation2 + $0xa0] sm:$0xf] %vm9530_vm4, %v467_v57  ;;  %v2646_v14 = vsel %vm2638_vm15, %v2613_v5, %v1535_v23  ;;  %v477_v38 = vsel %vm6937_vm5, %v475_v41, %v476_v26  ;;  %v2677_v44 = vsel %vm2671_vm3, %v2644_v4, %v1662_v46  ;;  %v7727_v20 = vcombine.low %v601_v8, %v7717_v15  ;;  %v6647_v30 = vld [vmem:[#allocation2 + $0x80] ss:$0 sps:$4 sm:$0x11]  }
  0xc9   : > { %570 = vst.msk [vmem:[#allocation2 + $0xa8] sm:$0xc] %vm9540_vm8, %v469_v62  ;;  %v603_v12 = vld [vmem:[#allocation2 + $0x84] sm:$0xf]  ;;  %v472_v49 = vsel %vm6937_vm5, %v470_v24, %v471_v39  ;;  %vm9545_vm8 = vmmov %vm9543_vm13  ;;  %2558 = vrot.lane.b32.xlu0 %v6157_v16, %s6833_s25  ;;  %v6062_v47 = vcombine.low %v639_v7, %v7717_v15  ;;  %v2679_v1 = vsel %vm2671_vm3, %v2646_v14, %v1664_v32  ;;  %v982_v55 = vshll.u32 %v6647_v30, 16 }
  0xca   : > { %573 = vst.msk [vmem:[#allocation2 + $0xb4] sm:$0xc] %vm9544_vm11, %v474_v63  ;;  %v640_v43 = vld [vmem:[#allocation2 + $0x84] sm:$0xe]  ;;  %vm9546_vm11 = vmmov %vm9545_vm8  ;;  %v2710_v27 = vsel %vm2704_vm2, %v2677_v44, %v2015_v9  ;;  %v7737_v53 = vcombine.low %v671_v10, %v7717_v15  ;;  %v975_v2 = vshrl.u32 %v7727_v20, 16  ;;  %v977_v11 = vshll.u32 %v7727_v20, 16  ;;  %v2017_v61 = vpop.permute.xlu1 %2016 }
  0xcb   : > { %569 = vst.msk [vmem:[#allocation2 + $0xa4] sm:$0x3] %vm9543_vm13, %v468_v51  ;;  %v1157_v22 = vrot.slane %v6062_v47, 1  ;;  %v7743_v13 = vld [vmem:[#allocation2 + $0x80] ss:$0 sps:$4 sm:$0x33]   ;;  %v7750_v21 = vcombine.low %v703_v59, %v7717_v15  ;;  %v2712_v58 = vsel %vm2704_vm2, %v2679_v1, %v2017_v61  ;;  %v2144_v36 = vpop.permute.xlu0 %2143 }
  0xcc   : > { %572 = vst.msk [vmem:[#allocation2 + $0xb0] sm:$0x3] %vm9545_vm8, %v473_v18  ;;  %v7741_v3 = vld [vmem:[#allocation2 + $0x88] sm:$0xf]  ;;  %v1158_v35 = vrot.slane %v6647_v30, 1  ;;  %v979_v28 = vrot.slane %v977_v11, 1  ;;  %v2743_v39 = vsel %vm2737_vm1, %v2710_v27, %v2144_v36 }
  0xcd   : > { %571 = vst.msk [vmem:[#allocation2 + $0xac] sm:$0xf] %vm9530_vm4, %v472_v49  ;;  %574 = vst.msk [vmem:[#allocation2 + $0xb8] sm:$0xf] %vm9530_vm4, %v477_v38  ;;  %v7746_v52 = vcombine.low %v603_v12, %v7741_v3  ;;  %v6063_v37 = vcombine.low %v640_v43, %v7741_v3  ;;  %v984_v25 = vrot.slane %v982_v55, 1  ;;  %v1427_v34 = vshrl.u32 %v6062_v47, 16 }
  0xce   : > { %575 = vst.msk [vmem:[#allocation2 + $0xbc] sm:$0x3] %vm9546_vm11, %v478_v50  ;;  %v6649_v0 = vld [vmem:[#allocation2 + $0x8c] ss:$0 sps:$4 sm:$0x11]   ;;  %vm9547_vm13 = vcmask 1046528   ;;  %v980_v62 = vor.u32 %v979_v28, %v975_v2  ;;  %v2146_v26 = vpop.permute.xlu1 %2145 }
  0xcf   : > { %v987_v60 = vshrl.u32 %v7746_v52, 16  ;;  %v989_v29 = vshll.u32 %v7746_v52, 16  ;;  %v994_v23 = vshll.u32 %v6649_v0, 16  ;;  %v1159_v17 = vsel %vm9547_vm13, %v1157_v22, %v1158_v35  ;;  %v7756_v48 = vld [vmem:[#allocation2 + $0x8c] ss:$0 sps:$4 sm:$0x33]   ;;  %vm9549_vm11 = vmmov %vm9547_vm13  ;;  %v2497_v41 = vpop.permute.xlu0 %2496 }
  0xd0   : > { %1195 = vrot.lane.b32.xlu0 %v1159_v17, %s6834_s26  ;;  %v1160_v63 = vrot.slane %v6063_v37, 1  ;;  %v1161_v46 = vrot.slane %v6649_v0, 1  ;;  %v1429_v57 = vrot.slane %v1427_v34, 1  ;;  %v1430_v51 = vshll.u32 %v6062_v47, 16  ;;  %v672_v9 = vld [vmem:[#allocation2 + $0x84] sm:$0xc] }
  0xd1   : > { %v991_v8 = vrot.slane %v989_v29, 1  ;;  %v996_v16 = vrot.slane %v994_v23, 1  ;;  %vm9548_vm8 = vsmask.f32 7424  ;;  %v1435_v24 = vshrl.u32 %v7743_v13, 16 }
  0xd2   : > { %v985_v54 = vsel %vm9548_vm8, %v980_v62, %v984_v25  ;;  %v1162_v7 = vsel %vm9549_vm11, %v1160_v63, %v1161_v46  ;;  %v1438_v18 = vshll.u32 %v7743_v13, 16  ;;  %v1432_v5 = vrot.slane %v1430_v51, 2  ;;  %vm9550_vm13 = vmmov %vm9548_vm8  ;;  %v2499_v30 = vpop.permute.xlu1 %2498  ;;  %v6654_v11 = vld [vmem:[#allocation2 + $0x80] ss:$0 sps:$4 sm:$0x77]  }
  0xd3   : > { %1066 = vrot.lane.b32.xlu1 %v985_v54, %s6837_s6  ;;  %v992_v56 = vor.u32 %v991_v8, %v987_v60  ;;  %v2745_v10 = vsel %vm2737_vm1, %v2712_v58, %v2146_v26  ;;  %v2776_v59 = vsel %vm2770_vm0, %v2743_v39, %v2497_v41  ;;  %v1437_v50 = vrot.slane %v1435_v24, 1  ;;  %v2545_v2 = vpop.permute.xlu0 %2544  ;;  %v7777_v58 = vld [vmem:[#allocation2 + $0x8c] ss:$0 sps:$4 sm:$0x77]  }
  0xd4   : > { %v1440_v4 = vrot.slane %v1438_v18, 2  ;;  %v1444_v14 = vshrl.u32 %v6063_v37, 16  ;;  %v1447_v32 = vshll.u32 %v6063_v37, 16  ;;  %v1433_v49 = vor.u32 %v1432_v5, %v1429_v57  ;;  %v704_v57 = vld [vmem:[#allocation2 + $0x84] sm:$0x8] }
  0xd5   : > { %v997_v12 = vsel %vm9550_vm13, %v992_v56, %v996_v16  ;;  %v1452_v38 = vshrl.u32 %v7756_v48, 16  ;;  %v1455_v44 = vshll.u32 %v7756_v48, 16  ;;  %v1639_v27 = vrot.slane %v7737_v53, 2 }
  0xd6   : > { %v1441_v47 = vor.u32 %v1440_v4, %v1437_v50  ;;  %v1446_v43 = vrot.slane %v1444_v14, 1  ;;  %v1449_v1 = vrot.slane %v1447_v32, 2  ;;  %v1640_v0 = vrot.slane %v7743_v13, 2  ;;  %v1055_v29 = vpop.permute.xlu1 %1054  ;;  %v7796_v50 = vld [vmem:[#allocation2 + $0x80] sm:$0xf] }
  0xd7   : > { %1068 = vrot.lane.b32.xlu1 %v997_v12, %s6837_s6  ;;  %v1454_v55 = vrot.slane %v1452_v38, 1  ;;  %v1457_v22 = vrot.slane %v1455_v44, 2  ;;  %v2778_v35 = vsel %vm2770_vm0, %v2745_v10, %v2499_v30  ;;  %v2809_v28 = vsel %vm2803_vm6, %v2776_v59, %v2545_v2  ;;  %v2547_v63 = vpop.permute.xlu0 %2546 }
  0xd8   : > { %v1442_v61 = vsel %vm1255_vm9, %v1433_v49, %v1441_v47  ;;  %v1450_v37 = vor.u32 %v1449_v1, %v1446_v43  ;;  %v6095_v25 = vcombine.low %v672_v9, %v7741_v3  ;;  %v1641_v34 = vsel %vm1608_vm7, %v1639_v27, %v1640_v0  ;;  %6496 = vmatprep.mubr.msk.bf16.mxu0 %vm2858_vm10, %v2809_v28  ;;  %v7799_v49 = vld [vmem:[#allocation2 + $0x8c] sm:$0xf] }
  0xd9   : > { %1548 = vrot.lane.b32.xlu0 %v1442_v61, %s6838_s7  ;;  %v1458_v36 = vor.u32 %v1457_v22, %v1454_v55  ;;  %v1643_v60 = vrot.slane %v7756_v48, 2  ;;  %v1909_v13 = vshrl.u32 %v7737_v53, 16  ;;  %v1912_v17 = vshll.u32 %v7737_v53, 16 }
  0xda   : > { %v1642_v23 = vrot.slane %v6095_v25, 2  ;;  %v1917_v62 = vshrl.u32 %v6654_v11, 16  ;;  %v1920_v39 = vshll.u32 %v6654_v11, 16  ;;  %vm9551_vm8 = vcmask 31744  }
  0xdb   : > { %1197 = vrot.lane.b32.xlu1 %v1162_v7, %s6834_s26  ;;  %v1459_v46 = vsel %vm1255_vm9, %v1450_v37, %v1458_v36  ;;  %v1911_v8 = vrot.slane %v1909_v13, 2  ;;  %v2582_v16 = vsel %vm9551_vm8, %v7165_v6, %v1055_v29  ;;  %v2811_v48 = vsel %vm2803_vm6, %v2778_v35, %v2547_v63  ;;  %v1184_v59 = vpop.permute.xlu0 %1183 }
  0xdc   : > { %v1644_v51 = vsel %vm1608_vm7, %v1642_v23, %v1643_v60  ;;  %v1914_v26 = vrot.slane %v1912_v17, 3  ;;  %v1919_v54 = vrot.slane %v1917_v62, 2  ;;  %v1922_v24 = vrot.slane %v1920_v39, 3  ;;  %6497 = vmatmul.mubr.msk.bf16.gmra.mrb[4].mxu0 %vm2858_vm10, %v2811_v48  ;;  %v7822_v39 = vld [vmem:[#allocation2 + $0x94] sm:$0xf] }
  0xdd   : > { %1677 = vrot.lane.b32.xlu0 %v1641_v34, %s6835_s27  ;;  %v1926_v53 = vshrl.u32 %v6095_v25, 16  ;;  %v1929_v7 = vshll.u32 %v6095_v25, 16  ;;  %v1934_v18 = vshrl.u32 %v7777_v58, 16  ;;  %v1937_v41 = vshll.u32 %v7777_v58, 16  ;;  %v605_v25 = vld [vmem:[#allocation2 + $0x90] sm:$0xf] }
  0xde   : > { %v1915_v56 = vor.u32 %v1914_v26, %v1911_v8  ;;  %v1923_v6 = vor.u32 %v1922_v24, %v1919_v54  ;;  %v2121_v5 = vrot.slane %v7750_v21, 3  ;;  %v2122_v10 = vrot.slane %v6654_v11, 3  ;;  %v7828_v24 = vld [vmem:[#allocation2 + $0xa0] sm:$0xf] }
  0xdf   : > { %1550 = vrot.lane.b32.xlu1 %v1459_v46, %s6838_s7  ;;  %v1928_v4 = vrot.slane %v1926_v53, 2  ;;  %v1931_v14 = vrot.slane %v1929_v7, 3  ;;  %v1936_v32 = vrot.slane %v1934_v18, 2  ;;  %v1939_v12 = vrot.slane %v1937_v41, 3  ;;  %v1537_v22 = vpop.permute.xlu0 %1536 }
  0xe0   : > { %vm9552_vm11 = vsmask.f32 5376  ;;  %vm9553_vm13 = vcmask 1044480   ;;  %v2615_v30 = vsel %vm2605_vm14, %v2582_v16, %v1184_v59  ;;  %v6127_v9 = vcombine.low %v704_v57, %v7741_v3  ;;  %v607_v57 = vld [vmem:[#allocation2 + $0x9c] sm:$0xf] }
  0xe1   : > { %v1924_v38 = vsel %vm9552_vm11, %v1915_v56, %v1923_v6  ;;  %v2123_v44 = vsel %vm9553_vm13, %v2121_v5, %v2122_v10  ;;  %v1932_v47 = vor.u32 %v1931_v14, %v1928_v4  ;;  %v1940_v43 = vor.u32 %v1939_v12, %v1936_v32  ;;  %vm9554_vm8 = vmmov %vm9552_vm11  ;;  %v6662_v53 = vld [vmem:[#allocation2 + $0xa4] ss:$0 sps:$4 sm:$0x11]   ;;  %v641_v5 = vld [vmem:[#allocation2 + $0x90] sm:$0xe] }
  0xe2   : > { %2030 = vrot.lane.b32.xlu0 %v1924_v38, %s6839_s10  ;;  %v2125_v1 = vrot.slane %v7777_v58, 3  ;;  %v6142_v27 = vcombine.low %v7796_v50, %v7796_v50  ;;  %v2124_v2 = vrot.slane %v6127_v9, 3  ;;  %v2391_v11 = vshrl.u32 %v7750_v21, 16  ;;  %v1057_v58 = vpop.permute.xlu1 %1056  ;;  %vm9555_vm11 = vmmov %vm9553_vm13 }
  0xe3   : > { %v2394_v55 = vshll.u32 %v7750_v21, 16  ;;  %v6143_v0 = vcombine.low %v7799_v49, %v7799_v49  ;;  %1679 = vrot.lane.b32.xlu1 %v1644_v51, %s6835_s27  ;;  %v1941_v35 = vsel %vm9554_vm8, %v1932_v47, %v1940_v43  ;;  %v2648_v28 = vsel %vm2638_vm15, %v2615_v30, %v1537_v22  ;;  %v7817_v21 = vld [vmem:[#allocation2 + $0x98] ss:$0 sps:$4 sm:$0x11]   ;;  %v1666_v48 = vpop.permute.xlu0 %1665 }
  0xe4   : > { %v2399_v61 = vshrl.u32 %v6142_v27, 16  ;;  %v2402_v37 = vshll.u32 %v6142_v27, 16  ;;  %v2126_v36 = vsel %vm9555_vm11, %v2124_v2, %v2125_v1  ;;  %v2393_v34 = vrot.slane %v2391_v11, 3  ;;  %v7850_v11 = vld [vmem:[#allocation2 + $0x98] ss:$0 sps:$4 sm:$0x33]  }
  0xe5   : > { %v2396_v60 = vrot.slane %v2394_v55, 4  ;;  %v2408_v13 = vshrl.u32 %v6127_v9, 16  ;;  %vm9556_vm13 = vcmask 31744   ;;  %v2411_v62 = vshll.u32 %v6127_v9, 16 }
  0xe6   : > { %2159 = vrot.lane.b32.xlu0 %v2123_v44, %s6836_s28  ;;  %v2584_v29 = vsel %vm9556_vm13, %v7255_v45, %v1057_v58  ;;  %v2401_v23 = vrot.slane %v2399_v61, 3  ;;  %v2404_v17 = vrot.slane %v2402_v37, 4  ;;  %v2416_v8 = vshrl.u32 %v6143_v0, 16  ;;  %v1186_v7 = vpop.permute.xlu1 %1185 }
  0xe7   : > { %v2397_v63 = vor.u32 %v2396_v60, %v2393_v34  ;;  %v2410_v46 = vrot.slane %v2408_v13, 3  ;;  %v2419_v16 = vshll.u32 %v6143_v0, 16  ;;  %2032 = vrot.lane.b32.xlu1 %v1941_v35, %s6839_s10  ;;  %v2413_v26 = vrot.slane %v2411_v62, 4  ;;  %v2019_v44 = vpop.permute.xlu0 %2018 }
  0xe8   : > { %v2405_v51 = vor.u32 %v2404_v17, %v2401_v23  ;;  %v6158_v54 = vcombine.low %v7717_v15, %v7796_v50  ;;  %v2681_v45 = vsel %vm2671_vm3, %v2648_v28, %v1666_v48  ;;  %v2418_v18 = vrot.slane %v2416_v8, 3  ;;  %v642_v50 = vld [vmem:[#allocation2 + $0x9c] sm:$0xe] }
  0xe9   : > { %v2421_v41 = vrot.slane %v2419_v16, 4  ;;  %v7831_v56 = vcombine.low %v605_v25, %v7822_v39  ;;  %v1006_v6 = vshll.u32 %v7817_v21, 16  ;;  %v2617_v59 = vsel %vm2605_vm14, %v2584_v29, %v1186_v7 }
  0xea   : > { %v2406_v10 = vsel %vm9531_vm12, %v2397_v63, %v2405_v51  ;;  %v2414_v4 = vor.u32 %v2413_v26, %v2410_v46  ;;  %v6159_v15 = vcombine.low %v7741_v3, %v7799_v49  ;;  %v2714_v30 = vsel %vm2704_vm2, %v2681_v45, %v2019_v44  ;;  %v1539_v43 = vpop.permute.xlu1 %1538  ;;  %v7875_v44 = vld [vmem:[#allocation2 + $0x98] ss:$0 sps:$4 sm:$0x77]  }
  0xeb   : > { %2512 = vrot.lane.b32.xlu0 %v2406_v10, %s6840_s11  ;;  %v2422_v14 = vor.u32 %v2421_v41, %v2418_v18  ;;  %v999_v32 = vshrl.u32 %v7831_v56, 16  ;;  %v1001_v12 = vshll.u32 %v7831_v56, 16  ;;  %v1008_v38 = vrot.slane %v1006_v6, 1  ;;  %2161 = vrot.lane.b32.xlu1 %v2126_v36, %s6836_s28  ;;  %v2148_v28 = vpop.permute.xlu0 %2147  ;;  %v7856_v36 = vld [vmem:[#allocation2 + $0xa4] ss:$0 sps:$4 sm:$0x33]  }
  0xec   : > { %v7844_v9 = vcombine.low %v607_v57, %v7828_v24  ;;  %v1018_v47 = vshll.u32 %v6662_v53, 16  ;;  %v6064_v3 = vcombine.low %v641_v5, %v7822_v39  ;;  %v1164_v27 = vrot.slane %v7817_v21, 1  ;;  %v674_v5 = vld [vmem:[#allocation2 + $0x9c] sm:$0xc] }
  0xed   : > { %v2423_v49 = vsel %vm9531_vm12, %v2414_v4, %v2422_v14  ;;  %v1003_v1 = vrot.slane %v1001_v12, 1  ;;  %v6065_v2 = vcombine.low %v642_v50, %v7828_v24  ;;  %v2650_v55 = vsel %vm2638_vm15, %v2617_v59, %v1539_v43 }
  0xee   : > { %v1011_v22 = vshrl.u32 %v7844_v9, 16  ;;  %v1013_v0 = vshll.u32 %v7844_v9, 16  ;;  %v1020_v35 = vrot.slane %v1018_v47, 1  ;;  %v1163_v37 = vrot.slane %v6064_v3, 1  ;;  %v1668_v23 = vpop.permute.xlu1 %1667 }
  0xef   : > { %2560 = vrot.lane.b32.xlu0 %v6158_v54, %s6833_s25  ;;  %v1004_v61 = vor.u32 %v1003_v1, %v999_v32  ;;  %v1166_v25 = vrot.slane %v6065_v2, 1  ;;  %v1167_v58 = vrot.slane %v6662_v53, 1  ;;  %2514 = vrot.lane.b32.xlu1 %v2423_v49, %s6840_s11  ;;  %v2747_v60 = vsel %vm2737_vm1, %v2714_v30, %v2148_v28  ;;  %v2501_v26 = vpop.permute.xlu0 %2500  ;;  %v673_v53 = vld [vmem:[#allocation2 + $0x90] sm:$0xc] }
  0xf0   : > { %v1015_v34 = vrot.slane %v1013_v0, 1  ;;  %v1461_v13 = vshrl.u32 %v6064_v3, 16  ;;  %v1464_v21 = vshll.u32 %v6064_v3, 16  ;;  %vm9557_vm8 = vsmask.f32 7424 }
  0xf1   : > { %v1009_v29 = vsel %vm9557_vm8, %v1004_v61, %v1008_v38  ;;  %vm9558_vm11 = vcmask 1046528   ;;  %v1469_v63 = vshrl.u32 %v7850_v11, 16  ;;  %v2683_v46 = vsel %vm2671_vm3, %v2650_v55, %v1668_v23 }
  0xf2   : > { %v1165_v17 = vsel %vm9558_vm11, %v1163_v37, %v1164_v27  ;;  %vm9559_vm13 = vmmov %vm9558_vm11  ;;  %v1016_v8 = vor.u32 %v1015_v34, %v1011_v22  ;;  %v1463_v16 = vrot.slane %v1461_v13, 1  ;;  %v1466_v48 = vrot.slane %v1464_v21, 2  ;;  %v2021_v10 = vpop.permute.xlu1 %2020  ;;  %v7882_v22 = vld [vmem:[#allocation2 + $0xa4] ss:$0 sps:$4 sm:$0x77]  }
  0xf3   : > { %v1168_v62 = vsel %vm9559_vm13, %v1166_v25, %v1167_v58  ;;  %2562 = vrot.lane.b32.xlu0 %v6159_v15, %s6833_s25  ;;  %v1471_v57 = vrot.slane %v1469_v63, 1  ;;  %v1472_v51 = vshll.u32 %v7850_v11, 16  ;;  %v1478_v54 = vshrl.u32 %v6065_v2, 16  ;;  %1070 = vrot.lane.b32.xlu1 %v1009_v29, %s6837_s6  ;;  %v2549_v49 = vpop.permute.xlu0 %2548 }
  0xf4   : > { %v1481_v45 = vshll.u32 %v6065_v2, 16  ;;  %v1021_v7 = vsel %vm9557_vm8, %v1016_v8, %v1020_v35  ;;  %v1467_v18 = vor.u32 %v1466_v48, %v1463_v16  ;;  %v2780_v41 = vsel %vm2770_vm0, %v2747_v60, %v2501_v26  ;;  %v705_v60 = vld [vmem:[#allocation2 + $0x90] sm:$0x8] }
  0xf5   : > { %v1486_v6 = vshrl.u32 %v7856_v36, 16  ;;  %v1474_v59 = vrot.slane %v1472_v51, 2  ;;  %v1480_v4 = vrot.slane %v1478_v54, 1  ;;  %v1489_v50 = vshll.u32 %v7856_v36, 16  ;;  %v706_v54 = vld [vmem:[#allocation2 + $0x9c] sm:$0x8] }
  0xf6   : > { %v1483_v15 = vrot.slane %v1481_v45, 2  ;;  %v2716_v14 = vsel %vm2704_vm2, %v2683_v46, %v2021_v10  ;;  %v6096_v12 = vcombine.low %v673_v53, %v7822_v39  ;;  %v1646_v38 = vrot.slane %v7850_v11, 2  ;;  %v2150_v0 = vpop.permute.xlu1 %2149 }
  0xf7   : > { %v1488_v32 = vrot.slane %v1486_v6, 1  ;;  %1199 = vrot.lane.b32.xlu0 %v1165_v17, %s6834_s26  ;;  %v1475_v30 = vor.u32 %v1474_v59, %v1471_v57  ;;  %v1491_v3 = vrot.slane %v1489_v50, 2  ;;  %v6097_v43 = vcombine.low %v674_v5, %v7828_v24  ;;  %1072 = vrot.lane.b32.xlu1 %v1021_v7, %s6837_s6  ;;  %v2551_v23 = vpop.permute.xlu0 %2550 }
  0xf8   : > { %v1484_v47 = vor.u32 %v1483_v15, %v1480_v4  ;;  %v1645_v1 = vrot.slane %v6096_v12, 2  ;;  %v2813_v27 = vsel %vm2803_vm6, %v2780_v41, %v2549_v49  ;;  %v1649_v2 = vrot.slane %v7856_v36, 2  ;;  %v7898_v41 = vld [vmem:[#allocation2 + $0x98] sm:$0xf] }
  0xf9   : > { %v1943_v55 = vshrl.u32 %v6096_v12, 16  ;;  %v1476_v11 = vsel %vm1255_vm9, %v1467_v18, %v1475_v30  ;;  %v1492_v35 = vor.u32 %v1491_v3, %v1488_v32  ;;  %v1648_v61 = vrot.slane %v6097_v43, 2  ;;  %6500 = vmatprep.mubr.msk.bf16.mxu0 %vm2858_vm10, %v2813_v27  ;;  %v7910_v3 = vld [vmem:[#allocation2 + $0xa4] sm:$0xf] }
  0xfa   : > { %v1946_v37 = vshll.u32 %v6096_v12, 16  ;;  %v2749_v28 = vsel %vm2737_vm1, %v2716_v14, %v2150_v0  ;;  %v1647_v25 = vsel %vm1608_vm7, %v1645_v1, %v1646_v38  ;;  %v1951_v34 = vshrl.u32 %v7875_v44, 16  ;;  %v2503_v16 = vpop.permute.xlu1 %2502 }
  0xfb   : > { %v1945_v58 = vrot.slane %v1943_v55, 2  ;;  %1552 = vrot.lane.b32.xlu0 %v1476_v11, %s6838_s7  ;;  %v1493_v36 = vsel %vm1255_vm9, %v1484_v47, %v1492_v35  ;;  %v1650_v13 = vsel %vm1608_vm7, %v1648_v61, %v1649_v2  ;;  %v1954_v29 = vshll.u32 %v7875_v44, 16  ;;  %1201 = vrot.lane.b32.xlu1 %v1168_v62, %s6834_s26  ;;  %v1188_v59 = vpop.permute.xlu0 %1187  ;;  %v7921_v61 = vld [vmem:[#allocation2 + $0xb0] ss:$0 sps:$4 sm:$0x11]  }
  0xfc   : > { %v1948_v21 = vrot.slane %v1946_v37, 3  ;;  %v1953_v17 = vrot.slane %v1951_v34, 2  ;;  %v1960_v63 = vshrl.u32 %v6097_v43, 16  ;;  %v1963_v46 = vshll.u32 %v6097_v43, 16 }
  0xfd   : > { %v1968_v8 = vshrl.u32 %v7882_v22, 16  ;;  %v1956_v57 = vrot.slane %v1954_v29, 3  ;;  %v1971_v51 = vshll.u32 %v7882_v22, 16  ;;  %v6128_v26 = vcombine.low %v705_v60, %v7822_v39 }
  0xfe   : > { %v1949_v48 = vor.u32 %v1948_v21, %v1945_v58  ;;  %v2782_v45 = vsel %vm2770_vm0, %v2749_v28, %v2503_v16  ;;  %v1962_v53 = vrot.slane %v1960_v63, 2  ;;  %v1965_v7 = vrot.slane %v1963_v46, 3  ;;  %v1059_v12 = vpop.permute.xlu1 %1058  ;;  %v7930_v63 = vld [vmem:[#allocation2 + $0xb8] sm:$0xf] }
  0xff   : > { %v1970_v18 = vrot.slane %v1968_v8, 2  ;;  %1681 = vrot.lane.b32.xlu0 %v1647_v25, %s6835_s27  ;;  %v1957_v62 = vor.u32 %v1956_v57, %v1953_v17  ;;  %v2815_v6 = vsel %vm2803_vm6, %v2782_v45, %v2551_v23  ;;  %v1973_v5 = vrot.slane %v1971_v51, 3  ;;  %1554 = vrot.lane.b32.xlu1 %v1493_v36, %s6838_s7  ;;  %v7924_v36 = vld [vmem:[#allocation2 + $0xac] sm:$0xf]  ;;  %v611_v17 = vld [vmem:[#allocation2 + $0xb4] sm:$0xf] }
 0x100   : > { %v2127_v10 = vrot.slane %v6128_v26, 3  ;;  %v1966_v4 = vor.u32 %v1965_v7, %v1962_v53  ;;  %v2128_v15 = vrot.slane %v7875_v44, 3  ;;  %6501 = vmatmul.mubr.msk.bf16.gmra.mrb[8].mxu0 %vm2858_vm10, %v2815_v6  ;;  %v6129_v50 = vcombine.low %v706_v54, %v7828_v24 }
 0x101   : > { %v2131_v14 = vrot.slane %v7882_v22, 3  ;;  %vm9560_vm11 = vsmask.f32 5376  ;;  %v1974_v38 = vor.u32 %v1973_v5, %v1970_v18  ;;  %v6144_v30 = vcombine.low %v7898_v41, %v7898_v41  ;;  %v609_v22 = vld [vmem:[#allocation2 + $0xa8] sm:$0xf]  ;;  %v1541_v58 = vpop.permute.xlu0 %1540 }
 0x102   : > { %v1958_v32 = vsel %vm9560_vm11, %v1949_v48, %v1957_v62  ;;  %v2425_v47 = vshrl.u32 %v6128_v26, 16  ;;  %vm9561_vm13 = vcmask 31744   ;;  %v2130_v44 = vrot.slane %v6129_v50, 3  ;;  %vm9562_vm8 = vmmov %vm9560_vm11  ;;  %v1061_v37 = vpop.permute.xlu1 %1060  ;;  %v643_v62 = vld [vmem:[#allocation2 + $0xa8] sm:$0xe] }
 0x103   : > { %v2586_v49 = vsel %vm9561_vm13, %v7399_v33, %v1059_v12  ;;  %v2428_v43 = vshll.u32 %v6128_v26, 16  ;;  %2034 = vrot.lane.b32.xlu0 %v1958_v32, %s6839_s10  ;;  %v1975_v1 = vsel %vm9562_vm8, %v1966_v4, %v1974_v38  ;;  %vm9563_vm4 = vcmask 1044480   ;;  %1683 = vrot.lane.b32.xlu1 %v1650_v13, %s6835_s27  ;;  %v644_v4 = vld [vmem:[#allocation2 + $0xb4] sm:$0xe] }
 0x104   : > { %v2129_v27 = vsel %vm9563_vm4, %v2127_v10, %v2128_v15  ;;  %v2427_v2 = vrot.slane %v2425_v47, 3  ;;  %v2433_v55 = vshrl.u32 %v6144_v30, 16  ;;  %v2619_v11 = vsel %vm2605_vm14, %v2586_v49, %v1188_v59  ;;  %vm9564_vm11 = vmmov %vm9563_vm4  ;;  %v7954_v49 = vld [vmem:[#allocation2 + $0xb0] ss:$0 sps:$4 sm:$0x33]  }
 0x105   : > { %v2430_v0 = vrot.slane %v2428_v43, 4  ;;  %v2436_v35 = vshll.u32 %v6144_v30, 16  ;;  %v6145_v33 = vcombine.low %v7910_v3, %v7910_v3  ;;  %v2132_v28 = vsel %vm9564_vm11, %v2130_v44, %v2131_v14  ;;  %vm9565_vm4 = vmmov %vm9561_vm13  ;;  %v1670_v18 = vpop.permute.xlu0 %1669 }
 0x106   : > { %v2435_v25 = vrot.slane %v2433_v55, 3  ;;  %v2442_v34 = vshrl.u32 %v6129_v50, 16  ;;  %v2445_v60 = vshll.u32 %v6129_v50, 16  ;;  %v2588_v13 = vsel %vm9565_vm4, %v7422_v31, %v1061_v37  ;;  %v1190_v54 = vpop.permute.xlu1 %1189 }
 0x107   : > { %v2431_v21 = vor.u32 %v2430_v0, %v2427_v2  ;;  %v2438_v29 = vrot.slane %v2436_v35, 4  ;;  %v6160_v23 = vcombine.low %v7822_v39, %v7898_v41  ;;  %2163 = vrot.lane.b32.xlu0 %v2129_v27, %s6836_s28  ;;  %v2450_v16 = vshrl.u32 %v6145_v33, 16  ;;  %2036 = vrot.lane.b32.xlu1 %v1975_v1, %s6839_s10  ;;  %v6675_v39 = vld [vmem:[#allocation2 + $0xbc] ss:$0 sps:$4 sm:$0x11]  }
 0x108   : > { %v2444_v46 = vrot.slane %v2442_v34, 3  ;;  %v2447_v8 = vrot.slane %v2445_v60, 4  ;;  %v2453_v48 = vshll.u32 %v6145_v33, 16  ;;  %v2652_v51 = vsel %vm2638_vm15, %v2619_v11, %v1541_v58  ;;  %v7964_v34 = vld [vmem:[#allocation2 + $0xbc] ss:$0 sps:$4 sm:$0x33]  }
 0x109   : > { %v2439_v57 = vor.u32 %v2438_v29, %v2435_v25  ;;  %v7936_v31 = vcombine.low %v609_v22, %v7924_v36  ;;  %v1030_v26 = vshll.u32 %v7921_v61, 16  ;;  %v2452_v53 = vrot.slane %v2450_v16, 3  ;;  %v2023_v43 = vpop.permute.xlu0 %2022 }
 0x10a   : > { %v2448_v45 = vor.u32 %v2447_v8, %v2444_v46  ;;  %v2455_v7 = vrot.slane %v2453_v48, 4  ;;  %v7940_v41 = vcombine.low %v611_v17, %v7930_v63  ;;  %v2621_v5 = vsel %vm2605_vm14, %v2588_v13, %v1190_v54  ;;  %v675_v46 = vld [vmem:[#allocation2 + $0xa8] sm:$0xc] }
 0x10b   : > { %v2440_v6 = vsel %vm9531_vm12, %v2431_v21, %v2439_v57  ;;  %v2685_v10 = vsel %vm2671_vm3, %v2652_v51, %v1670_v18  ;;  %v6161_v59 = vcombine.low %v7828_v24, %v7910_v3  ;;  %v1023_v50 = vshrl.u32 %v7936_v31, 16  ;;  %2165 = vrot.lane.b32.xlu1 %v2132_v28, %s6836_s28  ;;  %v1543_v3 = vpop.permute.xlu1 %1542 }
 0x10c   : > { %2516 = vrot.lane.b32.xlu0 %v2440_v6, %s6840_s11  ;;  %v2456_v15 = vor.u32 %v2455_v7, %v2452_v53  ;;  %v1025_v14 = vshll.u32 %v7936_v31, 16  ;;  %v1032_v32 = vrot.slane %v1030_v26, 1  ;;  %v1035_v12 = vshrl.u32 %v7940_v41, 16 }
 0x10d   : > { %v1037_v38 = vshll.u32 %v7940_v41, 16  ;;  %v1042_v30 = vshll.u32 %v6675_v39, 16  ;;  %v6066_v47 = vcombine.low %v643_v62, %v7924_v36  ;;  %v1170_v1 = vrot.slane %v7921_v61, 1  ;;  %v676_v62 = vld [vmem:[#allocation2 + $0xb4] sm:$0xc] }
 0x10e   : > { %v2457_v24 = vsel %vm9531_vm12, %v2448_v45, %v2456_v15  ;;  %v1027_v44 = vrot.slane %v1025_v14, 1  ;;  %v6067_v27 = vcombine.low %v644_v4, %v7930_v63  ;;  %v2654_v2 = vsel %vm2638_vm15, %v2621_v5, %v1543_v3 }
 0x10f   : > { %v1039_v55 = vrot.slane %v1037_v38, 1  ;;  %v1044_v22 = vrot.slane %v1042_v30, 1  ;;  %v1173_v11 = vrot.slane %v6675_v39, 1  ;;  %v1169_v35 = vrot.slane %v6066_v47, 1  ;;  %2518 = vrot.lane.b32.xlu1 %v2457_v24, %s6840_s11  ;;  %v1672_v13 = vpop.permute.xlu1 %1671 }
 0x110   : > { %2564 = vrot.lane.b32.xlu0 %v6160_v23, %s6833_s25  ;;  %v1028_v0 = vor.u32 %v1027_v44, %v1023_v50  ;;  %v1172_v33 = vrot.slane %v6067_v27, 1  ;;  %v1495_v37 = vshrl.u32 %v6066_v47, 16  ;;  %v1498_v25 = vshll.u32 %v6066_v47, 16  ;;  %v2152_v23 = vpop.permute.xlu0 %2151  ;;  %v7978_v50 = vld [vmem:[#allocation2 + $0xb0] ss:$0 sps:$4 sm:$0x77]  }
 0x111   : > { %v1040_v28 = vor.u32 %v1039_v55, %v1035_v12  ;;  %v1503_v58 = vshrl.u32 %v7954_v49, 16  ;;  %v1506_v61 = vshll.u32 %v7954_v49, 16  ;;  %vm9566_vm13 = vsmask.f32 7424 }
 0x112   : > { %v1033_v60 = vsel %vm9566_vm13, %v1028_v0, %v1032_v32  ;;  %v2718_v21 = vsel %vm2704_vm2, %v2685_v10, %v2023_v43  ;;  %vm9567_vm8 = vcmask 1046528   ;;  %v1497_v17 = vrot.slane %v1495_v37, 1  ;;  %vm9568_vm11 = vmmov %vm9566_vm13 }
 0x113   : > { %v1171_v29 = vsel %vm9567_vm8, %v1169_v35, %v1170_v1  ;;  %v2687_v8 = vsel %vm2671_vm3, %v2654_v2, %v1672_v13  ;;  %v1045_v16 = vsel %vm9568_vm11, %v1040_v28, %v1044_v22  ;;  %vm9569_vm4 = vmmov %vm9567_vm8  ;;  %v1500_v57 = vrot.slane %v1498_v25, 2  ;;  %1074 = vrot.lane.b32.xlu1 %v1033_v60, %s6837_s6  ;;  %v2025_v6 = vpop.permute.xlu1 %2024  ;;  %v7987_v2 = vld [vmem:[#allocation2 + $0xbc] ss:$0 sps:$4 sm:$0x77]  }
 0x114   : > { %v1174_v48 = vsel %vm9569_vm4, %v1172_v33, %v1173_v11  ;;  %2566 = vrot.lane.b32.xlu0 %v6161_v59, %s6833_s25  ;;  %v1505_v51 = vrot.slane %v1503_v58, 1  ;;  %v1508_v26 = vrot.slane %v1506_v61, 2  ;;  %v1512_v39 = vshrl.u32 %v6067_v27, 16  ;;  %v2505_v4 = vpop.permute.xlu0 %2504  ;;  %v707_v58 = vld [vmem:[#allocation2 + $0xa8] sm:$0x8] }
 0x115   : > { %v1515_v54 = vshll.u32 %v6067_v27, 16  ;;  %v1501_v45 = vor.u32 %v1500_v57, %v1497_v17  ;;  %v1520_v53 = vshrl.u32 %v7964_v34, 16  ;;  %v1523_v7 = vshll.u32 %v7964_v34, 16 }
 0x116   : > { %v6098_v18 = vcombine.low %v675_v46, %v7924_v36  ;;  %v2751_v5 = vsel %vm2737_vm1, %v2718_v21, %v2152_v23  ;;  %v1509_v10 = vor.u32 %v1508_v26, %v1505_v51  ;;  %v1514_v59 = vrot.slane %v1512_v39, 1  ;;  %v708_v39 = vld [vmem:[#allocation2 + $0xb4] sm:$0x8] }
 0x117   : > { %v1517_v15 = vrot.slane %v1515_v54, 2  ;;  %v2720_v14 = vsel %vm2704_vm2, %v2687_v8, %v2025_v6  ;;  %v1522_v32 = vrot.slane %v1520_v53, 1  ;;  %v1525_v12 = vrot.slane %v1523_v7, 2  ;;  %1076 = vrot.lane.b32.xlu1 %v1045_v16, %s6837_s6  ;;  %v2154_v55 = vpop.permute.xlu1 %2153  ;;  %v723_v54 = vld [vmem:[#allocation2 + $0xb0] sm:$0xf] }
 0x118   : > { %v1652_v38 = vrot.slane %v7954_v49, 2  ;;  %1203 = vrot.lane.b32.xlu0 %v1171_v29, %s6834_s26  ;;  %v2784_v30 = vsel %vm2770_vm0, %v2751_v5, %v2505_v4  ;;  %v1651_v24 = vrot.slane %v6098_v18, 2  ;;  %v6099_v3 = vcombine.low %v676_v62, %v7930_v63  ;;  %v2553_v22 = vpop.permute.xlu0 %2552 }
 0x119   : > { %v1518_v47 = vor.u32 %v1517_v15, %v1514_v59  ;;  %v1510_v44 = vsel %vm1255_vm9, %v1501_v45, %v1509_v10  ;;  %v1526_v43 = vor.u32 %v1525_v12, %v1522_v32  ;;  %v1977_v1 = vshrl.u32 %v6098_v18, 16 }
 0x11a   : > { %v1980_v27 = vshll.u32 %v6098_v18, 16  ;;  %v1654_v49 = vrot.slane %v6099_v3, 2  ;;  %v1655_v11 = vrot.slane %v7964_v34, 2  ;;  %v1985_v0 = vshrl.u32 %v7978_v50, 16 }
 0x11b   : > { %v1988_v35 = vshll.u32 %v7978_v50, 16  ;;  %v2753_v33 = vsel %vm2737_vm1, %v2720_v14, %v2154_v55  ;;  %v1653_v37 = vsel %vm1608_vm7, %v1651_v24, %v1652_v38  ;;  %v2817_v28 = vsel %vm2803_vm6, %v2784_v30, %v2553_v22  ;;  %1205 = vrot.lane.b32.xlu1 %v1174_v48, %s6834_s26  ;;  %v2507_v46 = vpop.permute.xlu1 %2506 }
 0x11c   : > { %v1979_v25 = vrot.slane %v1977_v1, 2  ;;  %1556 = vrot.lane.b32.xlu0 %v1510_v44, %s6838_s7  ;;  %v1527_v61 = vsel %vm1255_vm9, %v1518_v47, %v1526_v43  ;;  %v1982_v60 = vrot.slane %v1980_v27, 3  ;;  %v1987_v13 = vrot.slane %v1985_v0, 2  ;;  %6504 = vmatprep.mubr.msk.bf16.mxu0 %vm2858_vm10, %v2817_v28  ;;  %v2555_v51 = vpop.permute.xlu0 %2554  ;;  %v724_v47 = vld [vmem:[#allocation2 + $0xbc] sm:$0xf] }
 0x11d   : > { %v1990_v21 = vrot.slane %v1988_v35, 3  ;;  %v1994_v34 = vshrl.u32 %v6099_v3, 16  ;;  %v1997_v29 = vshll.u32 %v6099_v3, 16  ;;  %v2002_v23 = vshrl.u32 %v7987_v2, 16 }
 0x11e   : > { %v2005_v17 = vshll.u32 %v7987_v2, 16  ;;  %v1656_v8 = vsel %vm1608_vm7, %v1654_v49, %v1655_v11  ;;  %v1983_v16 = vor.u32 %v1982_v60, %v1979_v25  ;;  %v6130_v26 = vcombine.low %v707_v58, %v7924_v36 }
 0x11f   : > { %v1991_v57 = vor.u32 %v1990_v21, %v1987_v13  ;;  %v2786_v45 = vsel %vm2770_vm0, %v2753_v33, %v2507_v46  ;;  %v1996_v53 = vrot.slane %v1994_v34, 2  ;;  %v1999_v48 = vrot.slane %v1997_v29, 3  ;;  %1558 = vrot.lane.b32.xlu1 %v1527_v61, %s6838_s7  ;;  %v1063_v15 = vpop.permute.xlu1 %1062 }
 0x120   : > { %v2004_v7 = vrot.slane %v2002_v23, 2  ;;  %1685 = vrot.lane.b32.xlu0 %v1653_v37, %s6835_s27  ;;  %v2819_v18 = vsel %vm2803_vm6, %v2786_v45, %v2555_v51  ;;  %v2007_v62 = vrot.slane %v2005_v17, 3  ;;  %v2133_v6 = vrot.slane %v6130_v26, 3  ;;  %v1192_v12 = vpop.permute.xlu0 %1191 }
 0x121   : > { %v2134_v5 = vrot.slane %v7978_v50, 3  ;;  %vm9570_vm13 = vsmask.f32 5376  ;;  %6505 = vmatmul.mubr.msk.bf16.gmra.mrb[12].mxu0 %vm2858_vm10, %v2819_v18  ;;  %v6131_v4 = vcombine.low %v708_v39, %v7930_v63  ;;  %v6146_v59 = vcombine.low %v723_v54, %v723_v54 }
 0x122   : > { %v1992_v10 = vsel %vm9570_vm13, %v1983_v16, %v1991_v57  ;;  %v2000_v14 = vor.u32 %v1999_v48, %v1996_v53  ;;  %v2008_v32 = vor.u32 %v2007_v62, %v2004_v7  ;;  %v2459_v38 = vshrl.u32 %v6130_v26, 16  ;;  %vm9572_vm11 = vmmov %vm9570_vm13 }
 0x123   : > { %v2462_v30 = vshll.u32 %v6130_v26, 16  ;;  %v2467_v24 = vshrl.u32 %v6146_v59, 16  ;;  %v2470_v3 = vshll.u32 %v6146_v59, 16  ;;  %vm9571_vm8 = vcmask 1044480   ;;  %1687 = vrot.lane.b32.xlu1 %v1656_v8, %s6835_s27  ;;  %v1065_v0 = vpop.permute.xlu1 %1064 }
 0x124   : > { %2038 = vrot.lane.b32.xlu0 %v1992_v10, %s6839_s10  ;;  %v2135_v50 = vsel %vm9571_vm8, %v2133_v6, %v2134_v5  ;;  %v2137_v44 = vrot.slane %v7987_v2, 3  ;;  %v2461_v43 = vrot.slane %v2459_v38, 3  ;;  %v2136_v27 = vrot.slane %v6131_v4, 3  ;;  %v1545_v33 = vpop.permute.xlu0 %1544  ;;  %vm9573_vm4 = vmmov %vm9571_vm8 }
 0x125   : > { %v2464_v1 = vrot.slane %v2462_v30, 4  ;;  %v2469_v55 = vrot.slane %v2467_v24, 3  ;;  %v2472_v22 = vrot.slane %v2470_v3, 4  ;;  %v6147_v49 = vcombine.low %v724_v47, %v724_v47 }
 0x126   : > { %v2009_v11 = vsel %vm9572_vm11, %v2000_v14, %v2008_v32  ;;  %v2476_v37 = vshrl.u32 %v6131_v4, 16  ;;  %v2479_v28 = vshll.u32 %v6131_v4, 16  ;;  %v2138_v34 = vsel %vm9573_vm4, %v2136_v27, %v2137_v44 }
 0x127   : > { %v2465_v35 = vor.u32 %v2464_v1, %v2461_v43  ;;  %v2473_v25 = vor.u32 %v2472_v22, %v2469_v55  ;;  %v2484_v58 = vshrl.u32 %v6147_v49, 16  ;;  %v2487_v60 = vshll.u32 %v6147_v49, 16  ;;  %2040 = vrot.lane.b32.xlu1 %v2009_v11, %s6839_s10  ;;  %v1194_v29 = vpop.permute.xlu1 %1193 }
 0x128   : > { %2167 = vrot.lane.b32.xlu0 %v2135_v50, %s6836_s28  ;;  %v2478_v2 = vrot.slane %v2476_v37, 3  ;;  %v2481_v61 = vrot.slane %v2479_v28, 4  ;;  %v1674_v46 = vpop.permute.xlu0 %1673  ;;  %v6162_v16 = vcombine.low %v7924_v36, %v723_v54  ;;  %v6163_v39 = vcombine.low %v7930_v63, %v724_v47 }
 0x129   : > { %v2474_v13 = vsel %vm9531_vm12, %v2465_v35, %v2473_v25  ;;  %v2486_v21 = vrot.slane %v2484_v58, 3  ;;  %v2489_v17 = vrot.slane %v2487_v60, 4  ;;  %vm9574_vm13 = vcmask 31744  }
 0x12a   : > { %v2482_v23 = vor.u32 %v2481_v61, %v2478_v2  ;;  %v2590_v48 = vsel %vm9574_vm13, %v7499_v42, %v1063_v15  ;;  %vm9575_vm8 = vmmov %vm9574_vm13 }
 0x12b   : > { %v2490_v8 = vor.u32 %v2489_v17, %v2486_v21  ;;  %2169 = vrot.lane.b32.xlu1 %v2138_v34, %s6836_s28  ;;  %v1547_v51 = vpop.permute.xlu1 %1546  ;;  %v2623_v7 = vsel %vm2605_vm14, %v2590_v48, %v1192_v12  ;;  %v2592_v63 = vsel %vm9575_vm8, %v7513_v40, %v1065_v0  ;;  %vm9576_vm11 = vmmov %vm9575_vm8 }
 0x12c   : > { %2520 = vrot.lane.b32.xlu0 %v2474_v13, %s6840_s11  ;;  %v2027_v26 = vpop.permute.xlu0 %2026  ;;  %v2656_v36 = vsel %vm2638_vm15, %v2623_v7, %v1545_v33  ;;  %v2625_v10 = vsel %vm2605_vm14, %v2592_v63, %v1194_v29  ;;  %vm9577_vm4 = vmmov %vm9575_vm8 }
 0x12d   : > { %v2491_v57 = vsel %vm9531_vm12, %v2482_v23, %v2490_v8  ;;  %v2689_v62 = vsel %vm2671_vm3, %v2656_v36, %v1674_v46  ;;  %v2658_v15 = vsel %vm2638_vm15, %v2625_v10, %v1547_v51  ;;  %vm9578_vm13 = vmmov %vm9577_vm4 }
 0x12e   : > { %v2722_v6 = vsel %vm2704_vm2, %v2689_v62, %v2027_v26  ;;  %vm9579_vm8 = vmmov %vm9577_vm4 }
 0x12f   : > { %2522 = vrot.lane.b32.xlu1 %v2491_v57, %s6840_s11  ;;  %v1676_v45 = vpop.permute.xlu1 %1675 }
 0x130   : > { %2568 = vrot.lane.b32.xlu0 %v6162_v16, %s6833_s25  ;;  %v2156_v53 = vpop.permute.xlu0 %2155  ;;  %v2691_v32 = vsel %vm2671_vm3, %v2658_v15, %v1676_v45 }
 0x131   : > { %v2755_v5 = vsel %vm2737_vm1, %v2722_v6, %v2156_v53 }
 0x133   : > { %2570 = vrot.lane.b32.xlu1 %v6163_v39, %s6833_s25  ;;  %v2029_v54 = vpop.permute.xlu1 %2028 }
 0x134   : > { %v2509_v18 = vpop.permute.xlu0 %2508  ;;  %v2724_v12 = vsel %vm2704_vm2, %v2691_v32, %v2029_v54 }
 0x135   : > { %v2788_v4 = vsel %vm2770_vm0, %v2755_v5, %v2509_v18 }
 0x137   : > { %v2158_v42 = vpop.permute.xlu1 %2157 }
 0x138   : > { %v2557_v59 = vpop.permute.xlu0 %2556  ;;  %v2757_v40 = vsel %vm2737_vm1, %v2724_v12, %v2158_v42 }
 0x139   : > { %v2821_v14 = vsel %vm2803_vm6, %v2788_v4, %v2557_v59 }
 0x13a   : > { %6508 = vmatprep.mubr.msk.bf16.mxu0 %vm2858_vm10, %v2821_v14 }
 0x13b   : > { %v2511_v38 = vpop.permute.xlu1 %2510 }
 0x13c   : > { %v2559_v30 = vpop.permute.xlu0 %2558  ;;  %v2790_v47 = vsel %vm2770_vm0, %v2757_v40, %v2511_v38 }
 0x13d   : > { %v2823_v24 = vsel %vm2803_vm6, %v2790_v47, %v2559_v30 }
 0x13e   : > { %6509 = vmatmul.mubr.msk.bf16.gmra.mrb[16].mxu0 %vm2858_vm10, %v2823_v24 }
 0x142   : > { %v1196_v50 = vpop.permute.xlu0 %1195 }
 0x145   : > { %v1067_v3 = vpop.permute.xlu1 %1066 }
 0x146   : > { %v2594_v35 = vsel %vm9576_vm11, %v7727_v20, %v1067_v3  ;;  %vm9580_vm11 = vmmov %vm9577_vm4 }
 0x147   : > { %v2627_v33 = vsel %vm2605_vm14, %v2594_v35, %v1196_v50 }
 0x149   : > { %v1069_v44 = vpop.permute.xlu1 %1068 }
 0x14a   : > { %v2596_v2 = vsel %vm9577_vm4, %v7746_v52, %v1069_v44  ;;  %vm9581_vm4 = vcmask 27650  }
 0x14b   : > { %v1549_v43 = vpop.permute.xlu0 %1548 }
 0x14c   : > { %v2660_v37 = vsel %vm2638_vm15, %v2627_v33, %v1549_v43 }
 0x14d   : > { %v1198_v1 = vpop.permute.xlu1 %1197 }
 0x14e   : > { %v2629_v60 = vsel %vm2605_vm14, %v2596_v2, %v1198_v1 }
 0x14f   : > { %v1678_v27 = vpop.permute.xlu0 %1677 }
 0x150   : > { %v2693_v25 = vsel %vm2671_vm3, %v2660_v37, %v1678_v27 }
 0x151   : > { %v1551_v55 = vpop.permute.xlu1 %1550 }
 0x152   : > { %v2662_v21 = vsel %vm2638_vm15, %v2629_v60, %v1551_v55 }
 0x154   : > { %v2031_v22 = vpop.permute.xlu0 %2030 }
 0x155   : > { %v1680_v49 = vpop.permute.xlu1 %1679  ;;  %v2726_v61 = vsel %vm2704_vm2, %v2693_v25, %v2031_v22 }
 0x156   : > { %v2695_v29 = vsel %vm2671_vm3, %v2662_v21, %v1680_v49 }
 0x158   : > { %v2160_v11 = vpop.permute.xlu0 %2159 }
 0x159   : > { %v2033_v0 = vpop.permute.xlu1 %2032  ;;  %v2759_v13 = vsel %vm2737_vm1, %v2726_v61, %v2160_v11  ;;  %v8091_v11 = vld [vmem:[%s9518_s2] ss:$0 sm:$0xff] }
 0x15a   : > { %v2728_v46 = vsel %vm2704_vm2, %v2695_v29, %v2033_v0 }
 0x15d   : > { %v2513_v28 = vpop.permute.xlu0 %2512  ;;  %v2162_v58 = vpop.permute.xlu1 %2161 }
 0x15e   : > { %v2792_v20 = vsel %vm2770_vm0, %v2759_v13, %v2513_v28  ;;  %v2761_v52 = vsel %vm2737_vm1, %v2728_v46, %v2162_v58 }
 0x161   : > { %v2561_v34 = vpop.permute.xlu0 %2560  ;;  %v2515_v23 = vpop.permute.xlu1 %2514 }
 0x162   : > { %v2825_v17 = vsel %vm2803_vm6, %v2792_v20, %v2561_v34  ;;  %v2794_v8 = vsel %vm2770_vm0, %v2761_v52, %v2515_v23 }
 0x163   : > { %6512 = vmatprep.mubr.msk.bf16.mxu0 %vm2858_vm10, %v2825_v17 }
 0x165   : > { %v2563_v16 = vpop.permute.xlu0 %2562  ;;  %v1071_v57 = vpop.permute.xlu1 %1070 }
 0x166   : > { %v2827_v51 = vsel %vm2803_vm6, %v2794_v8, %v2563_v16  ;;  %v2598_v6 = vsel %vm9578_vm13, %v7831_v56, %v1071_v57  ;;  %vm9582_vm13 = vmmov %vm9581_vm4 }
 0x167   : > { %6513 = vmatmul.mubr.msk.bf16.gmra.mrb[20].mxu0 %vm2858_vm10, %v2827_v51 }
 0x169   : > { %v1200_v26 = vpop.permute.xlu0 %1199  ;;  %v1073_v39 = vpop.permute.xlu1 %1072 }
 0x16a   : > { %v2631_v63 = vsel %vm2605_vm14, %v2598_v6, %v1200_v26  ;;  %v2600_v59 = vsel %vm9579_vm8, %v7844_v9, %v1073_v39  ;;  %vm9583_vm8 = vcmask 27648  }
 0x16d   : > { %v1553_v45 = vpop.permute.xlu0 %1552  ;;  %v1202_v53 = vpop.permute.xlu1 %1201 }
 0x16e   : > { %v2664_v5 = vsel %vm2638_vm15, %v2631_v63, %v1553_v45  ;;  %v2633_v14 = vsel %vm2605_vm14, %v2600_v59, %v1202_v53 }
 0x171   : > { %v1682_v48 = vpop.permute.xlu0 %1681  ;;  %v1555_v7 = vpop.permute.xlu1 %1554 }
 0x172   : > { %v2697_v42 = vsel %vm2671_vm3, %v2664_v5, %v1682_v48  ;;  %v2666_v12 = vsel %vm2638_vm15, %v2633_v14, %v1555_v7 }
 0x175   : > { %v2035_v36 = vpop.permute.xlu0 %2034  ;;  %v1684_v54 = vpop.permute.xlu1 %1683 }
 0x176   : > { %v2730_v15 = vsel %vm2704_vm2, %v2697_v42, %v2035_v36  ;;  %v2699_v38 = vsel %vm2671_vm3, %v2666_v12, %v1684_v54 }
 0x179   : > { %v2164_v18 = vpop.permute.xlu0 %2163  ;;  %v2037_v62 = vpop.permute.xlu1 %2036 }
 0x17a   : > { %v2763_v32 = vsel %vm2737_vm1, %v2730_v15, %v2164_v18  ;;  %v2732_v24 = vsel %vm2704_vm2, %v2699_v38, %v2037_v62 }
 0x17d   : > { %v2166_v4 = vpop.permute.xlu1 %2165 }
 0x17e   : > { %v2517_v10 = vpop.permute.xlu0 %2516  ;;  %v2765_v9 = vsel %vm2737_vm1, %v2732_v24, %v2166_v4 }
 0x17f   : > { %v2796_v56 = vsel %vm2770_vm0, %v2763_v32, %v2517_v10 }
 0x181   : > { %v2519_v30 = vpop.permute.xlu1 %2518 }
 0x182   : > { %v2565_v40 = vpop.permute.xlu0 %2564  ;;  %v2798_v3 = vsel %vm2770_vm0, %v2765_v9, %v2519_v30 }
 0x183   : > { %v2829_v47 = vsel %vm2803_vm6, %v2796_v56, %v2565_v40 }
 0x184   : > { %6516 = vmatprep.mubr.msk.bf16.mxu0 %vm2858_vm10, %v2829_v47 }
 0x185   : > { %v1075_v44 = vpop.permute.xlu1 %1074 }
 0x186   : > { %v2567_v50 = vpop.permute.xlu0 %2566  ;;  %v2602_v57 = vsel %vm9580_vm11, %v7936_v31, %v1075_v44 }
 0x187   : > { %v2831_v43 = vsel %vm2803_vm6, %v2798_v3, %v2567_v50 }
 0x188   : > { %6517 = vmatmul.mubr.msk.bf16.gmra.mrb[24].mxu0 %vm2858_vm10, %v2831_v43 }
 0x189   : > { %v1077_v27 = vpop.permute.xlu1 %1076 }
 0x18a   : > { %v1204_v1 = vpop.permute.xlu0 %1203  ;;  %v2604_v42 = vsel %vm9580_vm11, %v7940_v41, %v1077_v27  ;;  %vm9589_vm11 = vcmask 1044480  }
 0x18b   : > { %v2635_v39 = vsel %vm2605_vm14, %v2602_v57, %v1204_v1 }
 0x18d   : > { %v1206_v22 = vpop.permute.xlu1 %1205 }
 0x18e   : > { %v1557_v55 = vpop.permute.xlu0 %1556  ;;  %v2637_v59 = vsel %vm2605_vm14, %v2604_v42, %v1206_v22 }
 0x18f   : > { %v2668_v48 = vsel %vm2638_vm15, %v2635_v39, %v1557_v55 }
 0x190   : > { %v6494_v35 = vpop.f32.mrb[0].mxu0 }
 0x191   : > { %v1559_v0 = vpop.permute.xlu1 %1558  ;;  %v2938_v33 = vadd.f32 %v6494_v35, %v8091_v11  ;;  %v2929_v37 = vpop.f32.mrb[1].mxu0 }
 0x192   : > { %v1686_v49 = vpop.permute.xlu0 %1685  ;;  %v2930_v25 = vadd.f32 %v8091_v11, %v2929_v37  ;;  %v6495_v58 = vpop.f32.mrb[2].mxu0  ;;  %v2670_v32 = vsel %vm2638_vm15, %v2637_v59, %v1559_v0 }
 0x193   : > { %v3058_v61 = vmax.f32 %v2938_v33, 0.0  ;;  %v2941_v60 = vadd.f32 %v6495_v58, %v8091_v11  ;;  %v2932_v13 = vpop.f32.mrb[3].mxu0  ;;  %v2701_v18 = vsel %vm2671_vm3, %v2668_v48, %v1686_v49 }
 0x194   : > { %v3056_v21 = vmax.f32 %v2930_v25, 0.0  ;;  %v2933_v20 = vadd.f32 %v8091_v11, %v2932_v13 }
 0x195   : > { %v1688_v2 = vpop.permute.xlu1 %1687  ;;  %v6418_v34 = vpack.c.bf16 %v3058_v61, %v3058_v61  ;;  %v3059_v29 = vmax.f32 %v2941_v60, 0.0 }
 0x196   : > { %v2039_v28 = vpop.permute.xlu0 %2038  ;;  %v6416_v17 = vpack.c.bf16 %v3056_v21, %v3056_v21  ;;  %v3057_v46 = vmax.f32 %v2933_v20, 0.0  ;;  %v2703_v41 = vsel %vm2671_vm3, %v2670_v32, %v1688_v2 }
 0x197   : > { %v3189_v8 = vrot.slane %v6418_v34, 6  ;;  %v6419_v16 = vpack.c.bf16 %v3059_v29, %v3059_v29  ;;  %v2734_v63 = vsel %vm2704_vm2, %v2701_v18, %v2039_v28 }
 0x198   : > { %v3184_v51 = vrot.slane %v6416_v17, 6  ;;  %v6417_v26 = vpack.c.bf16 %v3057_v46, %v3057_v46 }
 0x199   : > { %v2041_v52 = vpop.permute.xlu1 %2040  ;;  %v3190_v45 = vrot.slane %v3189_v8, 4  ;;  %3315 = vst.msk [vmem:[#allocation2 + $0xc] sm:$0xc] %vm9581_vm4, %v3189_v8  ;;  %v3191_v53 = vrot.slane %v6419_v16, 6  ;;  %vm9584_vm4 = vcmask 25600  }
 0x19a   : > { %v2168_v23 = vpop.permute.xlu0 %2167  ;;  %v3185_v7 = vrot.slane %v3184_v51, 4  ;;  %3312 = vst.msk [vmem:[#allocation2] sm:$0xc] %vm9582_vm13, %v3184_v51  ;;  %v3186_v54 = vrot.slane %v6417_v26, 6  ;;  %vm9585_vm13 = vmmov %vm9583_vm8  ;;  %v2736_v40 = vsel %vm2704_vm2, %v2703_v41, %v2041_v52 }
 0x19b   : > { %v3192_v31 = vsel %vm6937_vm5, %v3190_v45, %v3191_v53  ;;  %v3193_v6 = vrot.slane %v3191_v53, 4  ;;  %v2767_v4 = vsel %vm2737_vm1, %v2734_v63, %v2168_v23  ;;  %vm9586_vm12 = vmmov %vm9584_vm4 }
 0x19c   : > { %3316 = vst.msk [vmem:[#allocation2 + $0x10] sm:$0xf] %vm9583_vm8, %v3192_v31  ;;  %v3187_v5 = vsel %vm6937_vm5, %v3185_v7, %v3186_v54  ;;  %v3188_v10 = vrot.slane %v3186_v54, 4 }
 0x19d   : > { %v2170_v62 = vpop.permute.xlu1 %2169  ;;  %3317 = vst.msk [vmem:[#allocation2 + $0x14] sm:$0x3] %vm9584_vm4, %v3193_v6  ;;  %vm9590_vm4 = vsmask.f32 7424 }
 0x19e   : > { %v2521_v36 = vpop.permute.xlu0 %2520  ;;  %3313 = vst.msk [vmem:[#allocation2 + $0x4] sm:$0xf] %vm9585_vm13, %v3187_v5  ;;  %v2769_v30 = vsel %vm2737_vm1, %v2736_v40, %v2170_v62  ;;  %vm9591_vm13 = vmmov %vm9589_vm11 }
 0x19f   : > { %v2800_v15 = vsel %vm2770_vm0, %v2767_v4, %v2521_v36  ;;  %3314 = vst.msk [vmem:[#allocation2 + $0x8] sm:$0x3] %vm9586_vm12, %v3188_v10  ;;  %vm9587_vm12 = vcmask 1046528  }
 0x1a0   : > { %v3414_v38 = vld [vmem:[#allocation2 + $0xc] sm:$0xe]  ;;  %vm9588_vm8 = vmmov %vm9587_vm12 }
 0x1a1   : > { %v2523_v12 = vpop.permute.xlu1 %2522  ;;  %v3446_v47 = vld [vmem:[#allocation2 + $0xc] sm:$0xc]  ;;  %v3413_v24 = vld [vmem:[#allocation2] sm:$0xe] }
 0x1a2   : > { %v2569_v14 = vpop.permute.xlu0 %2568  ;;  %v3478_v9 = vld [vmem:[#allocation2 + $0xc] sm:$0x8]  ;;  %v2802_v3 = vsel %vm2770_vm0, %v2769_v30, %v2523_v12  ;;  %v3445_v43 = vld [vmem:[#allocation2] sm:$0xc] }
 0x1a3   : > { %v2833_v56 = vsel %vm2803_vm6, %v2800_v15, %v2569_v14  ;;  %v3368_v44 = vld [vmem:[#allocation2 + $0x10] sm:$0xf]  ;;  %v3367_v1 = vld [vmem:[#allocation2 + $0xc] sm:$0xf]  ;;  %v3477_v2 = vld [vmem:[#allocation2] sm:$0x8] }
 0x1a4   : > { %6520 = vmatprep.mubr.msk.bf16.mxu0 %vm2858_vm10, %v2833_v56  ;;  %v3494_v55 = vld [vmem:[#allocation2 + $0x14] sm:$0xf]  ;;  %v6249_v22 = vcombine.low %v3414_v38, %v3368_v44  ;;  %v8126_v0 = vcombine.low %v3446_v47, %v3368_v44  ;;  %v8128_v35 = vcombine.low %v3478_v9, %v3368_v44  ;;  %v8135_v13 = vcombine.low %v3367_v1, %v3368_v44  ;;  %v3365_v21 = vld [vmem:[#allocation2] sm:$0xf] }
 0x1a5   : > { %v2571_v50 = vpop.permute.xlu1 %2570  ;;  %v3366_v49 = vld [vmem:[#allocation2 + $0x4] sm:$0xf]  ;;  %v6345_v33 = vcombine.low %v3368_v44, %v3494_v55  ;;  %v6688_v37 = vld [vmem:[#allocation2 + $0x14] ss:$0 sps:$4 sm:$0x11]   ;;  %v8141_v17 = vcombine.low %v3494_v55, %v3494_v55 }
 0x1a6   : > { %v2835_v27 = vsel %vm2803_vm6, %v2802_v3, %v2571_v50  ;;  %v3493_v28 = vld [vmem:[#allocation2 + $0x8] sm:$0xf]  ;;  %v8131_v25 = vcombine.low %v3413_v24, %v3366_v49  ;;  %v8133_v58 = vcombine.low %v3445_v43, %v3366_v49  ;;  %v3912_v61 = vrot.slane %v6249_v22, 1  ;;  %v6692_v60 = vld [vmem:[#allocation2 + $0x14] ss:$0 sps:$4 sm:$0x33]  }
 0x1a7   : > { %6521 = vmatmul.mubr.msk.bf16.gmra.mrb[28].mxu0 %vm2858_vm10, %v2835_v27  ;;  %5319 = vrot.lane.b32.xlu0 %v6345_v33, %s6833_s25  ;;  %v3913_v20 = vrot.slane %v6688_v37, 1  ;;  %v4392_v34 = vrot.slane %v8126_v0, 2  ;;  %v4872_v23 = vrot.slane %v8128_v35, 3  ;;  %v8143_v46 = vcombine.low %v3493_v28, %v3493_v28  ;;  %v8145_v8 = vld [vmem:[#allocation2 + $0x8] ss:$0 sps:$4 sm:$0x11]  }
 0x1a8   : > { %v3909_v29 = vrot.slane %v8131_v25, 1  ;;  %v4393_v52 = vrot.slane %v6692_v60, 2  ;;  %v8147_v16 = vcombine.low %v3477_v2, %v3366_v49  ;;  %v6344_v51 = vcombine.low %v3366_v49, %v3493_v28  ;;  %v8150_v26 = vld [vmem:[#allocation2 + $0x14] ss:$0 sps:$4 sm:$0x77]  }
 0x1a9   : > { %v3914_v57 = vsel %vm9587_vm12, %v3912_v61, %v3913_v20  ;;  %v4389_v39 = vrot.slane %v8133_v58, 2  ;;  %v8153_v45 = vcombine.low %v3365_v21, %v3366_v49  ;;  %v3910_v48 = vrot.slane %v8145_v8, 1  ;;  %v8158_v7 = vld [vmem:[#allocation2 + $0x8] ss:$0 sps:$4 sm:$0x33]  }
 0x1aa   : > { %3959 = vrot.lane.b32.xlu1 %v3914_v57, %s6834_s26  ;;  %v4394_v53 = vsel %vm1608_vm7, %v4392_v34, %v4393_v52  ;;  %v3650_v36 = vshrl.u32 %v8135_v13, 16  ;;  %v3652_v54 = vshll.u32 %v8135_v13, 16  ;;  %v4873_v18 = vrot.slane %v8150_v26, 3  ;;  %v8167_v42 = vld [vmem:[#allocation2 + $0x8] ss:$0 sps:$4 sm:$0x77]  }
 0x1ab   : > { %5317 = vrot.lane.b32.xlu0 %v6344_v51, %s6833_s25  ;;  %v3657_v62 = vshll.u32 %v6688_v37, 16  ;;  %v4869_v31 = vrot.slane %v8147_v16, 3  ;;  %v4055_v6 = vshrl.u32 %v6249_v22, 16  ;;  %v3911_v63 = vsel %vm9588_vm8, %v3909_v29, %v3910_v48 }
 0x1ac   : > { %v4390_v5 = vrot.slane %v8158_v7, 2  ;;  %v3654_v10 = vrot.slane %v3652_v54, 1  ;;  %v4058_v4 = vshll.u32 %v6249_v22, 16  ;;  %v4874_v15 = vsel %vm9589_vm11, %v4872_v23, %v4873_v18  ;;  %vm9594_vm11 = vmmov %vm9590_vm4 }
 0x1ad   : > { %v3659_v14 = vrot.slane %v3657_v62, 1  ;;  %v4057_v32 = vrot.slane %v4055_v6, 1  ;;  %v4063_v12 = vshrl.u32 %v6692_v60, 16  ;;  %v4870_v30 = vrot.slane %v8167_v42, 3 }
 0x1ae   : > { %4439 = vrot.lane.b32.xlu1 %v4394_v53, %s6835_s27  ;;  %v4391_v40 = vsel %vm1608_vm7, %v4389_v39, %v4390_v5  ;;  %v3655_v38 = vor.u32 %v3654_v10, %v3650_v36  ;;  %v4060_v9 = vrot.slane %v4058_v4, 2  ;;  %v4066_v50 = vshll.u32 %v6692_v60, 16 }
 0x1af   : > { %v6498_v59 = vpop.f32.mrb[4].mxu0  ;;  %3957 = vrot.lane.b32.xlu0 %v3911_v63, %s6834_s26  ;;  %v4065_v3 = vrot.slane %v4063_v12, 1  ;;  %v4871_v55 = vsel %vm9591_vm13, %v4869_v31, %v4870_v30  ;;  %v3638_v61 = vshrl.u32 %v8153_v45, 16  ;;  %v3640_v60 = vshll.u32 %v8153_v45, 16 }
 0x1b0   : > { %v2954_v56 = vadd.f32 %v6498_v59, %v8091_v11  ;;  %v2945_v41 = vpop.f32.mrb[5].mxu0  ;;  %v3660_v27 = vsel %vm9590_vm4, %v3655_v38, %v3659_v14  ;;  %v4061_v33 = vor.u32 %v4060_v9, %v4057_v32  ;;  %v4068_v37 = vrot.slane %v4066_v50, 2 }
 0x1b1   : > { %v2946_v47 = vadd.f32 %v8091_v11, %v2945_v41  ;;  %v6499_v24 = vpop.f32.mrb[6].mxu0  ;;  %v3645_v29 = vshll.u32 %v8145_v8, 16  ;;  %v3642_v57 = vrot.slane %v3640_v60, 1  ;;  %v4535_v51 = vshrl.u32 %v8126_v0, 16 }
 0x1b2   : > { %v3062_v44 = vmax.f32 %v2954_v56, 0.0  ;;  %v2957_v43 = vadd.f32 %v6499_v24, %v8091_v11  ;;  %v2948_v1 = vpop.f32.mrb[7].mxu0  ;;  %4919 = vrot.lane.b32.xlu1 %v4874_v15, %s6836_s28  ;;  %v4069_v34 = vor.u32 %v4068_v37, %v4065_v3  ;;  %vm9592_vm12 = vcmask 27650  }
 0x1b3   : > { %v3060_v22 = vmax.f32 %v2946_v47, 0.0  ;;  %v2949_v49 = vadd.f32 %v8091_v11, %v2948_v1  ;;  %4437 = vrot.lane.b32.xlu0 %v4391_v40, %s6835_s27  ;;  %v3647_v36 = vrot.slane %v3645_v29, 1  ;;  %v3643_v62 = vor.u32 %v3642_v57, %v3638_v61  ;;  %vm9593_vm8 = vmmov %vm9592_vm12 }
 0x1b4   : > { %v6422_v28 = vpack.c.bf16 %v3062_v44, %v3062_v44  ;;  %v3063_v2 = vmax.f32 %v2957_v43, 0.0  ;;  %v4070_v48 = vsel %vm1255_vm9, %v4061_v33, %v4069_v34  ;;  %v4537_v31 = vrot.slane %v4535_v51, 2 }
 0x1b5   : > { %v6420_v21 = vpack.c.bf16 %v3060_v22, %v3060_v22  ;;  %v3061_v20 = vmax.f32 %v2949_v49, 0.0  ;;  %v4538_v63 = vshll.u32 %v8126_v0, 16  ;;  %v4543_v5 = vshrl.u32 %v8150_v26, 16 }
 0x1b6   : > { %v3199_v23 = vrot.slane %v6422_v28, 6  ;;  %v6423_v52 = vpack.c.bf16 %v3063_v2, %v3063_v2  ;;  %3831 = vrot.lane.b32.xlu1 %v3660_v27, %s6837_s6  ;;  %v3648_v59 = vsel %vm9594_vm11, %v3643_v62, %v3647_v36  ;;  %v4546_v15 = vshll.u32 %v8150_v26, 16 }
 0x1b7   : > { %v3194_v39 = vrot.slane %v6420_v21, 6  ;;  %v6421_v53 = vpack.c.bf16 %v3061_v20, %v3061_v20  ;;  %4917 = vrot.lane.b32.xlu0 %v4871_v55, %s6836_s28  ;;  %vm9595_vm4 = vcmask 27648   ;;  %v4540_v12 = vrot.slane %v4538_v63, 3 }
 0x1b8   : > { %v3200_v54 = vrot.slane %v3199_v23, 4  ;;  %3321 = vst.msk [vmem:[#allocation2 + $0x24] sm:$0xc] %vm9592_vm12, %v3199_v23  ;;  %v3201_v18 = vrot.slane %v6423_v52, 6  ;;  %v4545_v56 = vrot.slane %v4543_v5, 2  ;;  %vm9596_vm13 = vcmask 25600   ;;  %vm9597_vm12 = vmmov %vm9595_vm4 }
 0x1b9   : > { %v3195_v6 = vrot.slane %v3194_v39, 4  ;;  %3318 = vst.msk [vmem:[#allocation2 + $0x18] sm:$0xc] %vm9593_vm8, %v3194_v39  ;;  %v3196_v8 = vrot.slane %v6421_v53, 6  ;;  %v4548_v0 = vrot.slane %v4546_v15, 3  ;;  %v4038_v41 = vshrl.u32 %v8131_v25, 16  ;;  %vm9598_vm8 = vmmov %vm9596_vm13 }
 0x1ba   : > { %v3202_v10 = vsel %vm6937_vm5, %v3200_v54, %v3201_v18  ;;  %v3203_v4 = vrot.slane %v3201_v18, 4  ;;  %4311 = vrot.lane.b32.xlu1 %v4070_v48, %s6838_s7  ;;  %v4041_v40 = vshll.u32 %v8131_v25, 16  ;;  %v4046_v26 = vshrl.u32 %v8158_v7, 16 }
 0x1bb   : > { %3322 = vst.msk [vmem:[#allocation2 + $0x28] sm:$0xf] %vm9595_vm4, %v3202_v10  ;;  %v3197_v14 = vsel %vm6937_vm5, %v3195_v6, %v3196_v8  ;;  %v3198_v32 = vrot.slane %v3196_v8, 4  ;;  %3829 = vrot.lane.b32.xlu0 %v3648_v59, %s6837_s6  ;;  %v4541_v38 = vor.u32 %v4540_v12, %v4537_v31  ;;  %v4049_v30 = vshll.u32 %v8158_v7, 16 }
 0x1bc   : > { %3323 = vst.msk [vmem:[#allocation2 + $0x2c] sm:$0x3] %vm9596_vm13, %v3203_v4  ;;  %v5015_v47 = vshrl.u32 %v8128_v35, 16  ;;  %v5018_v24 = vshll.u32 %v8128_v35, 16  ;;  %v4549_v9 = vor.u32 %v4548_v0, %v4545_v56  ;;  %v4040_v3 = vrot.slane %v4038_v41, 1 }
 0x1bd   : > { %3319 = vst.msk [vmem:[#allocation2 + $0x1c] sm:$0xf] %vm9597_vm12, %v3197_v14  ;;  %v4043_v50 = vrot.slane %v4041_v40, 2  ;;  %v4048_v44 = vrot.slane %v4046_v26, 1  ;;  %v4051_v43 = vrot.slane %v4049_v30, 2  ;;  %v5023_v27 = vshrl.u32 %v8141_v17, 16 }
 0x1be   : > { %3320 = vst.msk [vmem:[#allocation2 + $0x20] sm:$0x3] %vm9598_vm8, %v3198_v32  ;;  %v5017_v1 = vrot.slane %v5015_v47, 3  ;;  %v5020_v25 = vrot.slane %v5018_v24, 4  ;;  %vm9599_vm11 = vsmask.f32 5376 }
 0x1bf   : > { %v4550_v55 = vsel %vm9599_vm11, %v4541_v38, %v4549_v9  ;;  %v4044_v22 = vor.u32 %v4043_v50, %v4040_v3  ;;  %v5026_v49 = vshll.u32 %v8141_v17, 16  ;;  %v4518_v7 = vshrl.u32 %v8133_v58, 16  ;;  %v3416_v52 = vld [vmem:[#allocation2 + $0x24] sm:$0xe]  ;;  %vm9601_vm13 = vmmov %vm9599_vm11 }
 0x1c0   : > { %4791 = vrot.lane.b32.xlu1 %v4550_v55, %s6839_s10  ;;  %v4052_v33 = vor.u32 %v4051_v43, %v4048_v44  ;;  %v5021_v35 = vor.u32 %v5020_v25, %v5017_v1  ;;  %v5025_v37 = vrot.slane %v5023_v27, 3  ;;  %v4521_v28 = vshll.u32 %v8133_v58, 16  ;;  %v3448_v62 = vld [vmem:[#allocation2 + $0x24] sm:$0xc]  ;;  %v3415_v40 = vld [vmem:[#allocation2 + $0x18] sm:$0xe] }
 0x1c1   : > { %v5028_v2 = vrot.slane %v5026_v49, 4  ;;  %v4520_v61 = vrot.slane %v4518_v7, 2  ;;  %v4526_v60 = vshrl.u32 %v8167_v42, 16  ;;  %v4529_v21 = vshll.u32 %v8167_v42, 16  ;;  %v3480_v14 = vld [vmem:[#allocation2 + $0x24] sm:$0x8] }
 0x1c2   : > { %v8219_v20 = vld [vmem:[#allocation2 + $0x28] sm:$0xf]  ;;  %v4053_v34 = vsel %vm1255_vm9, %v4044_v22, %v4052_v33  ;;  %v4523_v17 = vrot.slane %v4521_v28, 3  ;;  %v4998_v29 = vshrl.u32 %v8147_v16, 16  ;;  %v5001_v23 = vshll.u32 %v8147_v16, 16 }
 0x1c3   : > { %4309 = vrot.lane.b32.xlu0 %v4053_v34, %s6838_s7  ;;  %v5029_v57 = vor.u32 %v5028_v2, %v5025_v37  ;;  %v4528_v58 = vrot.slane %v4526_v60, 2  ;;  %v4531_v51 = vrot.slane %v4529_v21, 3  ;;  %v5006_v39 = vshrl.u32 %v8143_v46, 16  ;;  %v6698_v53 = vld [vmem:[#allocation2 + $0x2c] ss:$0 sps:$4 sm:$0x11]  }
 0x1c4   : > { %v4524_v48 = vor.u32 %v4523_v17, %v4520_v61  ;;  %v5000_v42 = vrot.slane %v4998_v29, 3  ;;  %v5003_v36 = vrot.slane %v5001_v23, 4  ;;  %v5009_v54 = vshll.u32 %v8143_v46, 16  ;;  %v8227_v18 = vld [vmem:[#allocation2 + $0x2c] sm:$0xf]  ;;  %v6743_v34 = vld [vmem:[%s9519_s3] sm:$0xff]  }
 0x1c5   : > { %vm9600_vm4 = vsmask.f32 4352  ;;  %v4532_v16 = vor.u32 %v4531_v51, %v4528_v58  ;;  %v5008_v6 = vrot.slane %v5006_v39, 3  ;;  %v8231_v8 = vcombine.low %v3416_v52, %v8219_v20  ;;  %v8233_v63 = vld [vmem:[#allocation2 + $0x2c] ss:$0 sps:$4 sm:$0x33]   ;;  %6524 = vmatprep.subr.bf16.mxu1 %v6743_v34 }
 0x1c6   : > { %v5030_v31 = vsel %vm9600_vm4, %v5021_v35, %v5029_v57  ;;  %v5004_v5 = vor.u32 %v5003_v36, %v5000_v42  ;;  %v5011_v10 = vrot.slane %v5009_v54, 4  ;;  %v3919_v4 = vrot.slane %v6698_v53, 1  ;;  %v8240_v59 = vld [vmem:[#allocation2 + $0x1c] sm:$0xf]  ;;  %v8242_v15 = vld [vmem:[#allocation2 + $0x20] sm:$0xf]  ;;  %vm9603_vm8 = vmmov %vm9600_vm4  ;;  %6525 = vmatpush3.bf16.msra.mxu1 %v6743_v34 }
 0x1c7   : > { %5271 = vrot.lane.b32.xlu1 %v5030_v31, %s6840_s11  ;;  %v8238_v46 = vcombine.low %v8227_v18, %v8227_v18  ;;  %v4533_v32 = vsel %vm9601_vm13, %v4524_v48, %v4532_v16  ;;  %v3918_v12 = vrot.slane %v8231_v8, 1  ;;  %v6347_v56 = vcombine.low %v8219_v20, %v8227_v18  ;;  %v8251_v41 = vld [vmem:[#allocation2 + $0x2c] ss:$0 sps:$4 sm:$0x77]   ;;  %v3371_v26 = vld [vmem:[#allocation2 + $0x24] sm:$0xf] }
 0x1c8   : > { %v8249_v0 = vcombine.low %v3448_v62, %v8219_v20  ;;  %4789 = vrot.lane.b32.xlu0 %v4533_v32, %s6839_s10  ;;  %v5012_v38 = vor.u32 %v5011_v10, %v5008_v6  ;;  %v4399_v30 = vrot.slane %v8233_v63, 2  ;;  %v8257_v47 = vcombine.low %v8242_v15, %v8242_v15  ;;  %v6707_v9 = vld [vmem:[#allocation2 + $0x20] ss:$0 sps:$4 sm:$0x11]   ;;  %v3447_v1 = vld [vmem:[#allocation2 + $0x18] sm:$0xc] }
 0x1c9   : > { %v6346_v24 = vcombine.low %v8240_v59, %v8242_v15  ;;  %vm9602_vm12 = vcmask 1046528   ;;  %v8264_v44 = vcombine.low %v3480_v14, %v8219_v20  ;;  %v4879_v43 = vrot.slane %v8251_v41, 3  ;;  %v8275_v49 = vld [vmem:[#allocation2 + $0x20] ss:$0 sps:$4 sm:$0x33]   ;;  %v6745_v17 = vld [vmem:[%s9519_s3 + $0x8] sm:$0xff]  }
 0x1ca   : > { %v3920_v3 = vsel %vm9602_vm12, %v3918_v12, %v3919_v4  ;;  %v4398_v50 = vrot.slane %v8249_v0, 2  ;;  %v5013_v25 = vsel %vm9603_vm8, %v5004_v5, %v5012_v38  ;;  %v8270_v27 = vcombine.low %v3415_v40, %v8240_v59  ;;  %v3369_v7 = vld [vmem:[#allocation2 + $0x18] sm:$0xf]  ;;  %v8298_v58 = vld [vmem:[#allocation2 + $0x20] ss:$0 sps:$4 sm:$0x77]   ;;  %vm9605_vm4 = vmmov %vm9602_vm12  ;;  %6526 = vmatprep.subr.bf16.mxu1 %v6745_v17 }
 0x1cb   : > { %3963 = vrot.lane.b32.xlu1 %v3920_v3, %s6834_s26  ;;  %v3916_v55 = vrot.slane %v6707_v9, 1  ;;  %v8273_v22 = vcombine.low %v3371_v26, %v8219_v20  ;;  %v4878_v35 = vrot.slane %v8264_v44, 3  ;;  %v3681_v37 = vshll.u32 %v6698_v53, 16  ;;  %v3479_v2 = vld [vmem:[#allocation2 + $0x18] sm:$0x8]  ;;  %6527 = vmatpush3.bf16.msra.mxu1 %v6745_v17 }
 0x1cc   : > { %v4400_v33 = vsel %vm1608_vm7, %v4398_v50, %v4399_v30  ;;  %v8280_v28 = vcombine.low %v3447_v1, %v8240_v59  ;;  %5269 = vrot.lane.b32.xlu0 %v5013_v25, %s6840_s11  ;;  %v3915_v61 = vrot.slane %v8270_v27, 1  ;;  %v4396_v20 = vrot.slane %v8275_v49, 2  ;;  %v6747_v5 = vld [vmem:[%s9519_s3 + $0x10] ss:$0 sps:$4 sm:$0x33]  }
 0x1cd   : > { %v3674_v60 = vshrl.u32 %v8273_v22, 16  ;;  %v3676_v21 = vshll.u32 %v8273_v22, 16  ;;  %vm9604_vm11 = vcmask 1044480   ;;  %v3683_v23 = vrot.slane %v3681_v37, 1 }
 0x1ce   : > { %v4880_v29 = vsel %vm9604_vm11, %v4878_v35, %v4879_v43  ;;  %v4395_v52 = vrot.slane %v8280_v28, 2  ;;  %v8296_v57 = vcombine.low %v3369_v7, %v8240_v59  ;;  %v3917_v51 = vsel %vm9605_vm4, %v3915_v61, %v3916_v55  ;;  %vm9607_vm12 = vmmov %vm9604_vm11 }
 0x1cf   : > { %4443 = vrot.lane.b32.xlu1 %v4400_v33, %s6835_s27  ;;  %v3678_v39 = vrot.slane %v3676_v21, 1  ;;  %v3669_v53 = vshll.u32 %v6707_v9, 16  ;;  %v8303_v48 = vcombine.low %v3479_v2, %v8240_v59  ;;  %v4876_v18 = vrot.slane %v8298_v58, 3 }
 0x1d0   : > { %v8306_v42 = vsel %vm1608_vm7, %v4395_v52, %v4396_v20  ;;  %v3662_v36 = vshrl.u32 %v8296_v57, 16  ;;  %v3664_v54 = vshll.u32 %v8296_v57, 16  ;;  %5323 = vrot.lane.b32.xlu0 %v6347_v56, %s6833_s25  ;;  %v4089_v6 = vshrl.u32 %v8231_v8, 16 }
 0x1d1   : > { %v3679_v62 = vor.u32 %v3678_v39, %v3674_v60  ;;  %v3671_v31 = vrot.slane %v3669_v53, 1  ;;  %v4875_v16 = vrot.slane %v8303_v48, 3  ;;  %v4092_v14 = vshll.u32 %v8231_v8, 16 }
 0x1d2   : > { %v3666_v4 = vrot.slane %v3664_v54, 1  ;;  %v4097_v32 = vshrl.u32 %v8233_v63, 16  ;;  %v4100_v12 = vshll.u32 %v8233_v63, 16  ;;  %vm9606_vm13 = vsmask.f32 7424 }
 0x1d3   : > { %v6502_v10 = vpop.f32.mrb[8].mxu0  ;;  %4923 = vrot.lane.b32.xlu1 %v4880_v29, %s6836_s28  ;;  %v3684_v26 = vsel %vm9606_vm13, %v3679_v62, %v3683_v23  ;;  %v8324_v38 = vsel %vm9607_vm12, %v4875_v16, %v4876_v18  ;;  %v4091_v30 = vrot.slane %v4089_v6, 1  ;;  %v4094_v8 = vrot.slane %v4092_v14, 2  ;;  %vm9609_vm11 = vmmov %vm9606_vm13 }
 0x1d4   : > { %v2970_v56 = vadd.f32 %v6502_v10, %v8091_v11  ;;  %v2961_v40 = vpop.f32.mrb[9].mxu0  ;;  %v3667_v50 = vor.u32 %v3666_v4, %v3662_v36  ;;  %v4099_v43 = vrot.slane %v4097_v32, 1  ;;  %5321 = vrot.lane.b32.xlu0 %v6346_v24, %s6833_s25  ;;  %v4102_v55 = vrot.slane %v4100_v12, 2 }
 0x1d5   : > { %v2962_v9 = vadd.f32 %v8091_v11, %v2961_v40  ;;  %v6503_v3 = vpop.f32.mrb[10].mxu0  ;;  %v4072_v7 = vshrl.u32 %v8270_v27, 16  ;;  %vm9608_vm8 = vcmask 1041408   ;;  %v4095_v2 = vor.u32 %v4094_v8, %v4091_v30 }
 0x1d6   : > { %v3066_v1 = vmax.f32 %v2970_v56, 0.0  ;;  %v2973_v63 = vadd.f32 %v6503_v3, %v8091_v11  ;;  %v2964_v25 = vpop.f32.mrb[11].mxu0  ;;  %6563 = vmatprep.subr.msk.bf16.mxu1 %vm9608_vm8, %v6747_v5  ;;  %v3672_v37 = vsel %vm9609_vm11, %v3667_v50, %v3671_v31  ;;  %v4103_v59 = vor.u32 %v4102_v55, %v4099_v43 }
 0x1d7   : > { %v3064_v33 = vmax.f32 %v2962_v9, 0.0  ;;  %v2965_v35 = vadd.f32 %v8091_v11, %v2964_v25  ;;  %3835 = vrot.lane.b32.xlu1 %v3684_v26, %s6837_s6  ;;  %v4074_v15 = vrot.slane %v4072_v7, 1  ;;  %v4075_v20 = vshll.u32 %v8270_v27, 16 }
 0x1d8   : > { %v6426_v61 = vpack.c.bf16 %v3066_v1, %v3066_v1  ;;  %v3067_v60 = vmax.f32 %v2973_v63, 0.0  ;;  %v4080_v34 = vshrl.u32 %v8275_v49, 16  ;;  %3961 = vrot.lane.b32.xlu0 %v3917_v51, %s6834_s26  ;;  %v4104_v23 = vsel %vm1255_vm9, %v4095_v2, %v4103_v59 }
 0x1d9   : > { %v6424_v24 = vpack.c.bf16 %v3064_v33, %v3064_v33  ;;  %v3065_v21 = vmax.f32 %v2965_v35, 0.0  ;;  %v4083_v52 = vshll.u32 %v8275_v49, 16  ;;  %v4077_v36 = vrot.slane %v4075_v20, 2 }
 0x1da   : > { %v3209_v17 = vrot.slane %v6426_v61, 6  ;;  %v6427_v29 = vpack.c.bf16 %v3067_v60, %v3067_v60  ;;  %v4082_v54 = vrot.slane %v4080_v34, 1  ;;  %vm9610_vm4 = vcmask 27650  }
 0x1db   : > { %v3204_v39 = vrot.slane %v6424_v24, 6  ;;  %v6425_v53 = vpack.c.bf16 %v3065_v21, %v3065_v21  ;;  %3833 = vrot.lane.b32.xlu1 %v3672_v37, %s6837_s6  ;;  %v4085_v27 = vrot.slane %v4083_v52, 2  ;;  %v4569_v31 = vshrl.u32 %v8249_v0, 16  ;;  %vm9611_vm13 = vmmov %vm9610_vm4 }
 0x1dc   : > { %v3210_v18 = vrot.slane %v3209_v17, 4  ;;  %3327 = vst.msk [vmem:[#allocation2 + $0x3c] sm:$0xc] %vm9610_vm4, %v3209_v17  ;;  %v3211_v62 = vrot.slane %v6427_v29, 6  ;;  %v4078_v6 = vor.u32 %v4077_v36, %v4074_v15  ;;  %v4572_v49 = vshll.u32 %v8249_v0, 16  ;;  %4441 = vrot.lane.b32.xlu0 %v8306_v42, %s6835_s27 }
 0x1dd   : > { %v3205_v16 = vrot.slane %v3204_v39, 4  ;;  %3324 = vst.msk [vmem:[#allocation2 + $0x30] sm:$0xc] %vm9611_vm13, %v3204_v39  ;;  %v3206_v51 = vrot.slane %v6425_v53, 6  ;;  %v4086_v4 = vor.u32 %v4085_v27, %v4082_v54  ;;  %v4571_v14 = vrot.slane %v4569_v31, 2 }
 0x1de   : > { %v3212_v5 = vsel %vm6937_vm5, %v3210_v18, %v3211_v62  ;;  %v3213_v10 = vrot.slane %v3211_v62, 4  ;;  %vm9612_vm12 = vcmask 27648   ;;  %v4574_v56 = vrot.slane %v4572_v49, 3 }
 0x1df   : > { %3328 = vst.msk [vmem:[#allocation2 + $0x40] sm:$0xf] %vm9612_vm12, %v3212_v5  ;;  %v3207_v32 = vsel %vm6937_vm5, %v3205_v16, %v3206_v51  ;;  %v3208_v12 = vrot.slane %v3206_v51, 4  ;;  %v4577_v40 = vshrl.u32 %v8251_v41, 16  ;;  %vm9613_vm8 = vcmask 25600   ;;  %vm9614_vm11 = vmmov %vm9612_vm12  ;;  %4315 = vrot.lane.b32.xlu1 %v4104_v23, %s6838_s7 }
 0x1e0   : > { %3329 = vst.msk [vmem:[#allocation2 + $0x44] sm:$0x3] %vm9613_vm8, %v3213_v10  ;;  %v4087_v0 = vsel %vm1255_vm9, %v4078_v6, %v4086_v4  ;;  %v4580_v42 = vshll.u32 %v8251_v41, 16  ;;  %v4552_v26 = vshrl.u32 %v8280_v28, 16  ;;  %v4555_v30 = vshll.u32 %v8280_v28, 16  ;;  %vm9615_vm4 = vmmov %vm9613_vm8  ;;  %4921 = vrot.lane.b32.xlu0 %v8324_v38, %s6836_s28 }
 0x1e1   : > { %3325 = vst.msk [vmem:[#allocation2 + $0x34] sm:$0xf] %vm9614_vm11, %v3207_v32  ;;  %v4575_v9 = vor.u32 %v4574_v56, %v4571_v14  ;;  %v4579_v3 = vrot.slane %v4577_v40, 2  ;;  %v4560_v50 = vshrl.u32 %v8298_v58, 16  ;;  %v4563_v8 = vshll.u32 %v8298_v58, 16 }
 0x1e2   : > { %3326 = vst.msk [vmem:[#allocation2 + $0x38] sm:$0x3] %vm9615_vm4, %v3208_v12  ;;  %v4582_v43 = vrot.slane %v4580_v42, 3  ;;  %v4554_v1 = vrot.slane %v4552_v26, 2  ;;  %v4557_v63 = vrot.slane %v4555_v30, 3  ;;  %v5049_v41 = vshrl.u32 %v8264_v44, 16 }
 0x1e3   : > { %v4562_v25 = vrot.slane %v4560_v50, 2  ;;  %v4565_v55 = vrot.slane %v4563_v8, 3  ;;  %v5052_v28 = vshll.u32 %v8264_v44, 16  ;;  %v5057_v7 = vshrl.u32 %v8238_v46, 16  ;;  %v3418_v59 = vld [vmem:[#allocation2 + $0x3c] sm:$0xe] }
 0x1e4   : > { %v4583_v33 = vor.u32 %v4582_v43, %v4579_v3  ;;  %v4558_v35 = vor.u32 %v4557_v63, %v4554_v1  ;;  %v5051_v37 = vrot.slane %v5049_v41, 3  ;;  %v5060_v2 = vshll.u32 %v8238_v46, 16  ;;  %4313 = vrot.lane.b32.xlu0 %v4087_v0, %s6838_s7  ;;  %v3450_v34 = vld [vmem:[#allocation2 + $0x3c] sm:$0xc] }
 0x1e5   : > { %v4566_v58 = vor.u32 %v4565_v55, %v4562_v25  ;;  %v5054_v61 = vrot.slane %v5052_v28, 4  ;;  %v5059_v60 = vrot.slane %v5057_v7, 3  ;;  %v5032_v38 = vshrl.u32 %v8303_v48, 16  ;;  %v3482_v16 = vld [vmem:[#allocation2 + $0x3c] sm:$0x8] }
 0x1e6   : > { %vm9616_vm13 = vsmask.f32 5376  ;;  %v5062_v24 = vrot.slane %v5060_v2, 4  ;;  %v5035_v44 = vshll.u32 %v8303_v48, 16  ;;  %v5040_v21 = vshrl.u32 %v8257_v47, 16 }
 0x1e7   : > { %v4584_v15 = vsel %vm9616_vm13, %v4575_v9, %v4583_v33  ;;  %v8376_v20 = vld [vmem:[#allocation2 + $0x40] sm:$0xf]  ;;  %v5055_v46 = vor.u32 %v5054_v61, %v5051_v37  ;;  %v5034_v17 = vrot.slane %v5032_v38, 3  ;;  %v5043_v29 = vshll.u32 %v8257_v47, 16  ;;  %v3498_v23 = vld [vmem:[#allocation2 + $0x44] sm:$0xf]  ;;  %vm9617_vm12 = vmmov %vm9616_vm13 }
 0x1e8   : > { %4795 = vrot.lane.b32.xlu1 %v4584_v15, %s6839_s10  ;;  %v5063_v52 = vor.u32 %v5062_v24, %v5059_v60  ;;  %v5037_v39 = vrot.slane %v5035_v44, 4  ;;  %v5042_v53 = vrot.slane %v5040_v21, 3  ;;  %v6710_v36 = vld [vmem:[#allocation2 + $0x44] ss:$0 sps:$4 sm:$0x11]   ;;  %v8381_v54 = vcombine.low %v3418_v59, %v8376_v20 }
 0x1e9   : > { %v4567_v48 = vsel %vm9617_vm12, %v4558_v35, %v4566_v58  ;;  %v5045_v18 = vrot.slane %v5043_v29, 4  ;;  %v8384_v62 = vcombine.low %v3498_v23, %v3498_v23  ;;  %v8386_v27 = vld [vmem:[#allocation2 + $0x44] ss:$0 sps:$4 sm:$0x33]   ;;  %v8389_v31 = vcombine.low %v3450_v34, %v8376_v20  ;;  %v3417_v47 = vld [vmem:[#allocation2 + $0x30] sm:$0xe] }
 0x1ea   : > { %4793 = vrot.lane.b32.xlu0 %v4567_v48, %s6839_s10  ;;  %vm9618_vm8 = vsmask.f32 4352  ;;  %v5038_v6 = vor.u32 %v5037_v39, %v5034_v17  ;;  %v3924_v49 = vrot.slane %v8381_v54, 1  ;;  %v3925_v5 = vrot.slane %v6710_v36, 1  ;;  %v8394_v10 = vld [vmem:[#allocation2 + $0x34] sm:$0xf] }
 0x1eb   : > { %v5064_v51 = vsel %vm9618_vm8, %v5055_v46, %v5063_v52  ;;  %v3497_v4 = vld [vmem:[#allocation2 + $0x38] sm:$0xf]  ;;  %v5046_v14 = vor.u32 %v5045_v18, %v5042_v53  ;;  %v6349_v32 = vcombine.low %v8376_v20, %v3498_v23  ;;  %v4404_v12 = vrot.slane %v8389_v31, 2  ;;  %v8403_v42 = vld [vmem:[#allocation2 + $0x44] ss:$0 sps:$4 sm:$0x77]   ;;  %vm9620_vm4 = vmmov %vm9618_vm8 }
 0x1ec   : > { %5275 = vrot.lane.b32.xlu1 %v5064_v51, %s6840_s11  ;;  %v4405_v56 = vrot.slane %v8386_v27, 2  ;;  %vm9619_vm11 = vcmask 1046528   ;;  %v8401_v0 = vcombine.low %v3497_v4, %v3497_v4  ;;  %v8406_v26 = vcombine.low %v3482_v16, %v8376_v20  ;;  %v6719_v30 = vld [vmem:[#allocation2 + $0x38] ss:$0 sps:$4 sm:$0x11]  }
 0x1ed   : > { %v3926_v40 = vsel %vm9619_vm11, %v3924_v49, %v3925_v5  ;;  %v8409_v9 = vcombine.low %v3417_v47, %v8394_v10  ;;  %v5047_v3 = vsel %vm9620_vm4, %v5038_v6, %v5046_v14  ;;  %v6348_v50 = vcombine.low %v8394_v10, %v3497_v4  ;;  %v3375_v8 = vld [vmem:[#allocation2 + $0x3c] sm:$0xf]  ;;  %v3449_v28 = vld [vmem:[#allocation2 + $0x30] sm:$0xc]  ;;  %vm9622_vm12 = vmmov %vm9619_vm11 }
 0x1ee   : > { %v3705_v43 = vshll.u32 %v6710_v36, 16  ;;  %v4123_v1 = vshrl.u32 %v8381_v54, 16  ;;  %5273 = vrot.lane.b32.xlu0 %v5047_v3, %s6840_s11  ;;  %v4884_v63 = vrot.slane %v8406_v26, 3  ;;  %v4885_v41 = vrot.slane %v8403_v42, 3  ;;  %v3373_v58 = vld [vmem:[#allocation2 + $0x30] sm:$0xf] }
 0x1ef   : > { %v3921_v25 = vrot.slane %v8409_v9, 1  ;;  %v3922_v55 = vrot.slane %v6719_v30, 1  ;;  %v4406_v7 = vsel %vm1608_vm7, %v4404_v12, %v4405_v56  ;;  %v8421_v33 = vcombine.low %v3375_v8, %v8376_v20  ;;  %v8423_v37 = vld [vmem:[#allocation2 + $0x38] ss:$0 sps:$4 sm:$0x33]  }
 0x1f0   : > { %3967 = vrot.lane.b32.xlu1 %v3926_v40, %s6834_s26  ;;  %v3707_v35 = vrot.slane %v3705_v43, 1  ;;  %v8426_v2 = vcombine.low %v3449_v28, %v8394_v10  ;;  %vm9621_vm13 = vcmask 1044480   ;;  %v8431_v38 = vcombine.low %v3373_v58, %v8394_v10  ;;  %v3481_v20 = vld [vmem:[#allocation2 + $0x30] sm:$0x8] }
 0x1f1   : > { %v4886_v61 = vsel %vm9621_vm13, %v4884_v63, %v4885_v41  ;;  %v3923_v60 = vsel %vm9622_vm12, %v3921_v25, %v3922_v55  ;;  %v3693_v59 = vshll.u32 %v6719_v30, 16  ;;  %v3698_v15 = vshrl.u32 %v8421_v33, 16  ;;  %v8440_v29 = vld [vmem:[#allocation2 + $0x38] ss:$0 sps:$4 sm:$0x77]   ;;  %vm9623_vm8 = vmmov %vm9621_vm13 }
 0x1f2   : > { %v3700_v24 = vshll.u32 %v8421_v33, 16  ;;  %v4401_v44 = vrot.slane %v8426_v2, 2  ;;  %v4402_v21 = vrot.slane %v8423_v37, 2  ;;  %5327 = vrot.lane.b32.xlu0 %v6349_v32, %s6833_s25  ;;  %v3686_v34 = vshrl.u32 %v8431_v38, 16 }
 0x1f3   : > { %v3688_v46 = vshll.u32 %v8431_v38, 16  ;;  %v3695_v17 = vrot.slane %v3693_v59, 1  ;;  %v8443_v23 = vcombine.low %v3481_v20, %v8394_v10  ;;  %v8447_v36 = vrot.slane %v4123_v1, 1 }
 0x1f4   : > { %4447 = vrot.lane.b32.xlu1 %v4406_v7, %s6835_s27  ;;  %v6506_v52 = vpop.f32.mrb[12].mxu0  ;;  %v3702_v39 = vrot.slane %v3700_v24, 1  ;;  %v4403_v53 = vsel %vm1608_vm7, %v4401_v44, %v4402_v21  ;;  %v4126_v48 = vshll.u32 %v8381_v54, 16  ;;  %v4882_v6 = vrot.slane %v8440_v29, 3  ;;  %v8459_v54 = vld [vmem:[%s9518_s2] ss:$0 sm:$0xff] }
 0x1f5   : > { %v2986_v18 = vadd.f32 %v6506_v52, %v8091_v11  ;;  %v2977_v16 = vpop.f32.mrb[13].mxu0  ;;  %v3690_v47 = vrot.slane %v3688_v46, 1  ;;  %v4881_v51 = vrot.slane %v8443_v23, 3  ;;  %v4131_v14 = vshrl.u32 %v8386_v27, 16 }
 0x1f6   : > { %v2978_v49 = vadd.f32 %v8091_v11, %v2977_v16  ;;  %v6507_v5 = vpop.f32.mrb[14].mxu0  ;;  %v3703_v10 = vor.u32 %v3702_v39, %v3698_v15  ;;  %v4128_v4 = vrot.slane %v4126_v48, 2  ;;  %5325 = vrot.lane.b32.xlu0 %v6348_v50, %s6833_s25  ;;  %vm9624_vm11 = vsmask.f32 7424 }
 0x1f7   : > { %v3070_v32 = vmax.f32 %v2986_v18, 0.0  ;;  %v2989_v12 = vadd.f32 %v8459_v54, %v6507_v5  ;;  %v2980_v56 = vpop.f32.mrb[15].mxu0  ;;  %v3691_v40 = vor.u32 %v3690_v47, %v3686_v34  ;;  %v4883_v30 = vsel %vm9623_vm8, %v4881_v51, %v4882_v6  ;;  %vm9625_vm4 = vmmov %vm9624_vm11 }
 0x1f8   : > { %v3068_v11 = vmax.f32 %v2978_v49, 0.0  ;;  %4927 = vrot.lane.b32.xlu1 %v4886_v61, %s6836_s28  ;;  %v2981_v3 = vadd.f32 %v8459_v54, %v2980_v56  ;;  %v3708_v8 = vsel %vm9624_vm11, %v3703_v10, %v3707_v35  ;;  %v4129_v50 = vor.u32 %v4128_v4, %v8447_v36 }
 0x1f9   : > { %v6430_v43 = vpack.c.bf16 %v3070_v32, %v3070_v32  ;;  %v3071_v1 = vmax.f32 %v2989_v12, 0.0  ;;  %v3696_v63 = vsel %vm9625_vm4, %v3691_v40, %v3695_v17  ;;  %v4133_v41 = vrot.slane %v4131_v14, 1 }
 0x1fa   : > { %v6428_v25 = vpack.c.bf16 %v3068_v11, %v3068_v11  ;;  %v3069_v55 = vmax.f32 %v2981_v3, 0.0  ;;  %v4134_v28 = vshll.u32 %v8386_v27, 16  ;;  %v4106_v7 = vshrl.u32 %v8409_v9, 16  ;;  %3965 = vrot.lane.b32.xlu0 %v3923_v60, %s6834_s26 }
 0x1fb   : > { %v3219_v58 = vrot.slane %v6430_v43, 6  ;;  %v6431_v59 = vpack.c.bf16 %v3071_v1, %v3071_v1  ;;  %v4109_v61 = vshll.u32 %v8409_v9, 16  ;;  %v4114_v35 = vshrl.u32 %v8423_v37, 16 }
 0x1fc   : > { %v3214_v15 = vrot.slane %v6428_v25, 6  ;;  %v6429_v24 = vpack.c.bf16 %v3069_v55, %v3069_v55  ;;  %3839 = vrot.lane.b32.xlu1 %v3708_v8, %s6837_s6  ;;  %v4136_v44 = vrot.slane %v4134_v28, 2  ;;  %v4108_v21 = vrot.slane %v4106_v7, 1 }
 0x1fd   : > { %v3220_v20 = vrot.slane %v3219_v58, 4  ;;  %vm9626_vm13 = vcmask 27650   ;;  %v3221_v27 = vrot.slane %v6431_v59, 6  ;;  %v4111_v34 = vrot.slane %v4109_v61, 2 }
 0x1fe   : > { %3333 = vst.msk [vmem:[#allocation2 + $0x54] sm:$0xc] %vm9626_vm13, %v3219_v58  ;;  %v4116_v46 = vrot.slane %v4114_v35, 1  ;;  %v3215_v17 = vrot.slane %v3214_v15, 4  ;;  %vm9627_vm12 = vmmov %vm9626_vm13  ;;  %v3216_v60 = vrot.slane %v6429_v24, 6  ;;  %v4137_v52 = vor.u32 %v4136_v44, %v4133_v41  ;;  %4445 = vrot.lane.b32.xlu0 %v4403_v53, %s6835_s27 }
 0x1ff   : > { %3330 = vst.msk [vmem:[#allocation2 + $0x48] sm:$0xc] %vm9627_vm12, %v3214_v15  ;;  %v4117_v9 = vshll.u32 %v8423_v37, 16  ;;  %v3222_v39 = vsel %vm6937_vm5, %v3220_v20, %v3221_v27  ;;  %v3223_v36 = vrot.slane %v3221_v27, 4  ;;  %v4112_v48 = vor.u32 %v4111_v34, %v4108_v21 }
 0x200   : > { %v4603_v18 = vshrl.u32 %v8389_v31, 16  ;;  %vm9628_vm8 = vcmask 27648   ;;  %v3217_v16 = vsel %vm6937_vm5, %v3215_v17, %v3216_v60  ;;  %v3218_v47 = vrot.slane %v3216_v60, 4  ;;  %3837 = vrot.lane.b32.xlu1 %v3696_v63, %s6837_s6 }
 0x201   : > { %3334 = vst.msk [vmem:[#allocation2 + $0x58] sm:$0xf] %vm9628_vm8, %v3222_v39  ;;  %v4138_v51 = vsel %vm1255_vm9, %v4129_v50, %v4137_v52  ;;  %v4119_v37 = vrot.slane %v4117_v9, 2  ;;  %vm9629_vm11 = vcmask 25600   ;;  %vm9630_vm4 = vmmov %vm9628_vm8  ;;  %v4606_v53 = vshll.u32 %v8389_v31, 16 }
 0x202   : > { %3335 = vst.msk [vmem:[#allocation2 + $0x5c] sm:$0x3] %vm9629_vm11, %v3223_v36  ;;  %v4605_v6 = vrot.slane %v4603_v18, 2  ;;  %v4611_v49 = vshrl.u32 %v8403_v42, 16  ;;  %v4614_v5 = vshll.u32 %v8403_v42, 16  ;;  %vm9631_vm13 = vmmov %vm9629_vm11  ;;  %v4586_v4 = vshrl.u32 %v8426_v2, 16  ;;  %4925 = vrot.lane.b32.xlu0 %v4883_v30, %s6836_s28 }
 0x203   : > { %3331 = vst.msk [vmem:[#allocation2 + $0x4c] sm:$0xf] %vm9630_vm4, %v3217_v16  ;;  %v4120_v10 = vor.u32 %v4119_v37, %v4116_v46  ;;  %v4589_v14 = vshll.u32 %v8426_v2, 16  ;;  %v4594_v32 = vshrl.u32 %v8440_v29, 16  ;;  %v4608_v12 = vrot.slane %v4606_v53, 3 }
 0x204   : > { %3332 = vst.msk [vmem:[#allocation2 + $0x50] sm:$0x3] %vm9631_vm13, %v3218_v47  ;;  %v4613_v56 = vrot.slane %v4611_v49, 2  ;;  %v4616_v40 = vrot.slane %v4614_v5, 3  ;;  %v4597_v31 = vshll.u32 %v8440_v29, 16  ;;  %4319 = vrot.lane.b32.xlu1 %v4138_v51, %s6838_s7  ;;  %v4588_v11 = vrot.slane %v4586_v4, 2 }
 0x205   : > { %v4121_v42 = vsel %vm1255_vm9, %v4112_v48, %v4120_v10  ;;  %v4591_v3 = vrot.slane %v4589_v14, 3  ;;  %v4596_v8 = vrot.slane %v4594_v32, 2  ;;  %v4609_v50 = vor.u32 %v4608_v12, %v4605_v6  ;;  %v3420_v59 = vld [vmem:[#allocation2 + $0x54] sm:$0xe] }
 0x206   : > { %v4617_v43 = vor.u32 %v4616_v40, %v4613_v56  ;;  %v4599_v1 = vrot.slane %v4597_v31, 3  ;;  %v5083_v2 = vshrl.u32 %v8406_v26, 16  ;;  %v5086_v30 = vshll.u32 %v8406_v26, 16  ;;  %4317 = vrot.lane.b32.xlu0 %v4121_v42, %s6838_s7  ;;  %v3452_v52 = vld [vmem:[#allocation2 + $0x54] sm:$0xc] }
 0x207   : > { %v4592_v63 = vor.u32 %v4591_v3, %v4588_v11  ;;  %v5091_v41 = vshrl.u32 %v8384_v62, 16  ;;  %v5094_v25 = vshll.u32 %v8384_v62, 16  ;;  %vm9632_vm12 = vsmask.f32 5376  ;;  %v3484_v48 = vld [vmem:[#allocation2 + $0x54] sm:$0x8] }
 0x208   : > { %v4618_v29 = vsel %vm9632_vm12, %v4609_v50, %v4617_v43  ;;  %v4600_v55 = vor.u32 %v4599_v1, %v4596_v8  ;;  %v5085_v28 = vrot.slane %v5083_v2, 3  ;;  %v5066_v7 = vshrl.u32 %v8443_v23, 16  ;;  %v8506_v58 = vld [vmem:[#allocation2 + $0x58] sm:$0xf]  ;;  %vm9633_vm8 = vmmov %vm9632_vm12  ;;  %v3419_v18 = vld [vmem:[#allocation2 + $0x48] sm:$0xe] }
 0x209   : > { %4799 = vrot.lane.b32.xlu1 %v4618_v29, %s6839_s10  ;;  %v5088_v61 = vrot.slane %v5086_v30, 4  ;;  %v5093_v35 = vrot.slane %v5091_v41, 3  ;;  %v5096_v26 = vrot.slane %v5094_v25, 4  ;;  %v5069_v15 = vshll.u32 %v8443_v23, 16  ;;  %v3500_v60 = vld [vmem:[#allocation2 + $0x5c] sm:$0xf] }
 0x20a   : > { %v4601_v62 = vsel %vm9633_vm8, %v4592_v63, %v4600_v55  ;;  %v5068_v24 = vrot.slane %v5066_v7, 3  ;;  %v5074_v44 = vshrl.u32 %v8401_v0, 16  ;;  %v5077_v21 = vshll.u32 %v8401_v0, 16  ;;  %v6722_v20 = vld [vmem:[#allocation2 + $0x5c] ss:$0 sps:$4 sm:$0x11]  }
 0x20b   : > { %v5089_v27 = vor.u32 %v5088_v61, %v5085_v28  ;;  %v5097_v34 = vor.u32 %v5096_v26, %v5093_v35  ;;  %v5071_v46 = vrot.slane %v5069_v15, 4  ;;  %v8514_v17 = vcombine.low %v3420_v59, %v8506_v58  ;;  %4797 = vrot.lane.b32.xlu0 %v4601_v62, %s6839_s10  ;;  %v8517_v36 = vld [vmem:[#allocation2 + $0x5c] ss:$0 sps:$4 sm:$0x33]   ;;  %v8523_v37 = vld [vmem:[#allocation2 + $0x4c] sm:$0xf] }
 0x20c   : > { %v5076_v9 = vrot.slane %v5074_v44, 3  ;;  %v5079_v23 = vrot.slane %v5077_v21, 4  ;;  %v3931_v39 = vrot.slane %v6722_v20, 1  ;;  %vm9634_vm11 = vsmask.f32 4352 }
 0x20d   : > { %v5098_v0 = vsel %vm9634_vm11, %v5089_v27, %v5097_v34  ;;  %v5072_v16 = vor.u32 %v5071_v46, %v5068_v24  ;;  %v3930_v47 = vrot.slane %v8514_v17, 1  ;;  %v8521_v51 = vcombine.low %v3500_v60, %v3500_v60  ;;  %v8525_v6 = vld [vmem:[#allocation2 + $0x50] sm:$0xf]  ;;  %v3379_v53 = vld [vmem:[#allocation2 + $0x54] sm:$0xf]  ;;  %vm9636_vm13 = vmmov %vm9634_vm11 }
 0x20e   : > { %5279 = vrot.lane.b32.xlu1 %v5098_v0, %s6840_s11  ;;  %v5080_v49 = vor.u32 %v5079_v23, %v5076_v9  ;;  %v6351_v5 = vcombine.low %v8506_v58, %v3500_v60  ;;  %v8530_v10 = vcombine.low %v3452_v52, %v8506_v58  ;;  %v4411_v4 = vrot.slane %v8517_v36, 2  ;;  %v8533_v14 = vld [vmem:[#allocation2 + $0x5c] ss:$0 sps:$4 sm:$0x77]   ;;  %v3451_v63 = vld [vmem:[#allocation2 + $0x48] sm:$0xc] }
 0x20f   : > { %vm9635_vm4 = vcmask 1046528   ;;  %v8538_v12 = vcombine.low %v8525_v6, %v8525_v6  ;;  %v8541_v56 = vcombine.low %v3484_v48, %v8506_v58  ;;  %v6731_v40 = vld [vmem:[#allocation2 + $0x50] ss:$0 sps:$4 sm:$0x11]   ;;  %v8544_v31 = vcombine.low %v3419_v18, %v8523_v37  ;;  %v3377_v28 = vld [vmem:[#allocation2 + $0x48] sm:$0xf] }
 0x210   : > { %v3932_v32 = vsel %vm9635_vm4, %v3930_v47, %v3931_v39  ;;  %v5081_v42 = vsel %vm9636_vm13, %v5072_v16, %v5080_v49  ;;  %v4410_v11 = vrot.slane %v8530_v10, 2  ;;  %v4891_v3 = vrot.slane %v8533_v14, 3  ;;  %v8560_v29 = vld [vmem:[#allocation2 + $0x50] ss:$0 sps:$4 sm:$0x33]   ;;  %vm9638_vm8 = vmmov %vm9635_vm4 }
 0x211   : > { %v8550_v8 = vcombine.low %v3379_v53, %v8506_v58  ;;  %5277 = vrot.lane.b32.xlu0 %v5081_v42, %s6840_s11  ;;  %v4890_v50 = vrot.slane %v8541_v56, 3  ;;  %v3927_v43 = vrot.slane %v8544_v31, 1  ;;  %v3928_v1 = vrot.slane %v6731_v40, 1  ;;  %v3483_v24 = vld [vmem:[#allocation2 + $0x48] sm:$0x8]  ;;  %v6510_v44 = vpop.f32.mrb[16].mxu0 }
 0x212   : > { %v3729_v2 = vshll.u32 %v6722_v20, 16  ;;  %3971 = vrot.lane.b32.xlu1 %v3932_v32, %s6834_s26  ;;  %v4412_v30 = vsel %vm1608_vm7, %v4410_v11, %v4411_v4  ;;  %v6350_v41 = vcombine.low %v8523_v37, %v8525_v6  ;;  %v8563_v55 = vcombine.low %v3451_v63, %v8523_v37  ;;  %v8576_v34 = vld [vmem:[#allocation2 + $0x50] ss:$0 sps:$4 sm:$0x77]   ;;  %v2993_v52 = vpop.f32.mrb[17].mxu0 }
 0x213   : > { %v3724_v25 = vshll.u32 %v8550_v8, 16  ;;  %vm9637_vm12 = vcmask 1044480   ;;  %v3722_v58 = vshrl.u32 %v8550_v8, 16  ;;  %v8568_v61 = vcombine.low %v3377_v28, %v8523_v37  ;;  %v6511_v18 = vpop.f32.mrb[18].mxu0 }
 0x214   : > { %v4892_v7 = vsel %vm9637_vm12, %v4890_v50, %v4891_v3  ;;  %v3731_v59 = vrot.slane %v3729_v2, 1  ;;  %v4407_v26 = vrot.slane %v8563_v55, 2  ;;  %v4408_v15 = vrot.slane %v8560_v29, 2  ;;  %v2996_v53 = vpop.f32.mrb[19].mxu0  ;;  %vm9640_vm4 = vmmov %vm9637_vm12 }
 0x215   : > { %v3726_v35 = vrot.slane %v3724_v25, 1  ;;  %v3717_v62 = vshll.u32 %v6731_v40, 16  ;;  %5331 = vrot.lane.b32.xlu0 %v6351_v5, %s6833_s25  ;;  %v3929_v21 = vsel %vm9638_vm8, %v3927_v43, %v3928_v1  ;;  %v3710_v20 = vshrl.u32 %v8568_v61, 16 }
 0x216   : > { %v3712_v27 = vshll.u32 %v8568_v61, 16  ;;  %v8579_v46 = vcombine.low %v3483_v24, %v8523_v37  ;;  %4451 = vrot.lane.b32.xlu1 %v4412_v30, %s6835_s27  ;;  %v3002_v60 = vadd.f32 %v8459_v54, %v6510_v44  ;;  %v4409_v23 = vsel %vm1608_vm7, %v4407_v26, %v4408_v15 }
 0x217   : > { %v3727_v9 = vor.u32 %v3726_v35, %v3722_v58  ;;  %v3719_v39 = vrot.slane %v3717_v62, 1  ;;  %v2994_v48 = vadd.f32 %v8459_v54, %v2993_v52  ;;  %v4888_v47 = vrot.slane %v8576_v34, 3 }
 0x218   : > { %v3714_v0 = vrot.slane %v3712_v27, 1  ;;  %v4887_v16 = vrot.slane %v8579_v46, 3  ;;  %v3074_v6 = vmax.f32 %v3002_v60, 0.0  ;;  %v3005_v37 = vadd.f32 %v8459_v54, %v6511_v18 }
 0x219   : > { %vm9639_vm11 = vsmask.f32 7424  ;;  %v4157_v5 = vshrl.u32 %v8514_v17, 16  ;;  %v3072_v4 = vmax.f32 %v2994_v48, 0.0  ;;  %5329 = vrot.lane.b32.xlu0 %v6350_v41, %s6833_s25  ;;  %v2997_v32 = vadd.f32 %v8459_v54, %v2996_v53  ;;  %v8602_v62 = vpop.permute.xlu0 %5319 }
 0x21a   : > { %v3732_v49 = vsel %vm9639_vm11, %v3727_v9, %v3731_v59  ;;  %v3715_v40 = vor.u32 %v3714_v0, %v3710_v20  ;;  %v4889_v42 = vsel %vm9640_vm4, %v4887_v16, %v4888_v47  ;;  %v6434_v11 = vpack.c.bf16 %v3074_v6, %v3074_v6  ;;  %4931 = vrot.lane.b32.xlu1 %v4892_v7, %s6836_s28  ;;  %vm9641_vm13 = vmmov %vm9639_vm11 }
 0x21b   : > { %v3075_v3 = vmax.f32 %v3005_v37, 0.0  ;;  %v4159_v50 = vrot.slane %v4157_v5, 1  ;;  %v4160_v43 = vshll.u32 %v8514_v17, 16  ;;  %v6432_v1 = vpack.c.bf16 %v3072_v4, %v3072_v4 }
 0x21c   : > { %v3073_v2 = vmax.f32 %v2997_v32, 0.0  ;;  %v3720_v63 = vsel %vm9641_vm13, %v3715_v40, %v3719_v39  ;;  %v4165_v30 = vshrl.u32 %v8517_v36, 16  ;;  %v3229_v25 = vrot.slane %v6434_v11, 6  ;;  %v8613_v0 = vpop.permute.xlu1 %3959 }
 0x21d   : > { %v6435_v41 = vpack.c.bf16 %v3075_v3, %v3075_v3  ;;  %v4162_v28 = vrot.slane %v4160_v43, 2  ;;  %v4168_v58 = vshll.u32 %v8517_v36, 16  ;;  %v3224_v59 = vrot.slane %v6432_v1, 6  ;;  %3969 = vrot.lane.b32.xlu0 %v3929_v21, %s6834_s26  ;;  %v8620_v6 = vpop.permute.xlu0 %5317 }
 0x21e   : > { %v6433_v35 = vpack.c.bf16 %v3073_v2, %v3073_v2  ;;  %v4167_v7 = vrot.slane %v4165_v30, 1  ;;  %v4140_v26 = vshrl.u32 %v8544_v31, 16  ;;  %v3230_v15 = vrot.slane %v3229_v25, 4  ;;  %3843 = vrot.lane.b32.xlu1 %v3732_v49, %s6837_s6 }
 0x21f   : > { %vm9642_vm12 = vcmask 27650   ;;  %v3231_v17 = vrot.slane %v6435_v41, 6  ;;  %v4163_v24 = vor.u32 %v4162_v28, %v4159_v50  ;;  %v4170_v44 = vrot.slane %v4168_v58, 2 }
 0x220   : > { %3339 = vst.msk [vmem:[#allocation2 + $0x6c] sm:$0xc] %vm9642_vm12, %v3229_v25  ;;  %v3225_v20 = vrot.slane %v3224_v59, 4  ;;  %vm9643_vm8 = vmmov %vm9642_vm12  ;;  %v3226_v36 = vrot.slane %v6433_v35, 6  ;;  %v4142_v27 = vrot.slane %v4140_v26, 1  ;;  %v4143_v21 = vshll.u32 %v8544_v31, 16  ;;  %v8630_v43 = vpop.permute.xlu1 %4439 }
 0x221   : > { %3336 = vst.msk [vmem:[#allocation2 + $0x60] sm:$0xc] %vm9643_vm8, %v3224_v59  ;;  %v3232_v60 = vsel %vm6937_vm5, %v3230_v15, %v3231_v17  ;;  %v3233_v52 = vrot.slane %v3231_v17, 4  ;;  %v4171_v9 = vor.u32 %v4170_v44, %v4167_v7  ;;  %v4148_v39 = vshrl.u32 %v8560_v29, 16  ;;  %4449 = vrot.lane.b32.xlu0 %v4409_v23, %s6835_s27  ;;  %v8634_v30 = vpop.permute.xlu0 %3957 }
 0x222   : > { %vm9644_vm11 = vcmask 27648   ;;  %v3227_v48 = vsel %vm6937_vm5, %v3225_v20, %v3226_v36  ;;  %v3228_v18 = vrot.slane %v3226_v36, 4  ;;  %v4145_v16 = vrot.slane %v4143_v21, 2  ;;  %3841 = vrot.lane.b32.xlu1 %v3720_v63, %s6837_s6 }
 0x223   : > { %3340 = vst.msk [vmem:[#allocation2 + $0x70] sm:$0xf] %vm9644_vm11, %v3232_v60  ;;  %v4151_v31 = vshll.u32 %v8560_v29, 16  ;;  %vm9645_vm4 = vcmask 25600   ;;  %vm9646_vm13 = vmmov %vm9644_vm11  ;;  %v4172_v47 = vsel %vm1255_vm9, %v4163_v24, %v4171_v9  ;;  %v4150_v37 = vrot.slane %v4148_v39, 1 }
 0x224   : > { %3341 = vst.msk [vmem:[#allocation2 + $0x74] sm:$0x3] %vm9645_vm4, %v3233_v52  ;;  %v4637_v53 = vshrl.u32 %v8530_v10, 16  ;;  %v4640_v23 = vshll.u32 %v8530_v10, 16  ;;  %vm9647_vm12 = vmmov %vm9645_vm4  ;;  %v4146_v49 = vor.u32 %v4145_v16, %v4142_v27  ;;  %v4645_v29 = vshrl.u32 %v8533_v14, 16  ;;  %v8645_v24 = vpop.permute.xlu1 %4919 }
 0x225   : > { %3337 = vst.msk [vmem:[#allocation2 + $0x64] sm:$0xf] %vm9646_vm13, %v3227_v48  ;;  %v4153_v5 = vrot.slane %v4151_v31, 2  ;;  %v4648_v4 = vshll.u32 %v8533_v14, 16  ;;  %v4620_v11 = vshrl.u32 %v8563_v55, 16  ;;  %v4623_v3 = vshll.u32 %v8563_v55, 16  ;;  %4929 = vrot.lane.b32.xlu0 %v4889_v42, %s6836_s28  ;;  %v8650_v60 = vpop.permute.xlu0 %4437 }
 0x226   : > { %3338 = vst.msk [vmem:[#allocation2 + $0x68] sm:$0x3] %vm9647_vm12, %v3228_v18  ;;  %v4639_v32 = vrot.slane %v4637_v53, 2  ;;  %v4642_v40 = vrot.slane %v4640_v23, 3  ;;  %v4647_v10 = vrot.slane %v4645_v29, 2  ;;  %v4628_v2 = vshrl.u32 %v8576_v34, 16  ;;  %4323 = vrot.lane.b32.xlu1 %v4172_v47, %s6838_s7 }
 0x227   : > { %v4154_v50 = vor.u32 %v4153_v5, %v4150_v37  ;;  %v4650_v1 = vrot.slane %v4648_v4, 3  ;;  %v4622_v14 = vrot.slane %v4620_v11, 2  ;;  %v4625_v25 = vrot.slane %v4623_v3, 3  ;;  %v3422_v36 = vld [vmem:[#allocation2 + $0x6c] sm:$0xe] }
 0x228   : > { %v4643_v63 = vor.u32 %v4642_v40, %v4639_v32  ;;  %v4631_v41 = vshll.u32 %v8576_v34, 16  ;;  %v4630_v42 = vrot.slane %v4628_v2, 2  ;;  %v5117_v58 = vshrl.u32 %v8541_v56, 16  ;;  %v3832_v29 = vpop.permute.xlu1 %3831  ;;  %v3454_v32 = vld [vmem:[#allocation2 + $0x6c] sm:$0xc] }
 0x229   : > { %v4155_v55 = vsel %vm1255_vm9, %v4146_v49, %v4154_v50  ;;  %v4651_v28 = vor.u32 %v4650_v1, %v4647_v10  ;;  %v4626_v59 = vor.u32 %v4625_v25, %v4622_v14  ;;  %v5120_v7 = vshll.u32 %v8541_v56, 16  ;;  %v8670_v50 = vpop.permute.xlu0 %4917  ;;  %v3486_v2 = vld [vmem:[#allocation2 + $0x6c] sm:$0x8] }
 0x22a   : > { %v4633_v35 = vrot.slane %v4631_v41, 3  ;;  %v5125_v26 = vshrl.u32 %v8521_v51, 16  ;;  %v8641_v15 = vld [vmem:[#allocation2 + $0x70] sm:$0xf]  ;;  %4321 = vrot.lane.b32.xlu0 %v4155_v55, %s6838_s7  ;;  %vm9648_vm8 = vsmask.f32 5376 }
 0x22b   : > { %v4652_v17 = vsel %vm9648_vm8, %v4643_v63, %v4651_v28  ;;  %v5119_v34 = vrot.slane %v5117_v58, 3  ;;  %v5128_v44 = vshll.u32 %v8521_v51, 16  ;;  %v5100_v20 = vshrl.u32 %v8579_v46, 16  ;;  %v8653_v9 = vld [vmem:[#allocation2 + $0x74] ss:$0 sps:$4 sm:$0x11]   ;;  %vm9649_vm11 = vmmov %vm9648_vm8 }
 0x22c   : > { %4803 = vrot.lane.b32.xlu1 %v4652_v17, %s6839_s10  ;;  %v4634_v27 = vor.u32 %v4633_v35, %v4630_v42  ;;  %v5122_v56 = vrot.slane %v5120_v7, 4  ;;  %v5127_v21 = vrot.slane %v5125_v26, 3  ;;  %v5103_v52 = vshll.u32 %v8579_v46, 16  ;;  %v3502_v16 = vld [vmem:[#allocation2 + $0x74] sm:$0xf] }
 0x22d   : > { %v5130_v39 = vrot.slane %v5128_v44, 4  ;;  %v5102_v48 = vrot.slane %v5100_v20, 3  ;;  %v5108_v18 = vshrl.u32 %v8538_v12, 16  ;;  %v5111_v51 = vshll.u32 %v8538_v12, 16  ;;  %v8665_v12 = vld [vmem:[#allocation2 + $0x64] sm:$0xf] }
 0x22e   : > { %v4635_v31 = vsel %vm9649_vm11, %v4626_v59, %v4634_v27  ;;  %v5123_v47 = vor.u32 %v5122_v56, %v5119_v34  ;;  %v5105_v37 = vrot.slane %v5103_v52, 4  ;;  %v8659_v53 = vcombine.low %v3422_v36, %v8641_v15  ;;  %v8661_v23 = vld [vmem:[#allocation2 + $0x74] ss:$0 sps:$4 sm:$0x33]   ;;  %v8674_v1 = vld [vmem:[#allocation2 + $0x68] sm:$0xf]  ;;  %v3830_v27 = vpop.permute.xlu0 %3829 }
 0x22f   : > { %4801 = vrot.lane.b32.xlu0 %v4635_v31, %s6839_s10  ;;  %v5131_v46 = vor.u32 %v5130_v39, %v5127_v21  ;;  %v5110_v49 = vrot.slane %v5108_v18, 3  ;;  %v5113_v5 = vrot.slane %v5111_v51, 4  ;;  %v3937_v4 = vrot.slane %v8653_v9, 1  ;;  %v8680_v55 = vld [vmem:[#allocation2 + $0x74] ss:$0 sps:$4 sm:$0x77]  }
 0x230   : > { %v5106_v40 = vor.u32 %v5105_v37, %v5102_v48  ;;  %vm9650_vm4 = vcmask 31744   ;;  %v3936_v3 = vrot.slane %v8659_v53, 1  ;;  %v8672_v10 = vcombine.low %v3502_v16, %v3502_v16  ;;  %v3421_v59 = vld [vmem:[#allocation2 + $0x60] sm:$0xe]  ;;  %v3383_v44 = vld [vmem:[#allocation2 + $0x6c] sm:$0xf] }
 0x231   : > { %v5352_v11 = vsel %vm9650_vm4, %v8135_v13, %v3832_v29  ;;  %vm9651_vm13 = vsmask.f32 4352  ;;  %v5114_v14 = vor.u32 %v5113_v5, %v5110_v49  ;;  %v6353_v25 = vcombine.low %v8641_v15, %v3502_v16  ;;  %v6744_v35 = vld [vmem:[#allocation2 + $0x68] ss:$0 sps:$4 sm:$0x11]   ;;  %vm9654_vm11 = vmmov %vm9650_vm4 }
 0x232   : > { %v5132_v63 = vsel %vm9651_vm13, %v5123_v47, %v5131_v46  ;;  %v5384_v41 = vsel %vm2605_vm14, %v5352_v11, %v8613_v0  ;;  %vm9652_vm12 = vcmask 1046528   ;;  %v8685_v28 = vcombine.low %v3454_v32, %v8641_v15  ;;  %vm9653_vm8 = vmmov %vm9651_vm13  ;;  %v4312_v0 = vpop.permute.xlu1 %4311  ;;  %v8705_v52 = vld [vmem:[#allocation2 + $0x68] ss:$0 sps:$4 sm:$0x33]   ;;  %v3381_v5 = vld [vmem:[#allocation2 + $0x60] sm:$0xf] }
 0x233   : > { %5283 = vrot.lane.b32.xlu1 %v5132_v63, %s6840_s11  ;;  %v3938_v13 = vsel %vm9652_vm12, %v3936_v3, %v3937_v4  ;;  %v4417_v42 = vrot.slane %v8661_v23, 2  ;;  %v8690_v58 = vcombine.low %v8674_v1, %v8674_v1  ;;  %v5115_v7 = vsel %vm9653_vm8, %v5106_v40, %v5114_v14  ;;  %vm9656_vm13 = vmmov %vm9652_vm12  ;;  %v8733_v40 = vld [vmem:[#allocation2 + $0x68] ss:$0 sps:$4 sm:$0x77]  }
 0x234   : > { %v6352_v26 = vcombine.low %v8665_v12, %v8674_v1  ;;  %v8696_v17 = vcombine.low %v3486_v2, %v8641_v15  ;;  %v4897_v34 = vrot.slane %v8680_v55, 3  ;;  %5281 = vrot.lane.b32.xlu0 %v5115_v7, %s6840_s11  ;;  %v5416_v20 = vsel %vm2638_vm15, %v5384_v41, %v4312_v0  ;;  %v6790_v41 = vld [vmem:[%s9519_s3 + $0x10] ss:$0 sps:$4 sm:$0x33]  }
 0x235   : > { %v4416_v36 = vrot.slane %v8685_v28, 2  ;;  %v8703_v56 = vcombine.low %v3421_v59, %v8665_v12  ;;  %v3934_v21 = vrot.slane %v6744_v35, 1  ;;  %v5350_v39 = vsel %vm9654_vm11, %v8153_v45, %v3830_v27  ;;  %v3453_v45 = vld [vmem:[#allocation2 + $0x60] sm:$0xc]  ;;  %v4310_v59 = vpop.permute.xlu0 %4309 }
 0x236   : > { %v5448_v48 = vsel %vm2671_vm3, %v5416_v20, %v8630_v43  ;;  %v4896_v18 = vrot.slane %v8696_v17, 3  ;;  %v8713_v51 = vcombine.low %v3383_v44, %v8641_v15  ;;  %v5382_v31 = vsel %vm2605_vm14, %v5350_v39, %v8634_v30  ;;  %v4792_v29 = vpop.permute.xlu1 %4791 }
 0x237   : > { %3975 = vrot.lane.b32.xlu1 %v3938_v13, %s6834_s26  ;;  %v4418_v16 = vsel %vm1608_vm7, %v4416_v36, %v4417_v42  ;;  %v3933_v47 = vrot.slane %v8703_v56, 1  ;;  %v3753_v37 = vshll.u32 %v8653_v9, 16  ;;  %vm9655_vm4 = vcmask 1044480   ;;  %v3485_v42 = vld [vmem:[#allocation2 + $0x60] sm:$0x8] }
 0x238   : > { %v4898_v46 = vsel %vm9655_vm4, %v4896_v18, %v4897_v34  ;;  %v3746_v43 = vshrl.u32 %v8713_v51, 16  ;;  %v3748_v49 = vshll.u32 %v8713_v51, 16  ;;  %v8725_v15 = vcombine.low %v3453_v45, %v8665_v12  ;;  %5335 = vrot.lane.b32.xlu0 %v6353_v25, %s6833_s25  ;;  %vm9659_vm11 = vmmov %vm9655_vm4 }
 0x239   : > { %v3935_v30 = vsel %vm9656_vm13, %v3933_v47, %v3934_v21  ;;  %v3755_v4 = vrot.slane %v3753_v37, 1  ;;  %v4414_v32 = vrot.slane %v8705_v52, 2  ;;  %v8731_v9 = vcombine.low %v3381_v5, %v8665_v12 }
 0x23a   : > { %v5480_v11 = vsel %vm2704_vm2, %v5448_v48, %v4792_v29  ;;  %v3750_v3 = vrot.slane %v3748_v49, 1  ;;  %v4413_v1 = vrot.slane %v8725_v15, 2  ;;  %v3741_v2 = vshll.u32 %v6744_v35, 16 }
 0x23b   : > { %4455 = vrot.lane.b32.xlu1 %v4418_v16, %s6835_s27  ;;  %v5512_v63 = vsel %vm2737_vm1, %v5480_v11, %v8645_v24  ;;  %v3734_v14 = vshrl.u32 %v8731_v9, 16  ;;  %v3736_v25 = vshll.u32 %v8731_v9, 16  ;;  %vm9657_vm12 = vcmask 1041408  }
 0x23c   : > { %v5660_v13 = vsel %vm9657_vm12, %v6790_v41, 0  ;;  %v3751_v7 = vor.u32 %v3750_v3, %v3746_v43  ;;  %v4415_v35 = vsel %vm1608_vm7, %v4413_v1, %v4414_v32  ;;  %v3743_v0 = vrot.slane %v3741_v2, 1  ;;  %5333 = vrot.lane.b32.xlu0 %v6352_v26, %s6833_s25  ;;  %v5272_v26 = vpop.permute.xlu1 %5271 }
 0x23d   : > { %6529 = vmatpush3.bf16.msra.mxu1 %v5660_v13  ;;  %v8748_v34 = vcombine.low %v3485_v42, %v8665_v12  ;;  %v5414_v24 = vsel %vm2638_vm15, %v5382_v31, %v4310_v59  ;;  %v3738_v44 = vrot.slane %v3736_v25, 1  ;;  %v4894_v20 = vrot.slane %v8733_v40, 3  ;;  %v6514_v12 = vpop.f32.mrb[20].mxu0 }
 0x23e   : > { %v4191_v36 = vshrl.u32 %v8659_v53, 16  ;;  %vm9658_vm8 = vsmask.f32 7424  ;;  %v5446_v21 = vsel %vm2671_vm3, %v5414_v24, %v8650_v60  ;;  %v4194_v48 = vshll.u32 %v8659_v53, 16  ;;  %v3009_v45 = vpop.f32.mrb[21].mxu0 }
 0x23f   : > { %v3756_v27 = vsel %vm9658_vm8, %v3751_v7, %v3755_v4  ;;  %v4893_v39 = vrot.slane %v8748_v34, 3  ;;  %4935 = vrot.lane.b32.xlu1 %v4898_v46, %s6836_s28  ;;  %v3739_v18 = vor.u32 %v3738_v44, %v3734_v14  ;;  %v4199_v31 = vshrl.u32 %v8661_v23, 16  ;;  %v6515_v5 = vpop.f32.mrb[22].mxu0  ;;  %v4790_v46 = vpop.permute.xlu0 %4789  ;;  %vm9660_vm4 = vmmov %vm9658_vm8 }
 0x240   : > { %v4193_v16 = vrot.slane %v4191_v36, 1  ;;  %v4202_v47 = vshll.u32 %v8661_v23, 16  ;;  %v3018_v37 = vadd.f32 %v8459_v54, %v6514_v12  ;;  %v5544_v43 = vsel %vm2770_vm0, %v5512_v63, %v5272_v26  ;;  %3973 = vrot.lane.b32.xlu0 %v3935_v30, %s6834_s26  ;;  %v3012_v3 = vpop.f32.mrb[23].mxu0  ;;  %v8774_v25 = vpop.permute.xlu1 %3963 }
 0x241   : > { %v4895_v60 = vsel %vm9659_vm11, %v4893_v39, %v4894_v20  ;;  %v4196_v49 = vrot.slane %v4194_v48, 2  ;;  %v3010_v53 = vadd.f32 %v8459_v54, %v3009_v45  ;;  %v3744_v29 = vsel %vm9660_vm4, %v3739_v18, %v3743_v0 }
 0x242   : > { %v4201_v4 = vrot.slane %v4199_v31, 1  ;;  %v4204_v32 = vrot.slane %v4202_v47, 2  ;;  %v3078_v11 = vmax.f32 %v3018_v37, 0.0  ;;  %v3021_v23 = vadd.f32 %v8459_v54, %v6515_v5 }
 0x243   : > { %v5478_v1 = vsel %vm2704_vm2, %v5446_v21, %v4790_v46  ;;  %v4197_v2 = vor.u32 %v4196_v49, %v4193_v16  ;;  %v3076_v63 = vmax.f32 %v3010_v53, 0.0  ;;  %v3013_v14 = vadd.f32 %v8459_v54, %v3012_v3  ;;  %3847 = vrot.lane.b32.xlu1 %v3756_v27, %s6837_s6  ;;  %v5270_v54 = vpop.permute.xlu0 %5269 }
 0x244   : > { %v5510_v30 = vsel %vm2737_vm1, %v5478_v1, %v8670_v50  ;;  %v4205_v41 = vor.u32 %v4204_v32, %v4201_v4  ;;  %v6438_v13 = vpack.c.bf16 %v3078_v11, %v3078_v11  ;;  %v3079_v42 = vmax.f32 %v3021_v23, 0.0  ;;  %4453 = vrot.lane.b32.xlu0 %v4415_v35, %s6835_s27  ;;  %v8786_v12 = vpop.permute.xlu1 %4443 }
 0x245   : > { %v5576_v59 = vsel %vm2803_vm6, %v5544_v43, %v8602_v62  ;;  %v4174_v7 = vshrl.u32 %v8703_v56, 16  ;;  %v6436_v0 = vpack.c.bf16 %v3076_v63, %v3076_v63  ;;  %v3077_v24 = vmax.f32 %v3013_v14, 0.0 }
 0x246   : > { %v4206_v44 = vsel %vm1255_vm9, %v4197_v2, %v4205_v41  ;;  %v4177_v20 = vshll.u32 %v8703_v56, 16  ;;  %v3239_v50 = vrot.slane %v6438_v13, 6  ;;  %v6439_v36 = vpack.c.bf16 %v3079_v42, %v3079_v42 }
 0x247   : > { %v5542_v27 = vsel %vm2770_vm0, %v5510_v30, %v5270_v54  ;;  %v4176_v21 = vrot.slane %v4174_v7, 1  ;;  %v3234_v39 = vrot.slane %v6436_v0, 6  ;;  %v6437_v48 = vpack.c.bf16 %v3077_v24, %v3077_v24  ;;  %3845 = vrot.lane.b32.xlu1 %v3744_v29, %s6837_s6 }
 0x248   : > { %v5574_v62 = vsel %vm2803_vm6, %v5542_v27, %v8620_v6  ;;  %v4179_v35 = vrot.slane %v4177_v20, 2  ;;  %v3240_v26 = vrot.slane %v3239_v50, 4  ;;  %vm9661_vm13 = vcmask 27650   ;;  %4933 = vrot.lane.b32.xlu0 %v4895_v60, %s6836_s28  ;;  %v8795_v6 = vpop.permute.xlu0 %5323  ;;  %v8805_v4 = vpop.permute.xlu1 %4923 }
 0x249   : > { %3345 = vst.msk [vmem:[#allocation2 + $0x84] sm:$0xc] %vm9661_vm13, %v3239_v50  ;;  %v3241_v18 = vrot.slane %v6439_v36, 6  ;;  %6530 = vmatprep.mubr.msk.bf16.mxu1 %vm2858_vm10, %v5574_v62  ;;  %v4182_v56 = vshrl.u32 %v8705_v52, 16  ;;  %v4185_v16 = vshll.u32 %v8705_v52, 16  ;;  %v3235_v31 = vrot.slane %v3234_v39, 4  ;;  %vm9662_vm12 = vmmov %vm9661_vm13 }
 0x24a   : > { %3342 = vst.msk [vmem:[#allocation2 + $0x78] sm:$0xc] %vm9662_vm12, %v3234_v39  ;;  %v3236_v47 = vrot.slane %v6437_v48, 6  ;;  %6531 = vmatmul.mubr.msk.bf16.vlgmr.msra.gmra.mrb[0].mxu1 %vm2858_vm10, %v5576_v59  ;;  %v4180_v37 = vor.u32 %v4179_v35, %v4176_v21  ;;  %v4671_v45 = vshrl.u32 %v8685_v28, 16  ;;  %vm9663_vm8 = vcmask 27648  }
 0x24b   : > { %v3242_v43 = vsel %vm6937_vm5, %v3240_v26, %v3241_v18  ;;  %v3243_v49 = vrot.slane %v3241_v18, 4  ;;  %v4184_v53 = vrot.slane %v4182_v56, 1  ;;  %v4187_v5 = vrot.slane %v4185_v16, 2  ;;  %4327 = vrot.lane.b32.xlu1 %v4206_v44, %s6838_s7  ;;  %vm9665_vm4 = vmmov %vm9663_vm8 }
 0x24c   : > { %3346 = vst.msk [vmem:[#allocation2 + $0x88] sm:$0xf] %vm9663_vm8, %v3242_v43  ;;  %v3237_v52 = vsel %vm6937_vm5, %v3235_v31, %v3236_v47  ;;  %v3238_v46 = vrot.slane %v3236_v47, 4  ;;  %v4673_v60 = vrot.slane %v4671_v45, 2  ;;  %v4674_v29 = vshll.u32 %v8685_v28, 16  ;;  %v8813_v2 = vpop.permute.xlu0 %5321  ;;  %v3836_v24 = vpop.permute.xlu1 %3835 }
 0x24d   : > { %vm9664_vm11 = vcmask 25600   ;;  %3343 = vst.msk [vmem:[#allocation2 + $0x7c] sm:$0xf] %vm9665_vm4, %v3237_v52  ;;  %v4188_v32 = vor.u32 %v4187_v5, %v4184_v53  ;;  %v4679_v11 = vshrl.u32 %v8680_v55, 16  ;;  %v4682_v23 = vshll.u32 %v8680_v55, 16 }
 0x24e   : > { %3347 = vst.msk [vmem:[#allocation2 + $0x8c] sm:$0x3] %vm9664_vm11, %v3243_v49  ;;  %v4654_v3 = vshrl.u32 %v8725_v15, 16  ;;  %vm9666_vm13 = vmmov %vm9664_vm11  ;;  %v4676_v1 = vrot.slane %v4674_v29, 3  ;;  %v4657_v28 = vshll.u32 %v8725_v15, 16  ;;  %v4662_v63 = vshrl.u32 %v8733_v40, 16 }
 0x24f   : > { %3344 = vst.msk [vmem:[#allocation2 + $0x80] sm:$0x3] %vm9666_vm13, %v3238_v46  ;;  %v4665_v14 = vshll.u32 %v8733_v40, 16  ;;  %v4189_v30 = vsel %vm1255_vm9, %v4180_v37, %v4188_v32  ;;  %v4681_v41 = vrot.slane %v4679_v11, 2  ;;  %v4684_v13 = vrot.slane %v4682_v23, 3 }
 0x250   : > { %v4656_v42 = vrot.slane %v4654_v3, 2  ;;  %4325 = vrot.lane.b32.xlu0 %v4189_v30, %s6838_s7  ;;  %v4677_v55 = vor.u32 %v4676_v1, %v4673_v60  ;;  %v4659_v59 = vrot.slane %v4657_v28, 3  ;;  %v4664_v7 = vrot.slane %v4662_v63, 2  ;;  %v3962_v27 = vpop.permute.xlu0 %3961  ;;  %v3424_v39 = vld [vmem:[#allocation2 + $0x84] sm:$0xe]  ;;  %v3834_v31 = vpop.permute.xlu1 %3833 }
 0x251   : > { %v4667_v0 = vrot.slane %v4665_v14, 3  ;;  %v4685_v54 = vor.u32 %v4684_v13, %v4681_v41  ;;  %v5151_v44 = vshrl.u32 %v8696_v17, 16  ;;  %v5154_v15 = vshll.u32 %v8696_v17, 16  ;;  %v3423_v49 = vld [vmem:[#allocation2 + $0x78] sm:$0xe] }
 0x252   : > { %v5159_v20 = vshrl.u32 %v8672_v10, 16  ;;  %v4660_v40 = vor.u32 %v4659_v59, %v4656_v42  ;;  %v5162_v36 = vshll.u32 %v8672_v10, 16  ;;  %vm9667_vm12 = vcmask 31744   ;;  %v3456_v53 = vld [vmem:[#allocation2 + $0x84] sm:$0xc] }
 0x253   : > { %v4668_v50 = vor.u32 %v4667_v0, %v4664_v7  ;;  %v5356_v21 = vsel %vm9667_vm12, %v8273_v22, %v3836_v24  ;;  %vm9668_vm8 = vsmask.f32 5376  ;;  %v5153_v62 = vrot.slane %v5151_v44, 3  ;;  %v8827_v18 = vld [vmem:[#allocation2 + $0x88] sm:$0xf]  ;;  %vm9670_vm4 = vmmov %vm9667_vm12 }
 0x254   : > { %v4686_v48 = vsel %vm9668_vm8, %v4677_v55, %v4685_v54  ;;  %v5156_v35 = vrot.slane %v5154_v15, 4  ;;  %v5161_v26 = vrot.slane %v5159_v20, 3  ;;  %vm9669_vm11 = vmmov %vm9668_vm8  ;;  %v5164_v56 = vrot.slane %v5162_v36, 4  ;;  %v8839_v60 = vpop.permute.xlu0 %4441  ;;  %v8843_v29 = vld [vmem:[#allocation2 + $0x7c] sm:$0xf]  ;;  %v4316_v41 = vpop.permute.xlu1 %4315 }
 0x255   : > { %4807 = vrot.lane.b32.xlu1 %v4686_v48, %s6839_s10  ;;  %v4669_v17 = vsel %vm9669_vm11, %v4660_v40, %v4668_v50  ;;  %v5134_v16 = vshrl.u32 %v8748_v34, 16  ;;  %v5137_v10 = vshll.u32 %v8748_v34, 16  ;;  %v5142_v47 = vshrl.u32 %v8690_v58, 16  ;;  %v6749_v45 = vld [vmem:[#allocation2 + $0x8c] ss:$0 sps:$4 sm:$0x11]  }
 0x256   : > { %4805 = vrot.lane.b32.xlu0 %v4669_v17, %s6839_s10  ;;  %v5157_v22 = vor.u32 %v5156_v35, %v5153_v62  ;;  %v5145_v37 = vshll.u32 %v8690_v58, 16  ;;  %v8837_v43 = vcombine.low %v3424_v39, %v8827_v18  ;;  %v5165_v5 = vor.u32 %v5164_v56, %v5161_v26  ;;  %v3455_v32 = vld [vmem:[#allocation2 + $0x78] sm:$0xc]  ;;  %v8847_v63 = vld [vmem:[#allocation2 + $0x80] ss:$0 sps:$4 sm:$0x11]  }
 0x257   : > { %v5136_v52 = vrot.slane %v5134_v16, 3  ;;  %v5139_v46 = vrot.slane %v5137_v10, 4  ;;  %v5354_v34 = vsel %vm9670_vm4, %v8296_v57, %v3834_v31  ;;  %v5144_v11 = vrot.slane %v5142_v47, 3  ;;  %v8852_v30 = vld [vmem:[#allocation2 + $0x8c] ss:$0 sps:$4 sm:$0x33]  }
 0x258   : > { %v5147_v23 = vrot.slane %v5145_v37, 4  ;;  %v3942_v58 = vrot.slane %v8837_v43, 1  ;;  %v3943_v3 = vrot.slane %v6749_v45, 1  ;;  %vm9671_vm13 = vsmask.f32 4352  ;;  %v8870_v15 = vpop.permute.xlu0 %4921 }
 0x259   : > { %v5166_v1 = vsel %vm9671_vm13, %v5157_v22, %v5165_v5  ;;  %v5140_v28 = vor.u32 %v5139_v46, %v5136_v52  ;;  %v8850_v14 = vcombine.low %v3423_v49, %v8843_v29  ;;  %v8855_v57 = vcombine.low %v3456_v53, %v8827_v18  ;;  %v8861_v59 = vld [vmem:[#allocation2 + $0x80] ss:$0 sps:$4 sm:$0x33]   ;;  %vm9673_vm8 = vmmov %vm9671_vm13  ;;  %v3488_v36 = vld [vmem:[#allocation2 + $0x84] sm:$0x8] }
 0x25a   : > { %5287 = vrot.lane.b32.xlu1 %v5166_v1, %s6840_s11  ;;  %v5148_v13 = vor.u32 %v5147_v23, %v5144_v11  ;;  %vm9672_vm12 = vcmask 1046528   ;;  %v5388_v55 = vsel %vm2605_vm14, %v5356_v21, %v8774_v25  ;;  %v8864_v7 = vcombine.low %v3455_v32, %v8843_v29  ;;  %v8879_v48 = vld [vmem:[#allocation2 + $0x8c] ss:$0 sps:$4 sm:$0x77]   ;;  %v3487_v26 = vld [vmem:[#allocation2 + $0x78] sm:$0x8] }
 0x25b   : > { %v3944_v42 = vsel %vm9672_vm12, %v3942_v58, %v3943_v3  ;;  %v3939_v0 = vrot.slane %v8850_v14, 1  ;;  %v3940_v24 = vrot.slane %v8847_v63, 1  ;;  %v4422_v54 = vrot.slane %v8855_v57, 2  ;;  %vm9674_vm11 = vmmov %vm9672_vm12  ;;  %v8889_v16 = vld [vmem:[#allocation2 + $0x80] ss:$0 sps:$4 sm:$0x77]  }
 0x25c   : > { %v4423_v44 = vrot.slane %v8852_v30, 2  ;;  %v5149_v20 = vsel %vm9673_vm8, %v5140_v28, %v5148_v13  ;;  %v5420_v40 = vsel %vm2638_vm15, %v5388_v55, %v4316_v41  ;;  %v4419_v25 = vrot.slane %v8864_v7, 2  ;;  %v3387_v31 = vld [vmem:[#allocation2 + $0x84] sm:$0xf]  ;;  %v8912_v3 = vld [vmem:[%s9518_s2] ss:$0 sm:$0xff] }
 0x25d   : > { %v4420_v50 = vrot.slane %v8861_v59, 2  ;;  %5285 = vrot.lane.b32.xlu0 %v5149_v20, %s6840_s11  ;;  %v3941_v21 = vsel %vm9674_vm11, %v3939_v0, %v3940_v24  ;;  %v8882_v62 = vcombine.low %v3488_v36, %v8827_v18  ;;  %v5386_v35 = vsel %vm2605_vm14, %v5354_v34, %v3962_v27  ;;  %v4314_v27 = vpop.permute.xlu0 %4313 }
 0x25e   : > { %v4424_v39 = vsel %vm1608_vm7, %v4422_v54, %v4423_v44  ;;  %3979 = vrot.lane.b32.xlu1 %v3944_v42, %s6834_s26  ;;  %v5452_v56 = vsel %vm2671_vm3, %v5420_v40, %v8786_v12  ;;  %v8892_v10 = vcombine.low %v3487_v26, %v8843_v29  ;;  %v3777_v22 = vshll.u32 %v6749_v45, 16  ;;  %v4796_v12 = vpop.permute.xlu1 %4795  ;;  %v6518_v45 = vpop.f32.mrb[24].mxu0 }
 0x25f   : > { %v4421_v17 = vsel %vm1608_vm7, %v4419_v25, %v4420_v50  ;;  %v4902_v47 = vrot.slane %v8882_v62, 3  ;;  %v4903_v37 = vrot.slane %v8879_v48, 3  ;;  %v8897_v49 = vcombine.low %v3387_v31, %v8827_v18  ;;  %v3025_v28 = vpop.f32.mrb[25].mxu0 }
 0x260   : > { %v4208_v53 = vshrl.u32 %v8850_v14, 16  ;;  %v5418_v5 = vsel %vm2638_vm15, %v5386_v35, %v4314_v27  ;;  %v4899_v52 = vrot.slane %v8892_v10, 3  ;;  %v4900_v46 = vrot.slane %v8889_v16, 3  ;;  %v6519_v0 = vpop.f32.mrb[26].mxu0 }
 0x261   : > { %v3779_v34 = vrot.slane %v3777_v22, 1  ;;  %3977 = vrot.lane.b32.xlu0 %v3941_v21, %s6834_s26  ;;  %vm9675_vm4 = vcmask 1044480   ;;  %v5484_v11 = vsel %vm2704_vm2, %v5452_v56, %v4796_v12  ;;  %v3770_v23 = vshrl.u32 %v8897_v49, 16  ;;  %v4794_v54 = vpop.permute.xlu0 %4793  ;;  %v3028_v50 = vpop.f32.mrb[27].mxu0 }
 0x262   : > { %v4904_v32 = vsel %vm9675_vm4, %v4902_v47, %v4903_v37  ;;  %v3772_v58 = vshll.u32 %v8897_v49, 16  ;;  %4459 = vrot.lane.b32.xlu1 %v4424_v39, %s6835_s27  ;;  %v3034_v1 = vadd.f32 %v8912_v3, %v6518_v45  ;;  %vm9676_vm13 = vmmov %vm9675_vm4  ;;  %v5450_v13 = vsel %vm2671_vm3, %v5418_v5, %v8839_v60  ;;  %v5276_v21 = vpop.permute.xlu1 %5275  ;;  %v3385_v5 = vld [vmem:[#allocation2 + $0x78] sm:$0xf] }
 0x263   : > { %v4901_v41 = vsel %vm9676_vm13, %v4899_v52, %v4900_v46  ;;  %v5516_v42 = vsel %vm2737_vm1, %v5484_v11, %v8805_v4  ;;  %v3026_v55 = vadd.f32 %v8912_v3, %v3025_v28  ;;  %v4210_v44 = vrot.slane %v4208_v53, 1 }
 0x264   : > { %v3774_v24 = vrot.slane %v3772_v58, 1  ;;  %v4211_v20 = vshll.u32 %v8850_v14, 16  ;;  %v3082_v40 = vmax.f32 %v3034_v1, 0.0  ;;  %v3037_v25 = vadd.f32 %v8912_v3, %v6519_v0 }
 0x265   : > { %v5482_v36 = vsel %vm2704_vm2, %v5450_v13, %v4794_v54  ;;  %v4216_v60 = vshrl.u32 %v8861_v59, 16  ;;  %v3080_v39 = vmax.f32 %v3026_v55, 0.0  ;;  %4457 = vrot.lane.b32.xlu0 %v4421_v17, %s6835_s27  ;;  %v3029_v4 = vadd.f32 %v8912_v3, %v3028_v50  ;;  %v5274_v17 = vpop.permute.xlu0 %5273 }
 0x266   : > { %v3775_v35 = vor.u32 %v3774_v24, %v3770_v23  ;;  %v8928_v26 = vsel %vm2770_vm0, %v5516_v42, %v5276_v21  ;;  %v6442_v56 = vpack.c.bf16 %v3082_v40, %v3082_v40  ;;  %4939 = vrot.lane.b32.xlu1 %v4904_v32, %s6836_s28  ;;  %v3083_v14 = vmax.f32 %v3037_v25, 0.0  ;;  %v8936_v11 = vpop.permute.xlu1 %3967 }
 0x267   : > { %v4213_v31 = vrot.slane %v4211_v20, 2  ;;  %v4218_v22 = vrot.slane %v4216_v60, 1  ;;  %v6440_v47 = vpack.c.bf16 %v3080_v39, %v3080_v39  ;;  %v3081_v37 = vmax.f32 %v3029_v4, 0.0 }
 0x268   : > { %vm9677_vm12 = vsmask.f32 7424  ;;  %v4219_v53 = vshll.u32 %v8861_v59, 16  ;;  %v3249_v12 = vrot.slane %v6442_v56, 6  ;;  %v6443_v52 = vpack.c.bf16 %v3083_v14, %v3083_v14 }
 0x269   : > { %v3780_v27 = vsel %vm9677_vm12, %v3775_v35, %v3779_v34  ;;  %v4214_v46 = vor.u32 %v4213_v31, %v4210_v44  ;;  %v8934_v45 = vcombine.low %v3385_v5, %v8843_v29  ;;  %v3244_v32 = vrot.slane %v6440_v47, 6  ;;  %4937 = vrot.lane.b32.xlu0 %v4901_v41, %s6836_s28  ;;  %v8945_v41 = vpop.permute.xlu0 %5327 }
 0x26a   : > { %v6441_v23 = vpack.c.bf16 %v3081_v37, %v3081_v37  ;;  %v4221_v58 = vrot.slane %v4219_v53, 2  ;;  %v3765_v1 = vshll.u32 %v8847_v63, 16  ;;  %v3250_v34 = vrot.slane %v3249_v12, 4  ;;  %3851 = vrot.lane.b32.xlu1 %v3780_v27, %s6837_s6  ;;  %v8951_v40 = vpop.permute.xlu1 %4447 }
 0x26b   : > { %vm9678_vm8 = vcmask 27650   ;;  %v3251_v59 = vrot.slane %v6443_v52, 6  ;;  %v3758_v28 = vshrl.u32 %v8934_v45, 16  ;;  %v3760_v13 = vshll.u32 %v8934_v45, 16 }
 0x26c   : > { %3351 = vst.msk [vmem:[#allocation2 + $0x9c] sm:$0xc] %vm9678_vm8, %v3249_v12  ;;  %v3245_v42 = vrot.slane %v3244_v32, 4  ;;  %vm9679_vm11 = vmmov %vm9678_vm8  ;;  %v3246_v55 = vrot.slane %v6441_v23, 6  ;;  %v4222_v0 = vor.u32 %v4221_v58, %v4218_v22  ;;  %v3767_v24 = vrot.slane %v3765_v1, 1 }
 0x26d   : > { %3348 = vst.msk [vmem:[#allocation2 + $0x90] sm:$0xc] %vm9679_vm11, %v3244_v32  ;;  %v3252_v63 = vsel %vm6937_vm5, %v3250_v34, %v3251_v59  ;;  %v3253_v54 = vrot.slane %v3251_v59, 4  ;;  %v3762_v44 = vrot.slane %v3760_v13, 1  ;;  %v5514_v20 = vsel %vm2737_vm1, %v5482_v36, %v8870_v15  ;;  %v8969_v22 = vpop.permute.xlu0 %5325 }
 0x26e   : > { %vm9680_vm4 = vcmask 27648   ;;  %v3247_v25 = vsel %vm6937_vm5, %v3245_v42, %v3246_v55  ;;  %v3248_v50 = vrot.slane %v3246_v55, 4  ;;  %v4223_v21 = vsel %vm1255_vm9, %v4214_v46, %v4222_v0  ;;  %v8974_v5 = vpop.permute.xlu1 %4927 }
 0x26f   : > { %3352 = vst.msk [vmem:[#allocation2 + $0xa0] sm:$0xf] %vm9680_vm4, %v3252_v63  ;;  %v5546_v60 = vsel %vm2770_vm0, %v5514_v20, %v5274_v17  ;;  %vm9681_vm13 = vcmask 25600   ;;  %vm9682_vm12 = vmmov %vm9680_vm4  ;;  %4329 = vrot.lane.b32.xlu0 %v4223_v21, %s6838_s7  ;;  %v3763_v39 = vor.u32 %v3762_v44, %v3758_v28  ;;  %v4688_v15 = vshrl.u32 %v8864_v7, 16  ;;  %v8994_v63 = vld [vmem:[#allocation2 + $0x8c] sm:$0xf] }
 0x270   : > { %3353 = vst.msk [vmem:[#allocation2 + $0xa4] sm:$0x3] %vm9681_vm13, %v3253_v54  ;;  %v4691_v36 = vshll.u32 %v8864_v7, 16  ;;  %v4696_v4 = vshrl.u32 %v8889_v16, 16  ;;  %vm9683_vm8 = vmmov %vm9681_vm13  ;;  %v4699_v35 = vshll.u32 %v8889_v16, 16  ;;  %v4225_v56 = vshrl.u32 %v8837_v43, 16 }
 0x271   : > { %3349 = vst.msk [vmem:[#allocation2 + $0x94] sm:$0xf] %vm9682_vm12, %v3247_v25  ;;  %v4228_v14 = vshll.u32 %v8837_v43, 16  ;;  %v4233_v31 = vshrl.u32 %v8852_v30, 16  ;;  %vm9684_vm11 = vsmask.f32 7424  ;;  %v5578_v32 = vsel %vm2803_vm6, %v5546_v60, %v8813_v2  ;;  %v8987_v28 = vpop.permute.xlu0 %3965 }
 0x272   : > { %3350 = vst.msk [vmem:[#allocation2 + $0x98] sm:$0x3] %vm9683_vm8, %v3248_v50  ;;  %v3768_v47 = vsel %vm9684_vm11, %v3763_v39, %v3767_v24  ;;  %v4690_v37 = vrot.slane %v4688_v15, 2  ;;  %v4693_v27 = vrot.slane %v4691_v36, 3  ;;  %v4698_v53 = vrot.slane %v4696_v4, 2  ;;  %6534 = vmatprep.mubr.msk.bf16.mxu1 %vm2858_vm10, %v5578_v32 }
 0x273   : > { %v8972_v7 = vld [vmem:[#allocation2 + $0x80] sm:$0xf]  ;;  %3849 = vrot.lane.b32.xlu1 %v3768_v47, %s6837_s6  ;;  %v4701_v16 = vrot.slane %v4699_v35, 3  ;;  %v4227_v17 = vrot.slane %v4225_v56, 1  ;;  %v4230_v12 = vrot.slane %v4228_v14, 2  ;;  %v4235_v52 = vrot.slane %v4233_v31, 1 }
 0x274   : > { %v4694_v43 = vor.u32 %v4693_v27, %v4690_v37  ;;  %v4236_v46 = vshll.u32 %v8852_v30, 16  ;;  %v5580_v23 = vsel %vm2803_vm6, %v8928_v26, %v8795_v6  ;;  %v6338_v34 = vcombine.low %v8972_v7, %v8972_v7  ;;  %v3840_v26 = vpop.permute.xlu1 %3839 }
 0x275   : > { %v4702_v58 = vor.u32 %v4701_v16, %v4698_v53  ;;  %v4231_v1 = vor.u32 %v4230_v12, %v4227_v17  ;;  %v5168_v59 = vshrl.u32 %v8892_v10, 16  ;;  %6535 = vmatmul.mubr.msk.bf16.gmra.mrb[4].mxu1 %vm2858_vm10, %v5580_v23  ;;  %v5171_v2 = vshll.u32 %v8892_v10, 16  ;;  %v8999_v60 = vpop.permute.xlu0 %4445 }
 0x276   : > { %v4238_v13 = vrot.slane %v4236_v46, 2  ;;  %v4705_v30 = vshrl.u32 %v8855_v57, 16  ;;  %v4708_v6 = vshll.u32 %v8855_v57, 16  ;;  %vm9685_vm4 = vsmask.f32 5376 }
 0x277   : > { %v4703_v42 = vsel %vm9685_vm4, %v4694_v43, %v4702_v58  ;;  %v5170_v55 = vrot.slane %v5168_v59, 3  ;;  %v5176_v0 = vshrl.u32 %v6338_v34, 16  ;;  %v5179_v24 = vshll.u32 %v6338_v34, 16  ;;  %v3425_v43 = vld [vmem:[#allocation2 + $0x90] sm:$0xe]  ;;  %vm9689_vm11 = vmmov %vm9685_vm4 }
 0x278   : > { %4809 = vrot.lane.b32.xlu0 %v4703_v42, %s6839_s10  ;;  %v4239_v54 = vor.u32 %v4238_v13, %v4235_v52  ;;  %v5173_v44 = vrot.slane %v5171_v2, 4  ;;  %v4707_v20 = vrot.slane %v4705_v30, 2  ;;  %v4710_v25 = vrot.slane %v4708_v6, 3  ;;  %v3838_v35 = vpop.permute.xlu1 %3837  ;;  %v9004_v56 = vld [vmem:[#allocation2 + $0x94] sm:$0xf] }
 0x279   : > { %v5178_v50 = vrot.slane %v5176_v0, 3  ;;  %v5181_v10 = vrot.slane %v5179_v24, 4  ;;  %v4713_v21 = vshrl.u32 %v8879_v48, 16  ;;  %v4716_v57 = vshll.u32 %v8879_v48, 16  ;;  %v9016_v46 = vpop.permute.xlu0 %4925  ;;  %v3389_v58 = vld [vmem:[#allocation2 + $0x90] sm:$0xf] }
 0x27a   : > { %v4240_v39 = vsel %vm1255_vm9, %v4231_v1, %v4239_v54  ;;  %v5174_v15 = vor.u32 %v5173_v44, %v5170_v55  ;;  %v4711_v36 = vor.u32 %v4710_v25, %v4707_v20  ;;  %v6354_v4 = vcombine.low %v8843_v29, %v8972_v7  ;;  %v6760_v14 = vld [vmem:[#allocation2 + $0x98] ss:$0 sps:$4 sm:$0x11]   ;;  %v9033_v54 = vld [vmem:[#allocation2 + $0xa0] sm:$0xf] }
 0x27b   : > { %4331 = vrot.lane.b32.xlu1 %v4240_v39, %s6838_s7  ;;  %v5182_v31 = vor.u32 %v5181_v10, %v5178_v50  ;;  %v4715_v47 = vrot.slane %v4713_v21, 2  ;;  %v4718_v37 = vrot.slane %v4716_v57, 3  ;;  %v6339_v48 = vcombine.low %v8994_v63, %v8994_v63  ;;  %v9023_v2 = vld [vmem:[#allocation2 + $0x98] ss:$0 sps:$4 sm:$0x33]  }
 0x27c   : > { %v5185_v27 = vshrl.u32 %v8882_v62, 16  ;;  %v5188_v53 = vshll.u32 %v8882_v62, 16  ;;  %vm9686_vm13 = vcmask 31744   ;;  %v6355_v29 = vcombine.low %v8827_v18, %v8994_v63  ;;  %v4320_v1 = vpop.permute.xlu1 %4319 }
 0x27d   : > { %v5360_v16 = vsel %vm9686_vm13, %v8421_v33, %v3840_v26  ;;  %vm9687_vm12 = vsmask.f32 4352  ;;  %v4719_v17 = vor.u32 %v4718_v37, %v4715_v47  ;;  %v5193_v12 = vshrl.u32 %v6339_v48, 16  ;;  %vm9688_vm8 = vmmov %vm9686_vm13  ;;  %v4318_v44 = vpop.permute.xlu0 %4317 }
 0x27e   : > { %v5183_v7 = vsel %vm9687_vm12, %v5174_v15, %v5182_v31  ;;  %v5196_v52 = vshll.u32 %v6339_v48, 16  ;;  %v5187_v32 = vrot.slane %v5185_v27, 3  ;;  %v5190_v23 = vrot.slane %v5188_v53, 4  ;;  %vm9691_vm13 = vmmov %vm9687_vm12 }
 0x27f   : > { %5289 = vrot.lane.b32.xlu0 %v5183_v7, %s6840_s11  ;;  %v5358_v62 = vsel %vm9688_vm8, %v8431_v38, %v3838_v35  ;;  %v6260_v33 = vcombine.low %v3425_v43, %v9004_v56  ;;  %v4720_v18 = vsel %vm9689_vm11, %v4711_v36, %v4719_v17  ;;  %v5195_v34 = vrot.slane %v5193_v12, 3  ;;  %v9029_v38 = vld [vmem:[#allocation2 + $0xa4] ss:$0 sps:$4 sm:$0x11]   ;;  %v3391_v36 = vld [vmem:[#allocation2 + $0x9c] sm:$0xf] }
 0x280   : > { %v5198_v59 = vrot.slane %v5196_v52, 4  ;;  %v3946_v13 = vrot.slane %v6760_v14, 1  ;;  %4811 = vrot.lane.b32.xlu1 %v4720_v18, %s6839_s10  ;;  %v5191_v30 = vor.u32 %v5190_v23, %v5187_v32  ;;  %v9027_v26 = vcombine.low %v3389_v58, %v9004_v56  ;;  %v4800_v21 = vpop.permute.xlu1 %4799 }
 0x281   : > { %v3945_v6 = vrot.slane %v6260_v33, 1  ;;  %v3789_v42 = vshll.u32 %v6760_v14, 16  ;;  %v5392_v0 = vsel %vm2605_vm14, %v5360_v16, %v8936_v11  ;;  %v4242_v24 = vshrl.u32 %v6260_v33, 16  ;;  %v6522_v14 = vpop.f32.mrb[28].mxu0  ;;  %v9051_v7 = vpop.permute.xlu0 %4797 }
 0x282   : > { %v5199_v55 = vor.u32 %v5198_v59, %v5195_v34  ;;  %v4245_v63 = vshll.u32 %v6260_v33, 16  ;;  %vm9690_vm4 = vcmask 1046528   ;;  %v3782_v25 = vshrl.u32 %v9027_v26, 16  ;;  %v3041_v48 = vpop.f32.mrb[29].mxu0 }
 0x283   : > { %5337 = vrot.lane.b32.xlu0 %v6354_v4, %s6833_s25  ;;  %v3947_v20 = vsel %vm9690_vm4, %v3945_v6, %v3946_v13  ;;  %v3784_v50 = vshll.u32 %v9027_v26, 16  ;;  %v3791_v10 = vrot.slane %v3789_v42, 1  ;;  %v5424_v39 = vsel %vm2638_vm15, %v5392_v0, %v4320_v1  ;;  %v6523_v52 = vpop.f32.mrb[30].mxu0 }
 0x284   : > { %v5200_v57 = vsel %vm9691_vm13, %v5191_v30, %v5199_v55  ;;  %v4244_v11 = vrot.slane %v4242_v24, 1  ;;  %v4247_v15 = vrot.slane %v4245_v63, 2  ;;  %v4250_v4 = vshrl.u32 %v9023_v2, 16  ;;  %v3044_v18 = vpop.f32.mrb[31].mxu0  ;;  %v5280_v34 = vpop.permute.xlu1 %5279 }
 0x285   : > { %5291 = vrot.lane.b32.xlu1 %v5200_v57, %s6840_s11  ;;  %v3786_v35 = vrot.slane %v3784_v50, 1  ;;  %v4253_v31 = vshll.u32 %v9023_v2, 16  ;;  %v9045_v47 = vcombine.low %v3391_v36, %v9033_v54  ;;  %v3050_v37 = vadd.f32 %v8912_v3, %v6522_v14 }
 0x286   : > { %v4248_v27 = vor.u32 %v4247_v15, %v4244_v11  ;;  %v3801_v53 = vshll.u32 %v9029_v38, 16  ;;  %v5390_v16 = vsel %vm2605_vm14, %v5358_v62, %v8987_v28  ;;  %v3042_v12 = vadd.f32 %v8912_v3, %v3041_v48  ;;  %v3457_v15 = vld [vmem:[#allocation2 + $0x90] sm:$0xc] }
 0x287   : > { %5339 = vrot.lane.b32.xlu0 %v6355_v29, %s6833_s25  ;;  %v3787_v17 = vor.u32 %v3786_v35, %v3782_v25  ;;  %v4252_v43 = vrot.slane %v4250_v4, 1  ;;  %v4255_v32 = vrot.slane %v4253_v31, 2  ;;  %v3086_v23 = vmax.f32 %v3050_v37, 0.0  ;;  %v9066_v25 = vpop.permute.xlu0 %5277  ;;  %v3426_v31 = vld [vmem:[#allocation2 + $0x9c] sm:$0xe] }
 0x288   : > { %v3053_v33 = vadd.f32 %v8912_v3, %v6523_v52  ;;  %v3794_v58 = vshrl.u32 %v9045_v47, 16  ;;  %v3796_v1 = vshll.u32 %v9045_v47, 16  ;;  %vm9692_vm12 = vsmask.f32 7424  ;;  %v9068_v36 = vpop.permute.xlu1 %3971 }
 0x289   : > { %v3792_v28 = vsel %vm9692_vm12, %v3787_v17, %v3791_v10  ;;  %v3084_v62 = vmax.f32 %v3042_v12, 0.0  ;;  %v4256_v59 = vor.u32 %v4255_v32, %v4252_v43  ;;  %v3803_v29 = vrot.slane %v3801_v53, 1  ;;  %vm9694_vm11 = vmmov %vm9692_vm12  ;;  %v9088_v43 = vld [vmem:[#allocation2 + $0xa4] ss:$0 sps:$4 sm:$0x33]  }
 0x28a   : > { %3853 = vrot.lane.b32.xlu1 %v3792_v28, %s6837_s6  ;;  %v6446_v13 = vpack.c.bf16 %v3086_v23, %v3086_v23  ;;  %v3087_v30 = vmax.f32 %v3053_v33, 0.0  ;;  %v3798_v6 = vrot.slane %v3796_v1, 1  ;;  %v3045_v42 = vadd.f32 %v8912_v3, %v3044_v18 }
 0x28b   : > { %3981 = vrot.lane.b32.xlu0 %v3947_v20, %s6834_s26  ;;  %v6444_v55 = vpack.c.bf16 %v3084_v62, %v3084_v62  ;;  %v4257_v0 = vsel %vm1255_vm9, %v4248_v27, %v4256_v59  ;;  %v5422_v24 = vsel %vm2638_vm15, %v5390_v16, %v4318_v44  ;;  %v5456_v63 = vsel %vm2671_vm3, %v5424_v39, %v8951_v40  ;;  %v9080_v27 = vld [vmem:[#allocation2 + $0x98] ss:$0 sps:$4 sm:$0x77]   ;;  %v9082_v53 = vpop.permute.xlu0 %5331 }
 0x28c   : > { %v3259_v50 = vrot.slane %v6446_v13, 6  ;;  %v6447_v10 = vpack.c.bf16 %v3087_v30, %v3087_v30  ;;  %v3799_v57 = vor.u32 %v3798_v6, %v3794_v58  ;;  %v3085_v11 = vmax.f32 %v3045_v42, 0.0  ;;  %v9090_v32 = vpop.permute.xlu1 %4451 }
 0x28d   : > { %v3254_v3 = vrot.slane %v6444_v55, 6  ;;  %v5488_v20 = vsel %vm2704_vm2, %v5456_v63, %v4800_v21  ;;  %v6292_v35 = vcombine.low %v3457_v15, %v9004_v56  ;;  %v4426_v14 = vrot.slane %v9023_v2, 2 }
 0x28e   : > { %v3260_v44 = vrot.slane %v3259_v50, 4  ;;  %vm9693_vm8 = vcmask 27650   ;;  %v3261_v40 = vrot.slane %v6447_v10, 6  ;;  %v3804_v39 = vsel %vm9694_vm11, %v3799_v57, %v3803_v29 }
 0x28f   : > { %3357 = vst.msk [vmem:[#allocation2 + $0xb4] sm:$0xc] %vm9693_vm8, %v3259_v50  ;;  %v6445_v4 = vpack.c.bf16 %v3085_v11, %v3085_v11  ;;  %v3255_v37 = vrot.slane %v3254_v3, 4  ;;  %vm9695_vm4 = vmmov %vm9693_vm8  ;;  %4333 = vrot.lane.b32.xlu0 %v4257_v0, %s6838_s7  ;;  %3855 = vrot.lane.b32.xlu1 %v3804_v39, %s6837_s6  ;;  %v4425_v21 = vrot.slane %v6292_v35, 2  ;;  %v6261_v48 = vcombine.low %v3426_v31, %v9033_v54  ;;  %v9107_v29 = vpop.permute.xlu0 %5329  ;;  %v3489_v11 = vld [vmem:[#allocation2 + $0x90] sm:$0x8] }
 0x290   : > { %3354 = vst.msk [vmem:[#allocation2 + $0xa8] sm:$0xc] %vm9695_vm4, %v3254_v3  ;;  %v3949_v2 = vrot.slane %v9029_v38, 1  ;;  %v3262_v16 = vsel %vm6937_vm5, %v3260_v44, %v3261_v40  ;;  %v3263_v17 = vrot.slane %v3261_v40, 4  ;;  %v5454_v52 = vsel %vm2671_vm3, %v5422_v24, %v8999_v60  ;;  %v9112_v6 = vpop.permute.xlu1 %4931  ;;  %v9119_v44 = vld [vmem:[#allocation2 + $0x98] sm:$0xf] }
 0x291   : > { %v3256_v12 = vrot.slane %v6445_v4, 6  ;;  %vm9696_vm13 = vcmask 27648   ;;  %v4427_v38 = vsel %vm1608_vm7, %v4425_v21, %v4426_v14  ;;  %v3948_v23 = vrot.slane %v6261_v48, 1  ;;  %v3458_v14 = vld [vmem:[#allocation2 + $0x9c] sm:$0xc] }
 0x292   : > { %3358 = vst.msk [vmem:[#allocation2 + $0xb8] sm:$0xf] %vm9696_vm13, %v3262_v16  ;;  %v5486_v33 = vsel %vm2704_vm2, %v5454_v52, %v9051_v7  ;;  %v5520_v58 = vsel %vm2737_vm1, %v5488_v20, %v8974_v5  ;;  %vm9697_vm12 = vcmask 25600   ;;  %v4722_v28 = vshrl.u32 %v6292_v35, 16  ;;  %vm9698_vm8 = vmmov %vm9696_vm13 }
 0x293   : > { %3359 = vst.msk [vmem:[#allocation2 + $0xbc] sm:$0x3] %vm9697_vm12, %v3263_v17  ;;  %v3257_v60 = vsel %vm6937_vm5, %v3255_v37, %v3256_v12  ;;  %v3258_v1 = vrot.slane %v3256_v12, 4  ;;  %v5552_v18 = vsel %vm2770_vm0, %v5520_v58, %v5280_v34  ;;  %4461 = vrot.lane.b32.xlu0 %v4427_v38, %s6835_s27  ;;  %vm9699_vm11 = vcmask 1046528   ;;  %vm9700_vm4 = vmmov %vm9697_vm12  ;;  %v9121_v40 = vpop.permute.xlu0 %3969 }
 0x294   : > { %3355 = vst.msk [vmem:[#allocation2 + $0xac] sm:$0xf] %vm9698_vm8, %v3257_v60  ;;  %v3950_v62 = vsel %vm9699_vm11, %v3948_v23, %v3949_v2  ;;  %v4725_v59 = vshll.u32 %v6292_v35, 16  ;;  %v4730_v7 = vshrl.u32 %v9080_v27, 16  ;;  %v4733_v5 = vshll.u32 %v9080_v27, 16 }
 0x295   : > { %3356 = vst.msk [vmem:[#allocation2 + $0xb0] sm:$0x3] %vm9700_vm4, %v3258_v1  ;;  %3983 = vrot.lane.b32.xlu1 %v3950_v62, %s6834_s26  ;;  %v4724_v19 = vrot.slane %v4722_v28, 2  ;;  %v4259_v34 = vshrl.u32 %v6261_v48, 16  ;;  %v4262_v13 = vshll.u32 %v6261_v48, 16  ;;  %v4267_v30 = vshrl.u32 %v9088_v43, 16 }
 0x296   : > { %v4727_v42 = vrot.slane %v4725_v59, 3  ;;  %v4732_v55 = vrot.slane %v4730_v7, 2  ;;  %v4735_v0 = vrot.slane %v4733_v5, 3  ;;  %v4270_v24 = vshll.u32 %v9088_v43, 16  ;;  %v3490_v28 = vld [vmem:[#allocation2 + $0x9c] sm:$0x8] }
 0x297   : > { %v4261_v63 = vrot.slane %v4259_v34, 1  ;;  %v4264_v50 = vrot.slane %v4262_v13, 2  ;;  %v4269_v10 = vrot.slane %v4267_v30, 1  ;;  %v5518_v57 = vsel %vm2737_vm1, %v5486_v33, %v9016_v46  ;;  %v3844_v46 = vpop.permute.xlu1 %3843  ;;  %v6769_v16 = vld [vmem:[#allocation2 + $0xa4] ss:$0 sps:$4 sm:$0x77]   ;;  %v9138_v33 = vpop.permute.xlu0 %4449 }
 0x298   : > { %v4728_v15 = vor.u32 %v4727_v42, %v4724_v19  ;;  %v4736_v3 = vor.u32 %v4735_v0, %v4732_v55  ;;  %v4272_v20 = vrot.slane %v4270_v24, 2  ;;  %v5550_v35 = vsel %vm2770_vm0, %v5518_v57, %v9066_v25 }
 0x299   : > { %v4265_v39 = vor.u32 %v4264_v50, %v4261_v63  ;;  %v6324_v4 = vcombine.low %v3489_v11, %v9004_v56  ;;  %v4906_v31 = vrot.slane %v9080_v27, 3  ;;  %v6293_v37 = vcombine.low %v3458_v14, %v9033_v54 }
 0x29a   : > { %vm9701_vm5 = vsmask.f32 5376  ;;  %v4273_v48 = vor.u32 %v4272_v20, %v4269_v10  ;;  %v4429_v2 = vrot.slane %v9088_v43, 2  ;;  %v5582_v25 = vsel %vm2803_vm6, %v5550_v35, %v8969_v22 }
 0x29b   : > { %v4737_v21 = vsel %vm9701_vm5, %v4728_v15, %v4736_v3  ;;  %v4905_v17 = vrot.slane %v6324_v4, 3  ;;  %v4428_v12 = vrot.slane %v6293_v37, 2  ;;  %6538 = vmatprep.mubr.msk.bf16.mxu1 %vm2858_vm10, %v5582_v25  ;;  %v5584_v27 = vsel %vm2803_vm6, %v5552_v18, %v8945_v41  ;;  %v9142_v41 = vld [vmem:[#allocation2 + $0xa4] sm:$0xf]  ;;  %v3842_v18 = vpop.permute.xlu1 %3841  ;;  %v9147_v63 = vpop.permute.xlu0 %4929  ;;  %vm9705_vm11 = vmmov %vm9701_vm5 }
 0x29c   : > { %4813 = vrot.lane.b32.xlu0 %v4737_v21, %s6839_s10  ;;  %v6340_v52 = vcombine.low %v9119_v44, %v9119_v44  ;;  %v4274_v38 = vsel %vm1255_vm9, %v4265_v39, %v4273_v48  ;;  %6539 = vmatmul.mubr.msk.bf16.gmra.mrb[8].mxu1 %vm2858_vm10, %v5584_v27  ;;  %v5202_v43 = vshrl.u32 %v6324_v4, 16  ;;  %v5205_v23 = vshll.u32 %v6324_v4, 16  ;;  %v9154_v39 = vld [vmem:[#allocation2 + $0xac] sm:$0xf] }
 0x29d   : > { %v4739_v22 = vshrl.u32 %v6293_v37, 16  ;;  %4335 = vrot.lane.b32.xlu1 %v4274_v38, %s6838_s7  ;;  %vm9702_vm13 = vcmask 1044480   ;;  %v4742_v5 = vshll.u32 %v6293_v37, 16  ;;  %v4747_v13 = vshrl.u32 %v6769_v16, 16 }
 0x29e   : > { %v4907_v58 = vsel %vm9702_vm13, %v4905_v17, %v4906_v31  ;;  %v5210_v60 = vshrl.u32 %v6340_v52, 16  ;;  %v5213_v1 = vshll.u32 %v6340_v52, 16  ;;  %v5204_v62 = vrot.slane %v5202_v43, 3  ;;  %v6771_v4 = vld [vmem:[#allocation2 + $0xb0] ss:$0 sps:$4 sm:$0x11]   ;;  %vm9706_vm4 = vmmov %vm9702_vm13 }
 0x29f   : > { %v5207_v59 = vrot.slane %v5205_v23, 4  ;;  %v4741_v7 = vrot.slane %v4739_v22, 2  ;;  %v4750_v30 = vshll.u32 %v6769_v16, 16  ;;  %v4430_v42 = vsel %vm1608_vm7, %v4428_v12, %v4429_v2  ;;  %v4324_v15 = vpop.permute.xlu1 %4323  ;;  %v4322_v17 = vpop.permute.xlu0 %4321  ;;  %v9165_v43 = vld [vmem:[#allocation2 + $0xb0] ss:$0 sps:$4 sm:$0x33]  }
 0x2a0   : > { %4941 = vrot.lane.b32.xlu0 %v4907_v58, %s6836_s28  ;;  %v5212_v19 = vrot.slane %v5210_v60, 3  ;;  %v5215_v34 = vrot.slane %v5213_v1, 4  ;;  %v4744_v0 = vrot.slane %v4742_v5, 3  ;;  %v6325_v24 = vcombine.low %v3490_v28, %v9033_v54  ;;  %v3393_v58 = vld [vmem:[#allocation2 + $0xa8] sm:$0xf] }
 0x2a1   : > { %v5208_v55 = vor.u32 %v5207_v59, %v5204_v62  ;;  %4463 = vrot.lane.b32.xlu1 %v4430_v42, %s6835_s27  ;;  %v4749_v10 = vrot.slane %v4747_v13, 2  ;;  %v4752_v57 = vrot.slane %v4750_v30, 3  ;;  %v4909_v11 = vrot.slane %v6769_v16, 3  ;;  %v3427_v16 = vld [vmem:[#allocation2 + $0xa8] sm:$0xe] }
 0x2a2   : > { %v5216_v50 = vor.u32 %v5215_v34, %v5212_v19  ;;  %v4745_v3 = vor.u32 %v4744_v0, %v4741_v7  ;;  %v6356_v20 = vcombine.low %v9004_v56, %v9119_v44  ;;  %v4908_v35 = vrot.slane %v6325_v24, 3  ;;  %v9173_v62 = vld [vmem:[#allocation2 + $0xbc] ss:$0 sps:$4 sm:$0x11]   ;;  %v9178_v34 = vld [vmem:[#allocation2 + $0xb8] sm:$0xf] }
 0x2a3   : > { %v6341_v14 = vcombine.low %v9142_v41, %v9142_v41  ;;  %vm9703_vm12 = vsmask.f32 4352  ;;  %v4753_v37 = vor.u32 %v4752_v57, %v4749_v10  ;;  %vm9704_vm8 = vcmask 31744   ;;  %v4802_v13 = vpop.permute.xlu0 %4801 }
 0x2a4   : > { %v5217_v31 = vsel %vm9703_vm12, %v5208_v55, %v5216_v50  ;;  %v5364_v21 = vsel %vm9704_vm8, %v8550_v8, %v3844_v46  ;;  %v5219_v48 = vshrl.u32 %v6325_v24, 16  ;;  %v6357_v2 = vcombine.low %v9033_v54, %v9142_v41  ;;  %v4804_v8 = vpop.permute.xlu1 %4803  ;;  %vm9707_vm5 = vmmov %vm9704_vm8 }
 0x2a5   : > { %5293 = vrot.lane.b32.xlu0 %v5217_v31, %s6840_s11  ;;  %v5222_v56 = vshll.u32 %v6325_v24, 16  ;;  %v5227_v44 = vshrl.u32 %v6341_v14, 16  ;;  %v5230_v25 = vshll.u32 %v6341_v14, 16  ;;  %v4754_v12 = vsel %vm9705_vm11, %v4745_v3, %v4753_v37 }
 0x2a6   : > { %v4910_v27 = vsel %vm9706_vm4, %v4908_v35, %v4909_v11  ;;  %v5221_v52 = vrot.slane %v5219_v48, 3  ;;  %v6262_v38 = vcombine.low %v3427_v16, %v9154_v39  ;;  %4815 = vrot.lane.b32.xlu1 %v4754_v12, %s6839_s10  ;;  %v3952_v22 = vrot.slane %v6771_v4, 1  ;;  %v3459_v12 = vld [vmem:[#allocation2 + $0xa8] sm:$0xc] }
 0x2a7   : > { %v5224_v46 = vrot.slane %v5222_v56, 4  ;;  %v5229_v23 = vrot.slane %v5227_v44, 3  ;;  %v5232_v54 = vrot.slane %v5230_v25, 4  ;;  %v5362_v60 = vsel %vm9707_vm5, %v8568_v61, %v3842_v18  ;;  %v5282_v56 = vpop.permute.xlu0 %5281 }
 0x2a8   : > { %v3951_v1 = vrot.slane %v6262_v38, 1  ;;  %v9171_v28 = vcombine.low %v3393_v58, %v9154_v39  ;;  %v3813_v41 = vshll.u32 %v6771_v4, 16  ;;  %v5396_v5 = vsel %vm2605_vm14, %v5364_v21, %v9068_v36  ;;  %v3395_v36 = vld [vmem:[#allocation2 + $0xb4] sm:$0xf] }
 0x2a9   : > { %5341 = vrot.lane.b32.xlu0 %v6356_v20, %s6833_s25  ;;  %v5225_v59 = vor.u32 %v5224_v46, %v5221_v52  ;;  %v5233_v7 = vor.u32 %v5232_v54, %v5229_v23  ;;  %v4276_v19 = vshrl.u32 %v6262_v38, 16  ;;  %vm9708_vm13 = vcmask 1046528   ;;  %v5284_v20 = vpop.permute.xlu1 %5283  ;;  %v3428_v46 = vld [vmem:[#allocation2 + $0xb4] sm:$0xe] }
 0x2aa   : > { %v3953_v61 = vsel %vm9708_vm13, %v3951_v1, %v3952_v22  ;;  %v3806_v18 = vshrl.u32 %v9171_v28, 16  ;;  %v3808_v30 = vshll.u32 %v9171_v28, 16  ;;  %v5428_v42 = vsel %vm2638_vm15, %v5396_v5, %v4324_v15  ;;  %4943 = vrot.lane.b32.xlu1 %v4910_v27, %s6836_s28  ;;  %v9203_v23 = vld [vmem:[#allocation2 + $0xb0] ss:$0 sps:$4 sm:$0x77]   ;;  %vm9711_vm4 = vmmov %vm9708_vm13 }
 0x2ab   : > { %v3815_v55 = vrot.slane %v3813_v41, 1  ;;  %v4278_v0 = vrot.slane %v4276_v19, 1  ;;  %v4279_v24 = vshll.u32 %v6262_v38, 16  ;;  %v4284_v50 = vshrl.u32 %v9165_v43, 16  ;;  %v9217_v5 = vpop.permute.xlu0 %5335 }
 0x2ac   : > { %v3810_v10 = vrot.slane %v3808_v30, 1  ;;  %v4287_v57 = vshll.u32 %v9165_v43, 16  ;;  %v9188_v11 = vcombine.low %v3395_v36, %v9178_v34  ;;  %v3825_v3 = vshll.u32 %v9173_v62, 16 }
 0x2ad   : > { %5343 = vrot.lane.b32.xlu0 %v6357_v2, %s6833_s25  ;;  %v5234_v15 = vsel %vm9703_vm12, %v5225_v59, %v5233_v7  ;;  %v4281_v35 = vrot.slane %v4279_v24, 2  ;;  %v4286_v14 = vrot.slane %v4284_v50, 1  ;;  %v5394_v4 = vsel %vm2605_vm14, %v5362_v60, %v9121_v40  ;;  %v9215_v7 = vld [vmem:[#allocation2 + $0xbc] ss:$0 sps:$4 sm:$0x33]  }
 0x2ae   : > { %v3811_v31 = vor.u32 %v3810_v10, %v3806_v18  ;;  %v4289_v37 = vrot.slane %v4287_v57, 2  ;;  %v3820_v21 = vshll.u32 %v9188_v11, 16  ;;  %v5460_v48 = vsel %vm2671_vm3, %v5428_v42, %v9090_v32  ;;  %5295 = vrot.lane.b32.xlu1 %v5234_v15, %s6840_s11  ;;  %v9205_v32 = vpop.permute.xlu1 %3975 }
 0x2af   : > { %v4282_v44 = vor.u32 %v4281_v35, %v4278_v0  ;;  %v3818_v2 = vshrl.u32 %v9188_v11, 16  ;;  %v3827_v25 = vrot.slane %v3825_v3, 1  ;;  %v5426_v16 = vsel %vm2638_vm15, %v5394_v4, %v4322_v17  ;;  %v9232_v3 = vpop.permute.xlu0 %5333 }
 0x2b0   : > { %vm9709_vm8 = vsmask.f32 7424  ;;  %v4290_v40 = vor.u32 %v4289_v37, %v4286_v14  ;;  %v3822_v52 = vrot.slane %v3820_v21, 1  ;;  %v6294_v38 = vcombine.low %v3459_v12, %v9154_v39  ;;  %v3491_v21 = vld [vmem:[#allocation2 + $0xa8] sm:$0x8] }
 0x2b1   : > { %v3816_v27 = vsel %vm9709_vm8, %v3811_v31, %v3815_v55  ;;  %3985 = vrot.lane.b32.xlu0 %v3953_v61, %s6834_s26  ;;  %v5492_v54 = vsel %vm2704_vm2, %v5460_v48, %v4804_v8  ;;  %v4432_v22 = vrot.slane %v9165_v43, 2  ;;  %v6263_v17 = vcombine.low %v3428_v46, %v9178_v34  ;;  %vm9710_vm11 = vmmov %vm9709_vm8  ;;  %v9243_v12 = vld [vmem:[#allocation2 + $0xb0] sm:$0xf] }
 0x2b2   : > { %v3955_v58 = vrot.slane %v9173_v62, 1  ;;  %v4291_v60 = vsel %vm1255_vm9, %v4282_v44, %v4290_v40  ;;  %v3823_v1 = vor.u32 %v3822_v52, %v3818_v2  ;;  %v4431_v41 = vrot.slane %v6294_v38, 2  ;;  %3857 = vrot.lane.b32.xlu1 %v3816_v27, %s6837_s6  ;;  %v9226_v42 = vpop.permute.xlu1 %4455 }
 0x2b3   : > { %v5458_v59 = vsel %vm2671_vm3, %v5426_v16, %v9138_v33  ;;  %v3954_v8 = vrot.slane %v6263_v17, 1  ;;  %v4756_v19 = vshrl.u32 %v6294_v38, 16  ;;  %v4759_v61 = vshll.u32 %v6294_v38, 16  ;;  %v3460_v16 = vld [vmem:[#allocation2 + $0xb4] sm:$0xc]  ;;  %v9249_v52 = vpop.permute.xlu0 %3973 }
 0x2b4   : > { %v5490_v43 = vsel %vm2704_vm2, %v5458_v59, %v4802_v13  ;;  %v3828_v62 = vsel %vm9710_vm11, %v3823_v1, %v3827_v25  ;;  %v4433_v18 = vsel %vm1608_vm7, %v4431_v41, %v4432_v22  ;;  %v5524_v30 = vsel %vm2737_vm1, %v5492_v54, %v9112_v6 }
 0x2b5   : > { %v4764_v33 = vshrl.u32 %v9203_v23, 16  ;;  %4337 = vrot.lane.b32.xlu0 %v4291_v60, %s6838_s7  ;;  %v5556_v55 = vsel %vm2770_vm0, %v5524_v30, %v5284_v20  ;;  %v4758_v0 = vrot.slane %v4756_v19, 2  ;;  %v4761_v24 = vrot.slane %v4759_v61, 3 }
 0x2b6   : > { %v4767_v13 = vshll.u32 %v9203_v23, 16  ;;  %v4293_v36 = vshrl.u32 %v6263_v17, 16  ;;  %v4296_v10 = vshll.u32 %v6263_v17, 16  ;;  %v4301_v57 = vshrl.u32 %v9215_v7, 16  ;;  %3859 = vrot.lane.b32.xlu1 %v3828_v62, %s6837_s6  ;;  %v9239_v48 = vpop.permute.xlu1 %4935  ;;  %s9367_s6 = scalar_lea.vmem %s9521_s5, %s6382_s21 }
 0x2b7   : > { %v4766_v50 = vrot.slane %v4764_v33, 2  ;;  %v4762_v6 = vor.u32 %v4761_v24, %v4758_v0  ;;  %v4304_v35 = vshll.u32 %v9215_v7, 16  ;;  %v5522_v20 = vsel %vm2737_vm1, %v5490_v43, %v9147_v63  ;;  %v9257_v17 = vld [vmem:[#allocation2 + $0xbc] ss:$0 sps:$4 sm:$0x77]  }
 0x2b8   : > { %v4769_v15 = vrot.slane %v4767_v13, 3  ;;  %v4295_v14 = vrot.slane %v4293_v36, 1  ;;  %v4298_v4 = vrot.slane %v4296_v10, 2  ;;  %v4303_v31 = vrot.slane %v4301_v57, 1  ;;  %v3508_v24 = vld [vmem:[#allocation2 + $0xbc] sm:$0xf] }
 0x2b9   : > { %v5554_v37 = vsel %vm2770_vm0, %v5522_v20, %v5282_v56  ;;  %4465 = vrot.lane.b32.xlu0 %v4433_v18, %s6835_s27  ;;  %v4306_v2 = vrot.slane %v4304_v35, 2  ;;  %v6326_v25 = vcombine.low %v3491_v21, %v9154_v39  ;;  %v3956_v27 = vsel %vm9711_vm4, %v3954_v8, %v3955_v58  ;;  %v4454_v18 = vpop.permute.xlu0 %4453  ;;  %v3492_v36 = vld [vmem:[#allocation2 + $0xb4] sm:$0x8] }
 0x2ba   : > { %v4770_v44 = vor.u32 %v4769_v15, %v4766_v50  ;;  %v4299_v63 = vor.u32 %v4298_v4, %v4295_v14  ;;  %v6295_v40 = vcombine.low %v3460_v16, %v9178_v34  ;;  %v5586_v56 = vsel %vm2803_vm6, %v5554_v37, %v9107_v29  ;;  %3987 = vrot.lane.b32.xlu1 %v3956_v27, %s6834_s26  ;;  %v3848_v41 = vpop.permute.xlu1 %3847 }
 0x2bb   : > { %vm9712_vm5 = vsmask.f32 5376  ;;  %v4307_v46 = vor.u32 %v4306_v2, %v4303_v31  ;;  %v4912_v54 = vrot.slane %v9203_v23, 3  ;;  %6542 = vmatprep.mubr.msk.bf16.mxu1 %vm2858_vm10, %v5586_v56  ;;  %v5588_v22 = vsel %vm2803_vm6, %v5556_v55, %v9082_v53 }
 0x2bc   : > { %v4771_v38 = vsel %vm9712_vm5, %v4762_v6, %v4770_v44  ;;  %v4911_v58 = vrot.slane %v6326_v25, 3  ;;  %6543 = vmatmul.mubr.msk.bf16.gmra.mrb[12].mxu1 %vm2858_vm10, %v5588_v22  ;;  %v6342_v29 = vcombine.low %v9243_v12, %v9243_v12  ;;  %v5236_v60 = vshrl.u32 %v6326_v25, 16 }
 0x2bd   : > { %v5239_v1 = vshll.u32 %v6326_v25, 16  ;;  %4817 = vrot.lane.b32.xlu0 %v4771_v38, %s6839_s10  ;;  %v4434_v59 = vrot.slane %v6295_v40, 2  ;;  %v4435_v23 = vrot.slane %v9215_v7, 2  ;;  %v4773_v8 = vshrl.u32 %v6295_v40, 16  ;;  %v4934_v37 = vpop.permute.xlu0 %4933 }
 0x2be   : > { %v4776_v43 = vshll.u32 %v6295_v40, 16  ;;  %v4308_v53 = vsel %vm1255_vm9, %v4299_v63, %v4307_v46  ;;  %v5238_v19 = vrot.slane %v5236_v60, 3  ;;  %v5244_v62 = vshrl.u32 %v6342_v29, 16  ;;  %v3846_v10 = vpop.permute.xlu1 %3845  ;;  %vm9714_vm9 = vmmov %vm9703_vm12 }
 0x2bf   : > { %v5241_v61 = vrot.slane %v5239_v1, 4  ;;  %4339 = vrot.lane.b32.xlu1 %v4308_v53, %s6838_s7  ;;  %v5247_v30 = vshll.u32 %v6342_v29, 16  ;;  %v4775_v33 = vrot.slane %v4773_v8, 2  ;;  %v4781_v0 = vshrl.u32 %v9257_v17, 16  ;;  %vm9719_vm4 = vmmov %vm9714_vm9 }
 0x2c0   : > { %v4778_v55 = vrot.slane %v4776_v43, 3  ;;  %vm9713_vm13 = vcmask 1044480   ;;  %v5246_v50 = vrot.slane %v5244_v62, 3  ;;  %v4784_v7 = vshll.u32 %v9257_v17, 16 }
 0x2c1   : > { %v4913_v13 = vsel %vm9713_vm13, %v4911_v58, %v4912_v54  ;;  %v5242_v57 = vor.u32 %v5241_v61, %v5238_v19  ;;  %v5249_v6 = vrot.slane %v5247_v30, 4  ;;  %v4783_v15 = vrot.slane %v4781_v0, 2  ;;  %vm9718_vm11 = vmmov %vm9713_vm13 }
 0x2c2   : > { %4945 = vrot.lane.b32.xlu0 %v4913_v13, %s6836_s28  ;;  %v6327_v35 = vcombine.low %v3492_v36, %v9178_v34  ;;  %v4436_v20 = vsel %vm1608_vm7, %v4434_v59, %v4435_v23  ;;  %v4779_v14 = vor.u32 %v4778_v55, %v4775_v33  ;;  %v4786_v4 = vrot.slane %v4784_v7, 3  ;;  %vm9715_vm7 = vmmov %vm9712_vm5  ;;  %v4328_v29 = vpop.permute.xlu1 %4327  ;;  %v4326_v59 = vpop.permute.xlu0 %4325 }
 0x2c3   : > { %v6343_v31 = vcombine.low %v3508_v24, %v3508_v24  ;;  %4467 = vrot.lane.b32.xlu1 %v4436_v20, %s6835_s27  ;;  %v5250_v21 = vor.u32 %v5249_v6, %v5246_v50  ;;  %v4915_v56 = vrot.slane %v9257_v17, 3  ;;  %v6358_v60 = vcombine.low %v9154_v39, %v9243_v12 }
 0x2c4   : > { %v5253_v44 = vshrl.u32 %v6327_v35, 16  ;;  %v5256_v2 = vshll.u32 %v6327_v35, 16  ;;  %v4787_v25 = vor.u32 %v4786_v4, %v4783_v15  ;;  %v4914_v40 = vrot.slane %v6327_v35, 3 }
 0x2c5   : > { %v5261_v16 = vshrl.u32 %v6343_v31, 16  ;;  %v5264_v27 = vshll.u32 %v6343_v31, 16  ;;  %v5251_v63 = vsel %vm9714_vm9, %v5242_v57, %v5250_v21  ;;  %vm9716_vm12 = vcmask 31744  }
 0x2c6   : > { %v5255_v38 = vrot.slane %v5253_v44, 3  ;;  %5297 = vrot.lane.b32.xlu0 %v5251_v63, %s6840_s11  ;;  %v4788_v46 = vsel %vm9715_vm7, %v4779_v14, %v4787_v25  ;;  %v5258_v54 = vrot.slane %v5256_v2, 4  ;;  %v5368_v1 = vsel %vm9716_vm12, %v8713_v51, %v3848_v41  ;;  %vm9717_vm8 = vmmov %vm9716_vm12 }
 0x2c7   : > { %v5263_v22 = vrot.slane %v5261_v16, 3  ;;  %v5266_v58 = vrot.slane %v5264_v27, 4  ;;  %4819 = vrot.lane.b32.xlu1 %v4788_v46, %s6839_s10  ;;  %v5366_v17 = vsel %vm9717_vm8, %v8731_v9, %v3846_v10  ;;  %v4916_v23 = vsel %vm9718_vm11, %v4914_v40, %v4915_v56  ;;  %v4808_v12 = vpop.permute.xlu1 %4807  ;;  %vm9720_vm5 = vmmov %vm9717_vm8 }
 0x2c8   : > { %v5259_v8 = vor.u32 %v5258_v54, %v5255_v38  ;;  %v5400_v53 = vsel %vm2605_vm14, %v5368_v1, %v9205_v32  ;;  %v5398_v51 = vsel %vm2605_vm14, %v5366_v17, %v9249_v52  ;;  %v4806_v19 = vpop.permute.xlu0 %4805  ;;  %v6359_v30 = vcombine.low %v9178_v34, %v3508_v24  ;;  %vm9721_vm13 = vmmov %vm9720_vm5 }
 0x2c9   : > { %v5267_v43 = vor.u32 %v5266_v58, %v5263_v22  ;;  %v5432_v39 = vsel %vm2638_vm15, %v5400_v53, %v4328_v29  ;;  %v5430_v41 = vsel %vm2638_vm15, %v5398_v51, %v4326_v59  ;;  %vm9722_vm9 = vmmov %vm9720_vm5 }
 0x2ca   : > { %5345 = vrot.lane.b32.xlu0 %v6358_v60, %s6833_s25  ;;  %v5464_v61 = vsel %vm2671_vm3, %v5432_v39, %v9226_v42  ;;  %v5462_v32 = vsel %vm2671_vm3, %v5430_v41, %v4454_v18  ;;  %vm9723_vm7 = vmmov %vm9720_vm5 }
 0x2cb   : > { %4947 = vrot.lane.b32.xlu1 %v4916_v23, %s6836_s28  ;;  %v5268_v9 = vsel %vm9719_vm4, %v5259_v8, %v5267_v43  ;;  %v5496_v62 = vsel %vm2704_vm2, %v5464_v61, %v4808_v12  ;;  %v5494_v33 = vsel %vm2704_vm2, %v5462_v32, %v4806_v19  ;;  %vm9724_vm12 = vmmov %vm9720_vm5 }
 0x2cc   : > { %v5288_v52 = vpop.permute.xlu1 %5287  ;;  %v5528_v55 = vsel %vm2737_vm1, %v5496_v62, %v9239_v48  ;;  %v5526_v13 = vsel %vm2737_vm1, %v5494_v33, %v4934_v37  ;;  %vm9725_vm8 = vmmov %vm9720_vm5 }
 0x2cd   : > { %v5560_v0 = vsel %vm2770_vm0, %v5528_v55, %v5288_v52  ;;  %vm9726_vm11 = vmmov %vm9720_vm5 }
 0x2ce   : > { %v5592_v34 = vsel %vm2803_vm6, %v5560_v0, %v9217_v5  ;;  %vm9727_vm4 = vmmov %vm9720_vm5 }
 0x2cf   : > { %5299 = vrot.lane.b32.xlu1 %v5268_v9, %s6840_s11  ;;  %v5286_v50 = vpop.permute.xlu0 %5285 }
 0x2d0   : > { %v5558_v42 = vsel %vm2770_vm0, %v5526_v13, %v5286_v50  ;;  %v3980_v7 = vpop.permute.xlu1 %3979 }
 0x2d1   : > { %v5590_v18 = vsel %vm2803_vm6, %v5558_v42, %v9232_v3 }
 0x2d2   : > { %6546 = vmatprep.mubr.msk.bf16.mxu1 %vm2858_vm10, %v5590_v18 }
 0x2d3   : > { %5347 = vrot.lane.b32.xlu1 %v6359_v30, %s6833_s25  ;;  %6547 = vmatmul.mubr.msk.bf16.gmra.mrb[16].mxu1 %vm2858_vm10, %v5592_v34  ;;  %v3978_v24 = vpop.permute.xlu0 %3977 }
 0x2d4   : > { %v4460_v48 = vpop.permute.xlu1 %4459 }
 0x2d7   : > { %v4458_v36 = vpop.permute.xlu0 %4457 }
 0x2d8   : > { %v4940_v10 = vpop.permute.xlu1 %4939 }
 0x2db   : > { %v4938_v57 = vpop.permute.xlu0 %4937 }
 0x2dc   : > { %v3852_v6 = vpop.permute.xlu1 %3851 }
 0x2dd   : > { %v5372_v5 = vsel %vm9721_vm13, %v8897_v49, %v3852_v6  ;;  %vm9729_vm13 = vmmov %vm9727_vm4 }
 0x2de   : > { %v5404_v21 = vsel %vm2605_vm14, %v5372_v5, %v3980_v7 }
 0x2e1   : > { %v4330_v15 = vpop.permute.xlu0 %4329 }
 0x2e5   : > { %v3850_v35 = vpop.permute.xlu1 %3849 }
 0x2e6   : > { %v5370_v20 = vsel %vm9720_vm5, %v8934_v45, %v3850_v35  ;;  %vm9728_vm5 = vmmov %vm9727_vm4 }
 0x2e7   : > { %v5402_v3 = vsel %vm2605_vm14, %v5370_v20, %v3978_v24 }
 0x2e8   : > { %v5434_v14 = vsel %vm2638_vm15, %v5402_v3, %v4330_v15  ;;  %v6792_v3 = vld [vmem:[%s6925_s24 + $0x10] sm:$0xff] }
 0x2e9   : > { %v5466_v31 = vsel %vm2671_vm3, %v5434_v14, %v4458_v36 }
 0x2ea   : > { %v4810_v4 = vpop.permute.xlu0 %4809 }
 0x2eb   : > { %v5498_v44 = vsel %vm2704_vm2, %v5466_v31, %v4810_v4 }
 0x2ec   : > { %v5530_v45 = vsel %vm2737_vm1, %v5498_v44, %v4938_v57 }
 0x2ed   : > { %v4332_v37 = vpop.permute.xlu1 %4331 }
 0x2ee   : > { %v5436_v2 = vsel %vm2638_vm15, %v5404_v21, %v4332_v37  ;;  %v6793_v37 = vld [vmem:[%s6925_s24] sm:$0xff] }
 0x2ef   : > { %v5468_v27 = vsel %vm2671_vm3, %v5436_v2, %v4460_v48 }
 0x2f1   : > { %v5290_v25 = vpop.permute.xlu0 %5289 }
 0x2f2   : > { %v4812_v16 = vpop.permute.xlu1 %4811  ;;  %v5562_v63 = vsel %vm2770_vm0, %v5530_v45, %v5290_v25  ;;  %v6794_v25 = vld [vmem:[%s6925_s24 + $0x18] sm:$0xff] }
 0x2f3   : > { %v5500_v40 = vsel %vm2704_vm2, %v5468_v27, %v4812_v16 }
 0x2f4   : > { %v5532_v46 = vsel %vm2737_vm1, %v5500_v40, %v4940_v10 }
 0x2f5   : > { %v5338_v49 = vpop.permute.xlu0 %5337 }
 0x2f6   : > { %v5594_v56 = vsel %vm2803_vm6, %v5562_v63, %v5338_v49  ;;  %v6795_v63 = vld [vmem:[%s6925_s24 + $0x8] sm:$0xff] }
 0x2f7   : > { %v5292_v38 = vpop.permute.xlu1 %5291  ;;  %6550 = vmatprep.mubr.msk.bf16.mxu1 %vm2858_vm10, %v5594_v56 }
 0x2f8   : > { %v5564_v54 = vsel %vm2770_vm0, %v5532_v46, %v5292_v38 }
 0x2f9   : > { %v5340_v22 = vpop.permute.xlu0 %5339 }
 0x2fa   : > { %v5596_v58 = vsel %vm2803_vm6, %v5564_v54, %v5340_v22 }
 0x2fb   : > { %6551 = vmatmul.mubr.msk.bf16.gmra.mrb[20].mxu1 %vm2858_vm10, %v5596_v58 }
 0x2fc   : > { %v3854_v29 = vpop.permute.xlu1 %3853 }
 0x2fd   : > { %v3982_v60 = vpop.permute.xlu0 %3981  ;;  %v5374_v53 = vsel %vm9722_vm9, %v9027_v26, %v3854_v29 }
 0x2fe   : > { %v5406_v51 = vsel %vm2605_vm14, %v5374_v53, %v3982_v60 }
 0x301   : > { %v4334_v1 = vpop.permute.xlu0 %4333  ;;  %v3856_v59 = vpop.permute.xlu1 %3855 }
 0x302   : > { %v5438_v41 = vsel %vm2638_vm15, %v5406_v51, %v4334_v1  ;;  %v5376_v26 = vsel %vm9723_vm7, %v9045_v47, %v3856_v59  ;;  %v9353_v47 = vld [vmem:[%s9520_s4] ss:$0 sm:$0xff] }
 0x305   : > { %v4462_v17 = vpop.permute.xlu0 %4461 }
 0x306   : > { %v5470_v19 = vsel %vm2671_vm3, %v5438_v41, %v4462_v17 }
 0x307   : > { %v3984_v23 = vpop.permute.xlu1 %3983 }
 0x308   : > { %v5408_v55 = vsel %vm2605_vm14, %v5376_v26, %v3984_v23 }
 0x30e   : > { %v4814_v8 = vpop.permute.xlu0 %4813 }
 0x30f   : > { %v4336_v43 = vpop.permute.xlu1 %4335  ;;  %v5502_v61 = vsel %vm2704_vm2, %v5470_v19, %v4814_v8 }
 0x310   : > { %v5440_v13 = vsel %vm2638_vm15, %v5408_v55, %v4336_v43 }
 0x312   : > { %v4942_v39 = vpop.permute.xlu0 %4941 }
 0x313   : > { %v4464_v12 = vpop.permute.xlu1 %4463  ;;  %v5534_v32 = vsel %vm2737_vm1, %v5502_v61, %v4942_v39 }
 0x314   : > { %v5472_v50 = vsel %vm2671_vm3, %v5440_v13, %v4464_v12 }
 0x317   : > { %v5294_v9 = vpop.permute.xlu0 %5293 }
 0x318   : > { %v4816_v62 = vpop.permute.xlu1 %4815  ;;  %v5566_v30 = vsel %vm2770_vm0, %v5534_v32, %v5294_v9 }
 0x319   : > { %v5504_v7 = vsel %vm2704_vm2, %v5472_v50, %v4816_v62 }
 0x31b   : > { %v5342_v33 = vpop.permute.xlu0 %5341 }
 0x31c   : > { %v5598_v52 = vsel %vm2803_vm6, %v5566_v30, %v5342_v33  ;;  %v4944_v0 = vpop.permute.xlu1 %4943 }
 0x31d   : > { %6554 = vmatprep.mubr.msk.bf16.mxu1 %vm2858_vm10, %v5598_v52  ;;  %v5536_v18 = vsel %vm2737_vm1, %v5504_v7, %v4944_v0  ;;  %v6532_v10 = vpop.f32.mrb[0].mxu1 }
 0x31e   : > { %v5705_v57 = vadd.f32 %v6532_v10, %v9353_v47  ;;  %v5696_v6 = vpop.f32.mrb[1].mxu1 }
 0x31f   : > { %v5344_v42 = vpop.permute.xlu0 %5343  ;;  %v5697_v35 = vadd.f32 %v9353_v47, %v5696_v6  ;;  %v6533_v20 = vpop.f32.mrb[2].mxu1 }
 0x320   : > { %v5296_v34 = vpop.permute.xlu1 %5295  ;;  %v5825_v14 = vadd.f32 %v6792_v3, %v5705_v57  ;;  %v5708_v4 = vadd.f32 %v6533_v20, %v9353_v47  ;;  %v5699_v5 = vpop.f32.mrb[3].mxu1  ;;  %v6798_v57 = vld [vmem:[%s6925_s24 + $0x38] sm:$0xff] }
 0x321   : > { %v5568_v24 = vsel %vm2770_vm0, %v5536_v18, %v5296_v34  ;;  %v5823_v21 = vadd.f32 %v6793_v37, %v5697_v35  ;;  %v5700_v44 = vadd.f32 %v9353_v47, %v5699_v5  ;;  %v6799_v35 = vld [vmem:[%s6925_s24 + $0x28] sm:$0xff] }
 0x322   : > { %v5600_v48 = vsel %vm2803_vm6, %v5568_v24, %v5344_v42  ;;  %v5857_v2 = vmax.f32 %v5825_v14, 0.0  ;;  %v5826_v16 = vadd.f32 %v6794_v25, %v5708_v4  ;;  %v6796_v42 = vld [vmem:[%s6925_s24 + $0x30] sm:$0xff]  ;;  %v6797_v24 = vld [vmem:[%s6925_s24 + $0x20] sm:$0xff] }
 0x323   : > { %v3986_v36 = vpop.permute.xlu0 %3985  ;;  %6555 = vmatmul.mubr.msk.bf16.gmra.mrb[24].mxu1 %vm2858_vm10, %v5600_v48  ;;  %v5855_v27 = vmax.f32 %v5823_v21, 0.0  ;;  %v5824_v40 = vadd.f32 %v6795_v63, %v5700_v44  ;;  %v6800_v44 = vld [vmem:[%s6925_s24 + $0x50] sm:$0xff] }
 0x324   : > { %v3858_v15 = vpop.permute.xlu1 %3857  ;;  %5889 = vst.msk [vmem:[%s9367_s6 + $0x10] sm:$0xff] %vm9724_vm12, %v5857_v2  ;;  %v5858_v49 = vmax.f32 %v5826_v16, 0.0 }
 0x325   : > { %5887 = vst.msk [vmem:[%s9367_s6] sm:$0xff] %vm9725_vm8, %v5855_v27  ;;  %v5856_v38 = vmax.f32 %v5824_v40, 0.0  ;;  %v5378_v58 = vsel %vm9728_vm5, %v9171_v28, %v3858_v15 }
 0x326   : > { %5890 = vst.msk [vmem:[%s9367_s6 + $0x18] sm:$0xff] %vm9726_vm11, %v5858_v49  ;;  %v5410_v60 = vsel %vm2605_vm14, %v5378_v58, %v3986_v36  ;;  %v6802_v49 = vld [vmem:[%s6925_s24 + $0x58] sm:$0xff] }
 0x327   : > { %v4338_v31 = vpop.permute.xlu0 %4337  ;;  %5888 = vst.msk [vmem:[%s9367_s6 + $0x8] sm:$0xff] %vm9727_vm4, %v5856_v38 }
 0x328   : > { %v3860_v45 = vpop.permute.xlu1 %3859  ;;  %v5442_v59 = vsel %vm2638_vm15, %v5410_v60, %v4338_v31 }
 0x329   : > { %v5380_v41 = vsel %vm9729_vm13, %v9188_v11, %v3860_v45  ;;  %v6801_v45 = vld [vmem:[%s6925_s24 + $0x40] sm:$0xff] }
 0x32b   : > { %v4466_v56 = vpop.permute.xlu0 %4465 }
 0x32c   : > { %v3988_v46 = vpop.permute.xlu1 %3987  ;;  %v5474_v23 = vsel %vm2671_vm3, %v5442_v59, %v4466_v56 }
 0x32d   : > { %v5412_v9 = vsel %vm2605_vm14, %v5380_v41, %v3988_v46  ;;  %v6803_v46 = vld [vmem:[%s6925_s24 + $0x48] sm:$0xff]  ;;  %v6806_v41 = vld [vmem:[%s6925_s24 + $0x78] sm:$0xff] }
 0x32f   : > { %v4818_v54 = vpop.permute.xlu0 %4817 }
 0x330   : > { %v5506_v43 = vsel %vm2704_vm2, %v5474_v23, %v4818_v54  ;;  %v6804_v23 = vld [vmem:[%s6925_s24 + $0x70] sm:$0xff] }
 0x331   : > { %v4340_v22 = vpop.permute.xlu1 %4339 }
 0x332   : > { %v5444_v19 = vsel %vm2638_vm15, %v5412_v9, %v4340_v22 }
 0x334   : > { %v4946_v29 = vpop.permute.xlu0 %4945 }
 0x335   : > { %v4468_v1 = vpop.permute.xlu1 %4467  ;;  %v5538_v53 = vsel %vm2737_vm1, %v5506_v43, %v4946_v29 }
 0x336   : > { %v5476_v62 = vsel %vm2671_vm3, %v5444_v19, %v4468_v1 }
 0x338   : > { %v5298_v17 = vpop.permute.xlu0 %5297 }
 0x339   : > { %v4820_v8 = vpop.permute.xlu1 %4819  ;;  %v5570_v39 = vsel %vm2770_vm0, %v5538_v53, %v5298_v17 }
 0x33a   : > { %v5508_v32 = vsel %vm2704_vm2, %v5476_v62, %v4820_v8 }
 0x33c   : > { %v5346_v51 = vpop.permute.xlu0 %5345 }
 0x33d   : > { %v5602_v12 = vsel %vm2803_vm6, %v5570_v39, %v5346_v51  ;;  %v4948_v28 = vpop.permute.xlu1 %4947  ;;  %v6805_v39 = vld [vmem:[%s6925_s24 + $0x60] sm:$0xff] }
 0x33e   : > { %6558 = vmatprep.mubr.msk.bf16.mxu1 %vm2858_vm10, %v5602_v12  ;;  %v5540_v30 = vsel %vm2737_vm1, %v5508_v32, %v4948_v28 }
 0x341   : > { %v5300_v61 = vpop.permute.xlu1 %5299 }
 0x342   : > { %v5572_v33 = vsel %vm2770_vm0, %v5540_v30, %v5300_v61  ;;  %vm9730_vm0 = vmmov %vm9727_vm4  ;;  %v6807_v61 = vld [vmem:[%s6925_s24 + $0x68] sm:$0xff] }
 0x343   : > { %vm9731_vm1 = vmmov %vm9730_vm0 }
 0x344   : > { %vm9732_vm2 = vmmov %vm9730_vm0 }
 0x345   : > { %v5348_v26 = vpop.permute.xlu1 %5347  ;;  %vm9735_vm14 = vmmov %vm9730_vm0 }
 0x346   : > { %v5604_v52 = vsel %vm2803_vm6, %v5572_v33, %v5348_v26  ;;  %vm9733_vm6 = vmmov %vm9730_vm0 }
 0x347   : > { %6559 = vmatmul.mubr.msk.bf16.gmra.mrb[28].mxu1 %vm2858_vm10, %v5604_v52  ;;  %vm9734_vm10 = vmmov %vm9730_vm0 }
 0x348   : > { %v6536_v11 = vpop.f32.mrb[4].mxu1  ;;  %vm9736_vm15 = vmmov %vm9730_vm0 }
 0x349   : > { %v5721_v55 = vadd.f32 %v6536_v11, %v9353_v47  ;;  %v5712_v0 = vpop.f32.mrb[5].mxu1  ;;  %vm9737_vm3 = vmmov %vm9730_vm0 }
 0x34a   : > { %v5713_v13 = vadd.f32 %v9353_v47, %v5712_v0  ;;  %v6537_v50 = vpop.f32.mrb[6].mxu1  ;;  %vm9738_vm9 = vmmov %vm9730_vm0  ;;  %v6808_v0 = vld [vmem:[%s6925_s24 + $0x90] sm:$0xff] }
 0x34b   : > { %v5829_v7 = vadd.f32 %v6796_v42, %v5721_v55  ;;  %v5724_v18 = vadd.f32 %v6537_v50, %v9353_v47  ;;  %v5715_v34 = vpop.f32.mrb[7].mxu1  ;;  %vm9739_vm7 = vmmov %vm9730_vm0 }
 0x34c   : > { %v5827_v48 = vadd.f32 %v6797_v24, %v5713_v13  ;;  %v5716_v36 = vadd.f32 %v9353_v47, %v5715_v34  ;;  %vm9740_vm12 = vmmov %vm9730_vm0 }
 0x34d   : > { %v5861_v10 = vmax.f32 %v5829_v7, 0.0  ;;  %v5830_v6 = vadd.f32 %v6798_v57, %v5724_v18  ;;  %vm9741_vm8 = vmmov %vm9730_vm0  ;;  %v6809_v7 = vld [vmem:[%s6925_s24 + $0x80] sm:$0xff]  ;;  %v6811_v57 = vld [vmem:[%s6925_s24 + $0x88] sm:$0xff] }
 0x34e   : > { %v5859_v15 = vmax.f32 %v5827_v48, 0.0  ;;  %v5828_v20 = vadd.f32 %v6799_v35, %v5716_v36  ;;  %v6810_v48 = vld [vmem:[%s6925_s24 + $0x98] sm:$0xff]  ;;  %vm9742_vm11 = vmmov %vm9730_vm0 }
 0x34f   : > { %5893 = vst.msk [vmem:[%s9367_s6 + $0x30] sm:$0xff] %vm9730_vm0, %v5861_v10  ;;  %v5862_v3 = vmax.f32 %v5830_v6, 0.0  ;;  %vm9743_vm4 = vmmov %vm9730_vm0 }
 0x350   : > { %5891 = vst.msk [vmem:[%s9367_s6 + $0x20] sm:$0xff] %vm9731_vm1, %v5859_v15  ;;  %v5860_v14 = vmax.f32 %v5828_v20, 0.0  ;;  %vm9744_vm5 = vmmov %vm9730_vm0 }
 0x351   : > { %5894 = vst.msk [vmem:[%s9367_s6 + $0x38] sm:$0xff] %vm9732_vm2, %v5862_v3  ;;  %vm9745_vm13 = vmmov %vm9730_vm0 }
 0x352   : > { %5892 = vst.msk [vmem:[%s9367_s6 + $0x28] sm:$0xff] %vm9733_vm6, %v5860_v14  ;;  %vm9746_vm1 = vmmov %vm9730_vm0 }
 0x353   : > { %vm9747_vm2 = vmmov %vm9730_vm0 }
 0x354   : > { %vm9748_vm6 = vmmov %vm9730_vm0 }
 0x36f   : > { %v6540_v4 = vpop.f32.mrb[8].mxu1 }
 0x370   : > { %v5737_v5 = vadd.f32 %v6540_v4, %v9353_v47  ;;  %v5728_v31 = vpop.f32.mrb[9].mxu1 }
 0x371   : > { %v5729_v37 = vadd.f32 %v9353_v47, %v5728_v31  ;;  %v6541_v21 = vpop.f32.mrb[10].mxu1  ;;  %v6812_v31 = vld [vmem:[%s6925_s24 + $0xb0] sm:$0xff] }
 0x372   : > { %v5833_v2 = vadd.f32 %v6800_v44, %v5737_v5  ;;  %v5740_v25 = vadd.f32 %v6541_v21, %v9353_v47  ;;  %v5731_v16 = vpop.f32.mrb[11].mxu1 }
 0x373   : > { %v5831_v27 = vadd.f32 %v6801_v45, %v5729_v37  ;;  %v5732_v63 = vadd.f32 %v9353_v47, %v5731_v16 }
 0x374   : > { %v5865_v40 = vmax.f32 %v5833_v2, 0.0  ;;  %v5834_v56 = vadd.f32 %v6802_v49, %v5740_v25  ;;  %v6813_v2 = vld [vmem:[%s6925_s24 + $0xa0] sm:$0xff]  ;;  %v6815_v49 = vld [vmem:[%s6925_s24 + $0xa8] sm:$0xff] }
 0x375   : > { %v5863_v38 = vmax.f32 %v5831_v27, 0.0  ;;  %v5832_v54 = vadd.f32 %v6803_v46, %v5732_v63  ;;  %v6814_v27 = vld [vmem:[%s6925_s24 + $0xb8] sm:$0xff] }
 0x376   : > { %5897 = vst.msk [vmem:[%s9367_s6 + $0x50] sm:$0xff] %vm9734_vm10, %v5865_v40  ;;  %v5866_v22 = vmax.f32 %v5834_v56, 0.0  ;;  %vm9749_vm10 = vmmov %vm9730_vm0 }
 0x377   : > { %5895 = vst.msk [vmem:[%s9367_s6 + $0x40] sm:$0xff] %vm9735_vm14, %v5863_v38  ;;  %v5864_v58 = vmax.f32 %v5832_v54, 0.0  ;;  %vm9750_vm14 = vmmov %vm9730_vm0 }
 0x378   : > { %5898 = vst.msk [vmem:[%s9367_s6 + $0x58] sm:$0xff] %vm9736_vm15, %v5866_v22  ;;  %vm9751_vm15 = vmmov %vm9730_vm0 }
 0x379   : > { %5896 = vst.msk [vmem:[%s9367_s6 + $0x48] sm:$0xff] %vm9737_vm3, %v5864_v58  ;;  %vm9752_vm3 = vmmov %vm9730_vm0 }
 0x38f   : > { %v6544_v29 = vpop.f32.mrb[12].mxu1 }
 0x390   : > { %v5753_v60 = vadd.f32 %v6544_v29, %v9353_v47  ;;  %v5744_v1 = vpop.f32.mrb[13].mxu1 }
 0x391   : > { %v5745_v59 = vadd.f32 %v9353_v47, %v5744_v1  ;;  %v6545_v17 = vpop.f32.mrb[14].mxu1  ;;  %v6816_v1 = vld [vmem:[%s6925_s24 + $0xd0] sm:$0xff] }
 0x392   : > { %v5837_v8 = vadd.f32 %v6804_v23, %v5753_v60  ;;  %v5756_v43 = vadd.f32 %v6545_v17, %v9353_v47  ;;  %v5747_v53 = vpop.f32.mrb[15].mxu1 }
 0x393   : > { %v5835_v51 = vadd.f32 %v6805_v39, %v5745_v59  ;;  %v5748_v12 = vadd.f32 %v9353_v47, %v5747_v53 }
 0x394   : > { %v5869_v28 = vmax.f32 %v5837_v8, 0.0  ;;  %v5838_v9 = vadd.f32 %v6806_v41, %v5756_v43  ;;  %v6817_v8 = vld [vmem:[%s6925_s24 + $0xc0] sm:$0xff]  ;;  %v6819_v41 = vld [vmem:[%s6925_s24 + $0xc8] sm:$0xff] }
 0x395   : > { %v5867_v19 = vmax.f32 %v5835_v51, 0.0  ;;  %v5836_v62 = vadd.f32 %v6807_v61, %v5748_v12  ;;  %v6818_v51 = vld [vmem:[%s6925_s24 + $0xd8] sm:$0xff] }
 0x396   : > { %5901 = vst.msk [vmem:[%s9367_s6 + $0x70] sm:$0xff] %vm9738_vm9, %v5869_v28  ;;  %v5870_v32 = vmax.f32 %v5838_v9, 0.0  ;;  %vm9753_vm9 = vmmov %vm9730_vm0 }
 0x397   : > { %5899 = vst.msk [vmem:[%s9367_s6 + $0x60] sm:$0xff] %vm9739_vm7, %v5867_v19  ;;  %v5868_v30 = vmax.f32 %v5836_v62, 0.0  ;;  %vm9754_vm7 = vmmov %vm9730_vm0 }
 0x398   : > { %5902 = vst.msk [vmem:[%s9367_s6 + $0x78] sm:$0xff] %vm9740_vm12, %v5870_v32  ;;  %vm9755_vm12 = vmmov %vm9730_vm0 }
 0x399   : > { %5900 = vst.msk [vmem:[%s9367_s6 + $0x68] sm:$0xff] %vm9741_vm8, %v5868_v30  ;;  %vm9756_vm8 = vmmov %vm9730_vm0 }
 0x3a6   : > { %v6548_v33 = vpop.f32.mrb[16].mxu1 }
 0x3a7   : > { %v5769_v26 = vadd.f32 %v6548_v33, %v9353_v47  ;;  %v5760_v52 = vpop.f32.mrb[17].mxu1 }
 0x3a8   : > { %v5761_v11 = vadd.f32 %v9353_v47, %v5760_v52  ;;  %v6549_v55 = vpop.f32.mrb[18].mxu1  ;;  %v6820_v52 = vld [vmem:[%s6925_s24 + $0xf0] sm:$0xff] }
 0x3a9   : > { %v5841_v13 = vadd.f32 %v6808_v0, %v5769_v26  ;;  %v5772_v50 = vadd.f32 %v6549_v55, %v9353_v47  ;;  %v5763_v42 = vpop.f32.mrb[19].mxu1 }
 0x3aa   : > { %v5839_v18 = vadd.f32 %v6809_v7, %v5761_v11  ;;  %v5764_v34 = vadd.f32 %v9353_v47, %v5763_v42 }
 0x3ab   : > { %v5873_v24 = vmax.f32 %v5841_v13, 0.0  ;;  %v5842_v36 = vadd.f32 %v6810_v48, %v5772_v50  ;;  %v6821_v13 = vld [vmem:[%s6925_s24 + $0xe0] sm:$0xff]  ;;  %v6823_v48 = vld [vmem:[%s6925_s24 + $0xe8] sm:$0xff] }
 0x3ac   : > { %v5871_v10 = vmax.f32 %v5839_v18, 0.0  ;;  %v5840_v6 = vadd.f32 %v6811_v57, %v5764_v34  ;;  %v6822_v18 = vld [vmem:[%s6925_s24 + $0xf8] sm:$0xff] }
 0x3ad   : > { %5905 = vst.msk [vmem:[%s9367_s6 + $0x90] sm:$0xff] %vm9742_vm11, %v5873_v24  ;;  %v5874_v15 = vmax.f32 %v5842_v36, 0.0 }
 0x3ae   : > { %5903 = vst.msk [vmem:[%s9367_s6 + $0x80] sm:$0xff] %vm9743_vm4, %v5871_v10  ;;  %v5872_v35 = vmax.f32 %v5840_v6, 0.0 }
 0x3af   : > { %5906 = vst.msk [vmem:[%s9367_s6 + $0x98] sm:$0xff] %vm9744_vm5, %v5874_v15 }
 0x3b0   : > { %5904 = vst.msk [vmem:[%s9367_s6 + $0x88] sm:$0xff] %vm9745_vm13, %v5872_v35 }
 0x3ce   : > { %v6552_v20 = vpop.f32.mrb[20].mxu1 }
 0x3cf   : > { %v5785_v3 = vadd.f32 %v6552_v20, %v9353_v47  ;;  %v5776_v14 = vpop.f32.mrb[21].mxu1 }
 0x3d0   : > { %v5777_v4 = vadd.f32 %v9353_v47, %v5776_v14  ;;  %v6553_v5 = vpop.f32.mrb[22].mxu1 }
 0x3d1   : > { %v5845_v37 = vadd.f32 %v6812_v31, %v5785_v3  ;;  %v5788_v21 = vadd.f32 %v6553_v5, %v9353_v47  ;;  %v5779_v44 = vpop.f32.mrb[23].mxu1 }
 0x3d2   : > { %v5843_v25 = vadd.f32 %v6813_v2, %v5777_v4  ;;  %v5780_v16 = vadd.f32 %v9353_v47, %v5779_v44 }
 0x3d3   : > { %v5877_v45 = vmax.f32 %v5845_v37, 0.0  ;;  %v5846_v63 = vadd.f32 %v6814_v27, %v5788_v21 }
 0x3d4   : > { %v5875_v40 = vmax.f32 %v5843_v25, 0.0  ;;  %v5844_v56 = vadd.f32 %v6815_v49, %v5780_v16 }
 0x3d5   : > { %5909 = vst.msk [vmem:[%s9367_s6 + $0xb0] sm:$0xff] %vm9730_vm0, %v5877_v45  ;;  %v5878_v38 = vmax.f32 %v5846_v63, 0.0 }
 0x3d6   : > { %5907 = vst.msk [vmem:[%s9367_s6 + $0xa0] sm:$0xff] %vm9746_vm1, %v5875_v40  ;;  %v5876_v46 = vmax.f32 %v5844_v56, 0.0 }
 0x3d7   : > { %5910 = vst.msk [vmem:[%s9367_s6 + $0xb8] sm:$0xff] %vm9747_vm2, %v5878_v38 }
 0x3d8   : > { %5908 = vst.msk [vmem:[%s9367_s6 + $0xa8] sm:$0xff] %vm9748_vm6, %v5876_v46 }
 0x3f6   : > { %v6556_v54 = vpop.f32.mrb[24].mxu1 }
 0x3f7   : > { %v5801_v22 = vadd.f32 %v6556_v54, %v9353_v47  ;;  %v5792_v58 = vpop.f32.mrb[25].mxu1 }
 0x3f8   : > { %v5793_v29 = vadd.f32 %v9353_v47, %v5792_v58  ;;  %v6557_v60 = vpop.f32.mrb[26].mxu1 }
 0x3f9   : > { %v5849_v59 = vadd.f32 %v6816_v1, %v5801_v22  ;;  %v5804_v17 = vadd.f32 %v6557_v60, %v9353_v47  ;;  %v5795_v23 = vpop.f32.mrb[27].mxu1 }
 0x3fa   : > { %v5847_v43 = vadd.f32 %v6817_v8, %v5793_v29  ;;  %v5796_v53 = vadd.f32 %v9353_v47, %v5795_v23 }
 0x3fb   : > { %v5881_v39 = vmax.f32 %v5849_v59, 0.0  ;;  %v5850_v12 = vadd.f32 %v6818_v51, %v5804_v17 }
 0x3fc   : > { %v5879_v28 = vmax.f32 %v5847_v43, 0.0  ;;  %v5848_v9 = vadd.f32 %v6819_v41, %v5796_v53 }
 0x3fd   : > { %5913 = vst.msk [vmem:[%s9367_s6 + $0xd0] sm:$0xff] %vm9749_vm10, %v5881_v39  ;;  %v5882_v19 = vmax.f32 %v5850_v12, 0.0 }
 0x3fe   : > { %5911 = vst.msk [vmem:[%s9367_s6 + $0xc0] sm:$0xff] %vm9750_vm14, %v5879_v28  ;;  %v5880_v61 = vmax.f32 %v5848_v9, 0.0 }
 0x3ff   : > { %5914 = vst.msk [vmem:[%s9367_s6 + $0xd8] sm:$0xff] %vm9751_vm15, %v5882_v19 }
 0x400   : > { %5912 = vst.msk [vmem:[%s9367_s6 + $0xc8] sm:$0xff] %vm9752_vm3, %v5880_v61 }
 0x41a   : > { %v6560_v62 = vpop.f32.mrb[28].mxu1 }
 0x41b   : > { %v5817_v32 = vadd.f32 %v6560_v62, %v9353_v47  ;;  %v5808_v30 = vpop.f32.mrb[29].mxu1 }
 0x41c   : > { %v5809_v33 = vadd.f32 %v9353_v47, %v5808_v30  ;;  %v6561_v26 = vpop.f32.mrb[30].mxu1 }
 0x41d   : > { %v5853_v11 = vadd.f32 %v6820_v52, %v5817_v32  ;;  %v5820_v55 = vadd.f32 %v6561_v26, %v9353_v47  ;;  %v5811_v0 = vpop.f32.mrb[31].mxu1 }
 0x41e   : > { %v5851_v50 = vadd.f32 %v6821_v13, %v5809_v33  ;;  %v5812_v42 = vadd.f32 %v9353_v47, %v5811_v0 }
 0x41f   : > { %v5885_v7 = vmax.f32 %v5853_v11, 0.0  ;;  %v5854_v34 = vadd.f32 %v6822_v18, %v5820_v55 }
 0x420   : > { %v5883_v24 = vmax.f32 %v5851_v50, 0.0  ;;  %v5852_v36 = vadd.f32 %v6823_v48, %v5812_v42 }
 0x421   : > { %5917 = vst.msk [vmem:[%s9367_s6 + $0xf0] sm:$0xff] %vm9753_vm9, %v5885_v7  ;;  %v5886_v10 = vmax.f32 %v5854_v34, 0.0 }
 0x422   : > { %5915 = vst.msk [vmem:[%s9367_s6 + $0xe0] sm:$0xff] %vm9754_vm7, %v5883_v24  ;;  %v5884_v57 = vmax.f32 %v5852_v36, 0.0 }
 0x423   : > { %5918 = vst.msk [vmem:[%s9367_s6 + $0xf8] sm:$0xff] %vm9755_vm12, %v5886_v10 }
 0x424   : > { %5916 = vst.msk [vmem:[%s9367_s6 + $0xe8] sm:$0xff] %vm9756_vm8, %v5884_v57 }
 0x425 PF: > { %s15_s18 = sadd.s32 1, %s6830_s18  }
 0x426   : > { %p12_p4 = scmp.ge.s32.totalorder %s15_s18, 4  }
 0x428   :  { %14 = sbr.rel (!%p12_p4) target bundleno = 1 (0x1), region = 70 }

</bundles_post_ra>
